<compile_context>
chip_gen: v7x
topology: tpu7x:2x2x1
jax: 0.10.0
libtpu: 0.0.40
codegen_flags: <defaults>
</compile_context>

<pallas_src>
import math
from functools import partial

import jax
import jax.numpy as jnp
from jax import lax
from jax.experimental import pallas as pl
from jax.experimental.pallas import tpu as pltpu

# exact (erf) GELU matches torch.nn.GELU(); flip on v5e if the MLP becomes
# VALU-bound (tanh form runs on the otherwise-idle EUP).
_USE_TANH_GELU = False


# --------------------------------------------------------------------------
# Generation-aware sizing helpers (trace-time Python only)
# --------------------------------------------------------------------------
def _tpu_gen():
    try:
        kind = jax.devices()[0].device_kind.lower()
    except Exception:
        return None
    if "7" in kind:
        return 7
    if "v6" in kind or "6e" in kind:
        return 6
    if "v5" in kind or "5e" in kind or "5p" in kind:
        return 5
    return None


def _vmem_limit_bytes():
    cap = None
    try:
        cap = int(pltpu.get_tpu_info().vmem_capacity_bytes)
    except Exception:
        cap = None
    if cap is None or cap <= 0:
        gen = _tpu_gen()
        cap = (64 << 20) if (gen is None or gen >= 7) else (128 << 20)
    # ~25% headroom, never above 100 MiB
    return int(min((cap * 3) // 4, 100 << 20))


def _divisor_block(n, target):
    """Largest multiple-of-8 divisor of n that is <= target (prefers exact
    divisors so no block runs LayerNorm on masked/uninitialized rows)."""
    if n <= target:
        return n
    t = max(8, (target // 8) * 8)
    for cand in range(t, 7, -8):
        if n % cand == 0:
            return cand
    return t


def _fused_row_block(n, d):
    gen = _tpu_gen()
    # v7x: smaller VMEM (64 MiB) and 2 TensorCores -> smaller blocks / >=2 programs.
    # v5e/v6e: single TC, 128 MiB VMEM -> avoid splitting small N.
    target = 256 if (gen is None or gen >= 7) else 1024
    if d >= 2048:
        target = max(128, target // 2)
    return _divisor_block(n, target)


def _conv_row_block(boh, kw_rows, d):
    budget_rows = max(1, (4 << 20) // max(1, kw_rows * d * 2))
    target = max(1, min(boh, budget_rows, 64))
    for cand in range(target, 0, -1):
        if boh % cand == 0:
            return cand
    return target


# --------------------------------------------------------------------------
# Kernel 1: fused q/k/v projection MLPs + MHA k/v in_proj epilogue.
#   For each group i in {q, k, v}:
#       y_i = LayerNorm(GELU(x @ W1_i + b1_i) @ W2_i + b2_i)
#   q output is stored directly (feeds the conv); for k/v the MHA in_proj
#   (y_i @ Wkv_i + bkv_i) is fused and the projected result is stored (bf16).
# --------------------------------------------------------------------------
def _gelu(h):
    if _USE_TANH_GELU:
        c = math.sqrt(2.0 / math.pi)
        return 0.5 * h * (1.0 + jnp.tanh(c * (h + 0.044715 * h * h * h)))
    return 0.5 * h * (1.0 + lax.erf(h * (1.0 / math.sqrt(2.0))))


def _fused_proj_kernel(x_ref, w1_ref, b1_ref, w2_ref, b2_ref, g_ref, beta_ref,
                       wkv_ref, bkv_ref, q_ref, kp_ref, vp_ref):
    x = x_ref[...].astype(jnp.bfloat16)                               # (RB, D)
    for idx, out_ref in enumerate((q_ref, kp_ref, vp_ref)):
        h = jnp.dot(x, w1_ref[idx], preferred_element_type=jnp.float32) + b1_ref[idx]
        h = _gelu(h)
        y = jnp.dot(h.astype(jnp.bfloat16), w2_ref[idx],
                    preferred_element_type=jnp.float32) + b2_ref[idx]
        mu = jnp.mean(y, axis=-1, keepdims=True)
        var = jnp.mean(jnp.square(y - mu), axis=-1, keepdims=True)
        y = (y - mu) * lax.rsqrt(var + 1e-6) * g_ref[idx] + beta_ref[idx]
        if idx == 0:
            out_ref[...] = y.astype(out_ref.dtype)                    # q MLP output
        else:
            # fused nn.MultiheadAttention k/v in_proj
            p = jnp.dot(y.astype(jnp.bfloat16), wkv_ref[idx - 1],
                        preferred_element_type=jnp.float32) + bkv_ref[idx - 1]
            out_ref[...] = p.astype(out_ref.dtype)


def fused_proj(x2, w1s, b1s, w2s, b2s, gs, betas, wkv, bkv, *, vmem_limit):
    N, D = x2.shape
    rb = _fused_row_block(N, D)
    row = pl.BlockSpec((rb, D), lambda i: (i, 0))
    c2 = lambda i: (0, 0)
    c3 = lambda i: (0, 0, 0)
    out_sds = jax.ShapeDtypeStruct((N, D), jnp.bfloat16)
    return pl.pallas_call(
        _fused_proj_kernel,
        out_shape=(out_sds, out_sds, out_sds),
        grid=(pl.cdiv(N, rb),),
        in_specs=[
            row,                                   # x rows
            pl.BlockSpec((3, D, D), c3),           # W1 q/k/v (bf16)
            pl.BlockSpec((3, D), c2),              # b1
            pl.BlockSpec((3, D, D), c3),           # W2 q/k/v (bf16)
            pl.BlockSpec((3, D), c2),              # b2
            pl.BlockSpec((3, D), c2),              # LN gamma
            pl.BlockSpec((3, D), c2),              # LN beta
            pl.BlockSpec((2, D, D), c3),           # MHA Wk/Wv (bf16)
            pl.BlockSpec((2, D), c2),              # MHA bk/bv
        ],
        out_specs=(row, row, row),
        compiler_params=pltpu.CompilerParams(
            dimension_semantics=("parallel",), vmem_limit_bytes=vmem_limit),
    )(x2, w1s, b1s, w2s, b2s, gs, betas, wkv, bkv)


# --------------------------------------------------------------------------
# Kernel 2a: depthwise Conv2d, non-overlapping (stride == kernel_size).
# Input is (B*OH, K*W, D): K contiguous image rows per output row — a pure
# (free) reshape of the q MLP output, no HBM gather.
# --------------------------------------------------------------------------
def _make_dwconv_kernel(K, W, OW):
    def kernel(x_ref, w_ref, b_ref, o_ref):
        rows = x_ref.shape[0]
        D = x_ref.shape[2]
        base = jnp.zeros((rows, D), jnp.float32) + b_ref[...].astype(jnp.float32)
        for ow in range(OW):
            acc = base
            for ki in range(K):
                off = ki * W + ow * K
                for kj in range(K):
                    acc = acc + (x_ref[:, off + kj, :].astype(jnp.float32)
                                 * w_ref[ki * K + kj].astype(jnp.float32))
            o_ref[:, ow, :] = acc.astype(o_ref.dtype)
    return kernel


def dwconv_nonoverlap(qf3, w_flat, bias, *, K, W, OW, vmem_limit):
    BOH, KW, D = qf3.shape
    rbo = _conv_row_block(BOH, KW, D)
    return pl.pallas_call(
        _make_dwconv_kernel(K, W, OW),
        out_shape=jax.ShapeDtypeStruct((BOH, OW, D), jnp.bfloat16),
        grid=(pl.cdiv(BOH, rbo),),
        in_specs=[
            pl.BlockSpec((rbo, KW, D), lambda i: (i, 0, 0)),
            pl.BlockSpec((K * K, D), lambda i: (0, 0)),
            pl.BlockSpec((1, D), lambda i: (0, 0)),
        ],
        out_specs=pl.BlockSpec((rbo, OW, D), lambda i: (i, 0, 0)),
        compiler_params=pltpu.CompilerParams(
            dimension_semantics=("parallel",), vmem_limit_bytes=vmem_limit),
    )(qf3, w_flat, bias)


# --------------------------------------------------------------------------
# Kernel 2b: depthwise Conv2d fallback for overlapping stride.  Patches are
# gathered wrapper-side, laid out tap-major (K*K, N, D) so each tap read is a
# contiguous lane-dense (RB, D) tile.
# --------------------------------------------------------------------------
def _dwconv_patches_kernel(x_ref, w_ref, b_ref, o_ref):
    kk = x_ref.shape[0]
    acc = jnp.zeros(o_ref.shape, jnp.float32) + b_ref[...].astype(jnp.float32)
    for t in range(kk):
        acc = acc + x_ref[t].astype(jnp.float32) * w_ref[t].astype(jnp.float32)
    o_ref[...] = acc.astype(o_ref.dtype)


def dwconv_patches(patches, w_flat, bias, *, vmem_limit):
    KK, N2, D = patches.shape
    rb = _divisor_block(N2, 512)
    return pl.pallas_call(
        _dwconv_patches_kernel,
        out_shape=jax.ShapeDtypeStruct((N2, D), jnp.bfloat16),
        grid=(pl.cdiv(N2, rb),),
        in_specs=[
            pl.BlockSpec((KK, rb, D), lambda i: (0, i, 0)),
            pl.BlockSpec((KK, D), lambda i: (0, 0)),
            pl.BlockSpec((1, D), lambda i: (0, 0)),
        ],
        out_specs=pl.BlockSpec((rb, D), lambda i: (i, 0)),
        compiler_params=pltpu.CompilerParams(
            dimension_semantics=("parallel",), vmem_limit_bytes=vmem_limit),
    )(patches, w_flat, bias)


def _extract_patches_tapmajor(x_bhwd, K, S):
    """Wrapper-side gather for the overlapping case: (B,H,W,D) -> (K*K, B*OH*OW, D)."""
    B, H, W, D = x_bhwd.shape
    OH = (H - K) // S + 1
    OW = (W - K) // S + 1
    ridx = (jnp.arange(OH)[:, None] * S + jnp.arange(K)[None, :]).reshape(-1)
    cidx = (jnp.arange(OW)[:, None] * S + jnp.arange(K)[None, :]).reshape(-1)
    xg = jnp.take(x_bhwd, ridx, axis=1)                   # (B, OH*K, W, D)
    xg = jnp.take(xg, cidx, axis=2)                       # (B, OH*K, OW*K, D)
    xg = xg.reshape(B, OH, K, OW, K, D).transpose(2, 4, 0, 1, 3, 5)
    return xg.reshape(K * K, B * OH * OW, D), OH, OW


# --------------------------------------------------------------------------
# Kernel 3: nn.MultiheadAttention core.  q in_proj (scale folded), per-head
# softmax attention with dot_general scores, ctx packed into a (Tq, D) bf16
# scratch, single fused out_proj.  k/v are already projected (kernel 1).
# --------------------------------------------------------------------------
def _make_mha_kernel(num_heads, head_dim):
    def kernel(qc_ref, kp_ref, vp_ref, wq_ref, bq_ref, wo_ref, bo_ref,
               o_ref, qp_s, ctx_s):
        # q in_proj (1/sqrt(head_dim) pre-folded into wq/bq by the wrapper)
        qp = jnp.dot(qc_ref[0], wq_ref[...],
                     preferred_element_type=jnp.float32) + bq_ref[...]
        qp_s[...] = qp.astype(qp_s.dtype)
        for h in range(num_heads):
            lo = h * head_dim
            qh = qp_s[:, lo:lo + head_dim]                         # (Tq, hd) bf16
            kh = kp_ref[0, :, lo:lo + head_dim]                    # (Tk, hd) bf16
            vh = vp_ref[0, :, lo:lo + head_dim]                    # (Tk, hd) bf16
            # contract last dims of both operands: MXU does the "transposed"
            # contraction natively, no XLU transpose, no (hd, Tk) copy.
            s = lax.dot_general(qh, kh, (((1,), (1,)), ((), ())),
                                preferred_element_type=jnp.float32)  # (Tq, Tk)
            m = jnp.max(s, axis=-1, keepdims=True)
            p = jnp.exp(s - m)
            denom = jnp.sum(p, axis=-1, keepdims=True)
            ctx = jnp.dot(p.astype(jnp.bfloat16), vh,
                          preferred_element_type=jnp.float32)        # (Tq, hd)
            # normalize after the PV matmul: (Tq, hd) VPU work instead of (Tq, Tk)
            ctx = ctx * pl.reciprocal(denom, approx=True)
            ctx_s[:, lo:lo + head_dim] = ctx.astype(ctx_s.dtype)
        out = jnp.dot(ctx_s[...], wo_ref[...],
                      preferred_element_type=jnp.float32) + bo_ref[...]
        o_ref[0] = out.astype(o_ref.dtype)
    return kernel


def mha_core(qc, kp, vp, wq_s, bq_s, wo_t, bo, num_heads, *, vmem_limit, out_dtype):
    B, Tq, D = qc.shape
    _, Tk, _ = kp.shape
    hd = D // num_heads
    c2 = lambda b: (0, 0)
    return pl.pallas_call(
        _make_mha_kernel(num_heads, hd),
        out_shape=jax.ShapeDtypeStruct((B, Tq, D), out_dtype),
        grid=(B,),
        in_specs=[
            pl.BlockSpec((1, Tq, D), lambda b: (b, 0, 0)),
            pl.BlockSpec((1, Tk, D), lambda b: (b, 0, 0)),
            pl.BlockSpec((1, Tk, D), lambda b: (b, 0, 0)),
            pl.BlockSpec((D, D), c2),   # Wq (scale folded, bf16)
            pl.BlockSpec((1, D), c2),   # bq (scaled)
            pl.BlockSpec((D, D), c2),   # Wo (bf16)
            pl.BlockSpec((1, D), c2),   # bo
        ],
        out_specs=pl.BlockSpec((1, Tq, D), lambda b: (b, 0, 0)),
        scratch_shapes=[pltpu.VMEM((Tq, D), jnp.bfloat16),   # projected q
                        pltpu.VMEM((Tq, D), jnp.bfloat16)],  # packed per-head ctx
        compiler_params=pltpu.CompilerParams(
            dimension_semantics=("parallel",), vmem_limit_bytes=vmem_limit),
    )(qc, kp, vp, wq_s, bq_s, wo_t, bo)


# --------------------------------------------------------------------------
# Module wrapper
# --------------------------------------------------------------------------
def init_params(key, embed_dim, kernel_size, scale=0.05):
    D, K = embed_dim, kernel_size
    keys = jax.random.split(key, 32)
    ki = iter(keys)

    def mlp_params():
        return dict(
            w1=scale * jax.random.normal(next(ki), (D, D), jnp.float32),
            b1=scale * jax.random.normal(next(ki), (D,), jnp.float32),
            w2=scale * jax.random.normal(next(ki), (D, D), jnp.float32),
            b2=scale * jax.random.normal(next(ki), (D,), jnp.float32),
            gamma=jnp.ones((D,), jnp.float32),
            beta=jnp.zeros((D,), jnp.float32),
        )

    return dict(
        q_proj=mlp_params(),
        k_proj=mlp_params(),
        v_proj=mlp_params(),
        # depthwise conv weight stored as (K, K, D)  (PyTorch: (D, 1, K, K))
        conv_w=scale * jax.random.normal(next(ki), (K, K, D), jnp.float32),
        conv_b=scale * jax.random.normal(next(ki), (D,), jnp.float32),
        # MHA in_proj / out_proj stored pre-transposed for x @ W
        wq=scale * jax.random.normal(next(ki), (D, D), jnp.float32),
        wk=scale * jax.random.normal(next(ki), (D, D), jnp.float32),
        wv=scale * jax.random.normal(next(ki), (D, D), jnp.float32),
        bq=scale * jax.random.normal(next(ki), (D,), jnp.float32),
        bk=scale * jax.random.normal(next(ki), (D,), jnp.float32),
        bv=scale * jax.random.normal(next(ki), (D,), jnp.float32),
        wo=scale * jax.random.normal(next(ki), (D, D), jnp.float32),
        bo=scale * jax.random.normal(next(ki), (D,), jnp.float32),
    )


@partial(jax.jit, static_argnames=("num_heads", "kernel_size", "stride"))
def token_conv_attention(hidden_states, params, *, num_heads, kernel_size, stride):
    """hidden_states: (B, T, D) with T a perfect square (token grid)."""
    B, T, D = hidden_states.shape
    grid_hw = int(round(T ** 0.5))
    assert grid_hw * grid_hw == T, "token count must be a perfect square"
    head_dim = D // num_heads
    assert head_dim * num_heads == D
    vlim = _vmem_limit_bytes()

    pq, pk, pv = params["q_proj"], params["k_proj"], params["v_proj"]
    w1s = jnp.stack([pq["w1"], pk["w1"], pv["w1"]]).astype(jnp.bfloat16)
    b1s = jnp.stack([pq["b1"], pk["b1"], pv["b1"]])
    w2s = jnp.stack([pq["w2"], pk["w2"], pv["w2"]]).astype(jnp.bfloat16)
    b2s = jnp.stack([pq["b2"], pk["b2"], pv["b2"]])
    gs = jnp.stack([pq["gamma"], pk["gamma"], pv["gamma"]])
    betas = jnp.stack([pq["beta"], pk["beta"], pv["beta"]])
    # MHA k/v in_proj is fused into the projection-MLP kernel (hoisted out of
    # the per-batch attention program).
    wkv = jnp.stack([params["wk"], params["wv"]]).astype(jnp.bfloat16)
    bkv = jnp.stack([params["bk"], params["bv"]])

    x2 = hidden_states.reshape(B * T, D)
    qf, kp, vp = fused_proj(x2, w1s, b1s, w2s, b2s, gs, betas, wkv, bkv,
                            vmem_limit=vlim)
    kp = kp.reshape(B, T, D)
    vp = vp.reshape(B, T, D)

    conv_w_flat = params["conv_w"].reshape(kernel_size * kernel_size, D)
    conv_b = params["conv_b"].reshape(1, D)
    if stride == kernel_size and grid_hw % kernel_size == 0:
        # non-overlapping conv: K contiguous image rows per output row are a
        # free reshape of the q MLP output -> no HBM patch round trip.
        OH = OW = grid_hw // kernel_size
        qf3 = qf.reshape(B * OH, kernel_size * grid_hw, D)
        qc = dwconv_nonoverlap(qf3, conv_w_flat, conv_b,
                               K=kernel_size, W=grid_hw, OW=OW, vmem_limit=vlim)
        qc = qc.reshape(B, OH * OW, D)
    else:
        # TODO(synk): overlapping stride < kernel_size still gathers patches on
        # the XLA side (jnp.take) before the tap-major Pallas conv kernel.
        q2d = qf.reshape(B, grid_hw, grid_hw, D)
        patches, OH, OW = _extract_patches_tapmajor(q2d, kernel_size, stride)
        qc = dwconv_patches(patches, conv_w_flat, conv_b, vmem_limit=vlim)
        qc = qc.reshape(B, OH * OW, D)

    scale = 1.0 / math.sqrt(head_dim)
    wq_s = (params["wq"] * scale).astype(jnp.bfloat16)   # fold softmax scale
    bq_s = (params["bq"] * scale).reshape(1, D)
    wo_t = params["wo"].astype(jnp.bfloat16)
    bo = params["bo"].reshape(1, D)

    out = mha_core(qc, kp, vp, wq_s, bq_s, wo_t, bo, num_heads,
                   vmem_limit=vlim, out_dtype=hidden_states.dtype)
    return out                                            # (B, OH*OW, D)


if __name__ == "__main__":
    # small config: visual_token_count=16 (4x4 grid), embed_dim=256,
    # 2 heads (head_dim=128 -> lane-aligned per-head slices),
    # depthwise conv kernel=2 stride=2 -> 4 compressed query tokens
    B, T, D = 2, 16, 256
    NUM_HEADS = 2
    KSIZE, STRIDE = 2, 2

    key = jax.random.PRNGKey(0)
    k_x, k_p = jax.random.split(key)
    x = jax.random.normal(k_x, (B, T, D), jnp.float32)
    params = init_params(k_p, D, KSIZE)

    out = token_conv_attention(x, params, num_heads=NUM_HEADS,
                               kernel_size=KSIZE, stride=STRIDE)
    out = jax.block_until_ready(out)

    grid_hw = int(round(T ** 0.5))
    oh = (grid_hw - KSIZE) // STRIDE + 1
    assert out.shape == (B, oh * oh, D), out.shape
    assert bool(jnp.all(jnp.isfinite(out)))
    print("KERNEL_OK")
</pallas_src>

<mosaic_0001>
module attributes {stable_mosaic.version = 11 : i64} {
  func.func @kernel(%arg0: i32, %arg1: memref<4x8x256xbf16, #tpu.memory_space<vmem>>, %arg2: memref<4x256xf32, #tpu.memory_space<vmem>>, %arg3: memref<1x256xf32, #tpu.memory_space<vmem>>, %arg4: memref<4x2x256xbf16, #tpu.memory_space<vmem>>) attributes {dimension_semantics = [#tpu.dimension_semantics<parallel>], iteration_bounds = array<i64: 1>, scalar_prefetch = 0 : i64, scratch_operands = 0 : i64, tpu.core_type = #tpu.core_type<tc>, window_params = [{transform_indices = @transform_0, window_bounds = array<i64: 4, 8, 256>}, {pipeline_mode = #tpu.pipeline_mode<synchronous>, transform_indices = @transform_1, window_bounds = array<i64: 4, 256>}, {pipeline_mode = #tpu.pipeline_mode<synchronous>, transform_indices = @transform_2, window_bounds = array<i64: 1, 256>}, {transform_indices = @transform_3, window_bounds = array<i64: 4, 2, 256>}]} {
    %cst = arith.constant 0.000000e+00 : f32
    %0 = vector.broadcast %cst : f32 to vector<4x256xf32>
    %c0 = arith.constant 0 : index
    %c0_0 = arith.constant 0 : index
    %1 = vector.load %arg3[%c0, %c0_0] : memref<1x256xf32, #tpu.memory_space<vmem>>, vector<1x256xf32>
    %2 = vector.broadcast %1 : vector<1x256xf32> to vector<4x256xf32>
    %3 = arith.addf %0, %2 : vector<4x256xf32>
    %c0_1 = arith.constant 0 : index
    %c0_2 = arith.constant 0 : index
    %c0_3 = arith.constant 0 : index
    %4 = vector.load %arg1[%c0_1, %c0_2, %c0_3] : memref<4x8x256xbf16, #tpu.memory_space<vmem>>, vector<4x1x256xbf16>
    %5 = vector.shape_cast %4 : vector<4x1x256xbf16> to vector<4x256xbf16>
    %6 = arith.extf %5 : vector<4x256xbf16> to vector<4x256xf32>
    %c0_4 = arith.constant 0 : index
    %c0_5 = arith.constant 0 : index
    %7 = vector.load %arg2[%c0_4, %c0_5] : memref<4x256xf32, #tpu.memory_space<vmem>>, vector<1x256xf32>
    %8 = vector.shape_cast %7 : vector<1x256xf32> to vector<256xf32>
    %9 = vector.shape_cast %8 : vector<256xf32> to vector<1x256xf32>
    %10 = vector.broadcast %9 : vector<1x256xf32> to vector<4x256xf32>
    %11 = arith.mulf %6, %10 : vector<4x256xf32>
    %12 = arith.addf %3, %11 : vector<4x256xf32>
    %c0_6 = arith.constant 0 : index
    %c1 = arith.constant 1 : index
    %c0_7 = arith.constant 0 : index
    %13 = vector.load %arg1[%c0_6, %c1, %c0_7] : memref<4x8x256xbf16, #tpu.memory_space<vmem>>, vector<4x1x256xbf16>
    %14 = vector.shape_cast %13 : vector<4x1x256xbf16> to vector<4x256xbf16>
    %15 = arith.extf %14 : vector<4x256xbf16> to vector<4x256xf32>
    %c1_8 = arith.constant 1 : index
    %c0_9 = arith.constant 0 : index
    %16 = vector.load %arg2[%c1_8, %c0_9] : memref<4x256xf32, #tpu.memory_space<vmem>>, vector<1x256xf32>
    %17 = vector.shape_cast %16 : vector<1x256xf32> to vector<256xf32>
    %18 = vector.shape_cast %17 : vector<256xf32> to vector<1x256xf32>
    %19 = vector.broadcast %18 : vector<1x256xf32> to vector<4x256xf32>
    %20 = arith.mulf %15, %19 : vector<4x256xf32>
    %21 = arith.addf %12, %20 : vector<4x256xf32>
    %c0_10 = arith.constant 0 : index
    %c4 = arith.constant 4 : index
    %c0_11 = arith.constant 0 : index
    %22 = vector.load %arg1[%c0_10, %c4, %c0_11] : memref<4x8x256xbf16, #tpu.memory_space<vmem>>, vector<4x1x256xbf16>
    %23 = vector.shape_cast %22 : vector<4x1x256xbf16> to vector<4x256xbf16>
    %24 = arith.extf %23 : vector<4x256xbf16> to vector<4x256xf32>
    %c2 = arith.constant 2 : index
    %c0_12 = arith.constant 0 : index
    %25 = vector.load %arg2[%c2, %c0_12] : memref<4x256xf32, #tpu.memory_space<vmem>>, vector<1x256xf32>
    %26 = vector.shape_cast %25 : vector<1x256xf32> to vector<256xf32>
    %27 = vector.shape_cast %26 : vector<256xf32> to vector<1x256xf32>
    %28 = vector.broadcast %27 : vector<1x256xf32> to vector<4x256xf32>
    %29 = arith.mulf %24, %28 : vector<4x256xf32>
    %30 = arith.addf %21, %29 : vector<4x256xf32>
    %c0_13 = arith.constant 0 : index
    %c5 = arith.constant 5 : index
    %c0_14 = arith.constant 0 : index
    %31 = vector.load %arg1[%c0_13, %c5, %c0_14] : memref<4x8x256xbf16, #tpu.memory_space<vmem>>, vector<4x1x256xbf16>
    %32 = vector.shape_cast %31 : vector<4x1x256xbf16> to vector<4x256xbf16>
    %33 = arith.extf %32 : vector<4x256xbf16> to vector<4x256xf32>
    %c3 = arith.constant 3 : index
    %c0_15 = arith.constant 0 : index
    %34 = vector.load %arg2[%c3, %c0_15] : memref<4x256xf32, #tpu.memory_space<vmem>>, vector<1x256xf32>
    %35 = vector.shape_cast %34 : vector<1x256xf32> to vector<256xf32>
    %36 = vector.shape_cast %35 : vector<256xf32> to vector<1x256xf32>
    %37 = vector.broadcast %36 : vector<1x256xf32> to vector<4x256xf32>
    %38 = arith.mulf %33, %37 : vector<4x256xf32>
    %39 = arith.addf %30, %38 : vector<4x256xf32>
    %40 = arith.truncf %39 : vector<4x256xf32> to vector<4x256xbf16>
    %c0_16 = arith.constant 0 : index
    %c0_17 = arith.constant 0 : index
    %c0_18 = arith.constant 0 : index
    %41 = vector.load %arg4[%c0_16, %c0_17, %c0_18] : memref<4x2x256xbf16, #tpu.memory_space<vmem>>, vector<4x1x256xbf16>
    %42 = vector.shape_cast %41 : vector<4x1x256xbf16> to vector<4x256xbf16>
    %43 = vector.shape_cast %40 : vector<4x256xbf16> to vector<4x1x256xbf16>
    tpu.vector_store %arg4[%c0_16, %c0_17, %c0_18], %43 {strides = array<i32>} : memref<4x2x256xbf16, #tpu.memory_space<vmem>>, vector<4x1x256xbf16>,
    %c0_19 = arith.constant 0 : index
    %c2_20 = arith.constant 2 : index
    %c0_21 = arith.constant 0 : index
    %44 = vector.load %arg1[%c0_19, %c2_20, %c0_21] : memref<4x8x256xbf16, #tpu.memory_space<vmem>>, vector<4x1x256xbf16>
    %45 = vector.shape_cast %44 : vector<4x1x256xbf16> to vector<4x256xbf16>
    %46 = arith.extf %45 : vector<4x256xbf16> to vector<4x256xf32>
    %c0_22 = arith.constant 0 : index
    %c0_23 = arith.constant 0 : index
    %47 = vector.load %arg2[%c0_22, %c0_23] : memref<4x256xf32, #tpu.memory_space<vmem>>, vector<1x256xf32>
    %48 = vector.shape_cast %47 : vector<1x256xf32> to vector<256xf32>
    %49 = vector.shape_cast %48 : vector<256xf32> to vector<1x256xf32>
    %50 = vector.broadcast %49 : vector<1x256xf32> to vector<4x256xf32>
    %51 = arith.mulf %46, %50 : vector<4x256xf32>
    %52 = arith.addf %3, %51 : vector<4x256xf32>
    %c0_24 = arith.constant 0 : index
    %c3_25 = arith.constant 3 : index
    %c0_26 = arith.constant 0 : index
    %53 = vector.load %arg1[%c0_24, %c3_25, %c0_26] : memref<4x8x256xbf16, #tpu.memory_space<vmem>>, vector<4x1x256xbf16>
    %54 = vector.shape_cast %53 : vector<4x1x256xbf16> to vector<4x256xbf16>
    %55 = arith.extf %54 : vector<4x256xbf16> to vector<4x256xf32>
    %c1_27 = arith.constant 1 : index
    %c0_28 = arith.constant 0 : index
    %56 = vector.load %arg2[%c1_27, %c0_28] : memref<4x256xf32, #tpu.memory_space<vmem>>, vector<1x256xf32>
    %57 = vector.shape_cast %56 : vector<1x256xf32> to vector<256xf32>
    %58 = vector.shape_cast %57 : vector<256xf32> to vector<1x256xf32>
    %59 = vector.broadcast %58 : vector<1x256xf32> to vector<4x256xf32>
    %60 = arith.mulf %55, %59 : vector<4x256xf32>
    %61 = arith.addf %52, %60 : vector<4x256xf32>
    %c0_29 = arith.constant 0 : index
    %c6 = arith.constant 6 : index
    %c0_30 = arith.constant 0 : index
    %62 = vector.load %arg1[%c0_29, %c6, %c0_30] : memref<4x8x256xbf16, #tpu.memory_space<vmem>>, vector<4x1x256xbf16>
    %63 = vector.shape_cast %62 : vector<4x1x256xbf16> to vector<4x256xbf16>
    %64 = arith.extf %63 : vector<4x256xbf16> to vector<4x256xf32>
    %c2_31 = arith.constant 2 : index
    %c0_32 = arith.constant 0 : index
    %65 = vector.load %arg2[%c2_31, %c0_32] : memref<4x256xf32, #tpu.memory_space<vmem>>, vector<1x256xf32>
    %66 = vector.shape_cast %65 : vector<1x256xf32> to vector<256xf32>
    %67 = vector.shape_cast %66 : vector<256xf32> to vector<1x256xf32>
    %68 = vector.broadcast %67 : vector<1x256xf32> to vector<4x256xf32>
    %69 = arith.mulf %64, %68 : vector<4x256xf32>
    %70 = arith.addf %61, %69 : vector<4x256xf32>
    %c0_33 = arith.constant 0 : index
    %c7 = arith.constant 7 : index
    %c0_34 = arith.constant 0 : index
    %71 = vector.load %arg1[%c0_33, %c7, %c0_34] : memref<4x8x256xbf16, #tpu.memory_space<vmem>>, vector<4x1x256xbf16>
    %72 = vector.shape_cast %71 : vector<4x1x256xbf16> to vector<4x256xbf16>
    %73 = arith.extf %72 : vector<4x256xbf16> to vector<4x256xf32>
    %c3_35 = arith.constant 3 : index
    %c0_36 = arith.constant 0 : index
    %74 = vector.load %arg2[%c3_35, %c0_36] : memref<4x256xf32, #tpu.memory_space<vmem>>, vector<1x256xf32>
    %75 = vector.shape_cast %74 : vector<1x256xf32> to vector<256xf32>
    %76 = vector.shape_cast %75 : vector<256xf32> to vector<1x256xf32>
    %77 = vector.broadcast %76 : vector<1x256xf32> to vector<4x256xf32>
    %78 = arith.mulf %73, %77 : vector<4x256xf32>
    %79 = arith.addf %70, %78 : vector<4x256xf32>
    %80 = arith.truncf %79 : vector<4x256xf32> to vector<4x256xbf16>
    %c0_37 = arith.constant 0 : index
    %c1_38 = arith.constant 1 : index
    %c0_39 = arith.constant 0 : index
    %81 = vector.load %arg4[%c0_37, %c1_38, %c0_39] : memref<4x2x256xbf16, #tpu.memory_space<vmem>>, vector<4x1x256xbf16>
    %82 = vector.shape_cast %81 : vector<4x1x256xbf16> to vector<4x256xbf16>
    %83 = vector.shape_cast %80 : vector<4x256xbf16> to vector<4x1x256xbf16>
    tpu.vector_store %arg4[%c0_37, %c1_38, %c0_39], %83 {strides = array<i32>} : memref<4x2x256xbf16, #tpu.memory_space<vmem>>, vector<4x1x256xbf16>,
    return
  }
  func.func @transform_0(%arg0: i32) -> (i32, i32, i32) {
    %c0_i32 = arith.constant 0 : i32
    %c0_i32_0 = arith.constant 0 : i32
    %c0_i32_1 = arith.constant 0 : i32
    return %arg0, %c0_i32, %c0_i32_0 : i32, i32, i32
  }
  func.func @transform_1(%arg0: i32) -> (i32, i32) {
    %c0_i32 = arith.constant 0 : i32
    %c0_i32_0 = arith.constant 0 : i32
    %c0_i32_1 = arith.constant 0 : i32
    return %c0_i32, %c0_i32_0 : i32, i32
  }
  func.func @transform_2(%arg0: i32) -> (i32, i32) {
    %c0_i32 = arith.constant 0 : i32
    %c0_i32_0 = arith.constant 0 : i32
    %c0_i32_1 = arith.constant 0 : i32
    return %c0_i32, %c0_i32_0 : i32, i32
  }
  func.func @transform_3(%arg0: i32) -> (i32, i32, i32) {
    %c0_i32 = arith.constant 0 : i32
    %c0_i32_0 = arith.constant 0 : i32
    %c0_i32_1 = arith.constant 0 : i32
    return %arg0, %c0_i32, %c0_i32_0 : i32, i32, i32
  }
}

module attributes {stable_mosaic.version = 11 : i64} {
  func.func @_fused_proj_kernel(%arg0: i32, %arg1: memref<32x256xf32, #tpu.memory_space<vmem>>, %arg2: memref<3x256x256xbf16, #tpu.memory_space<vmem>>, %arg3: memref<3x256xf32, #tpu.memory_space<vmem>>, %arg4: memref<3x256x256xbf16, #tpu.memory_space<vmem>>, %arg5: memref<3x256xf32, #tpu.memory_space<vmem>>, %arg6: memref<3x256xf32, #tpu.memory_space<vmem>>, %arg7: memref<3x256xf32, #tpu.memory_space<vmem>>, %arg8: memref<2x256x256xbf16, #tpu.memory_space<vmem>>, %arg9: memref<2x256xf32, #tpu.memory_space<vmem>>, %arg10: memref<32x256xbf16, #tpu.memory_space<vmem>>, %arg11: memref<32x256xbf16, #tpu.memory_space<vmem>>, %arg12: memref<32x256xbf16, #tpu.memory_space<vmem>>) attributes {dimension_semantics = [#tpu.dimension_semantics<parallel>], iteration_bounds = array<i64: 1>, scalar_prefetch = 0 : i64, scratch_operands = 0 : i64, tpu.core_type = #tpu.core_type<tc>, window_params = [{transform_indices = @transform_0, window_bounds = array<i64: 32, 256>}, {pipeline_mode = #tpu.pipeline_mode<synchronous>, transform_indices = @transform_1, window_bounds = array<i64: 3, 256, 256>}, {pipeline_mode = #tpu.pipeline_mode<synchronous>, transform_indices = @transform_2, window_bounds = array<i64: 3, 256>}, {pipeline_mode = #tpu.pipeline_mode<synchronous>, transform_indices = @transform_3, window_bounds = array<i64: 3, 256, 256>}, {pipeline_mode = #tpu.pipeline_mode<synchronous>, transform_indices = @transform_4, window_bounds = array<i64: 3, 256>}, {pipeline_mode = #tpu.pipeline_mode<synchronous>, transform_indices = @transform_5, window_bounds = array<i64: 3, 256>}, {pipeline_mode = #tpu.pipeline_mode<synchronous>, transform_indices = @transform_6, window_bounds = array<i64: 3, 256>}, {pipeline_mode = #tpu.pipeline_mode<synchronous>, transform_indices = @transform_7, window_bounds = array<i64: 2, 256, 256>}, {pipeline_mode = #tpu.pipeline_mode<synchronous>, transform_indices = @transform_8, window_bounds = array<i64: 2, 256>}, {transform_indices = @transform_9, window_bounds = array<i64: 32, 256>}, {transform_indices = @transform_10, window_bounds = array<i64: 32, 256>}, {transform_indices = @transform_11, window_bounds = array<i64: 32, 256>}]} {
    %c0 = arith.constant 0 : index
    %c0_0 = arith.constant 0 : index
    %0 = vector.load %arg1[%c0, %c0_0] : memref<32x256xf32, #tpu.memory_space<vmem>>, vector<32x256xf32>
    %1 = arith.truncf %0 : vector<32x256xf32> to vector<32x256xbf16>
    %c0_1 = arith.constant 0 : index
    %c0_2 = arith.constant 0 : index
    %c0_3 = arith.constant 0 : index
    %2 = vector.load %arg2[%c0_1, %c0_2, %c0_3] : memref<3x256x256xbf16, #tpu.memory_space<vmem>>, vector<1x256x256xbf16>
    %3 = vector.shape_cast %2 : vector<1x256x256xbf16> to vector<256x256xbf16>
    %cst = arith.constant dense<0.000000e+00> : vector<32x256xf32>
    %4 = tpu.matmul %1, %3, %cst {dimension_numbers = #tpu.dot_dimension_numbers<[1], [0], [0], [1], [0, 0, 1, 1], [], []>} : vector<32x256xbf16>, vector<256x256xbf16>, vector<32x256xf32> -> vector<32x256xf32>
    %c0_4 = arith.constant 0 : index
    %c0_5 = arith.constant 0 : index
    %5 = vector.load %arg3[%c0_4, %c0_5] : memref<3x256xf32, #tpu.memory_space<vmem>>, vector<1x256xf32>
    %6 = vector.shape_cast %5 : vector<1x256xf32> to vector<256xf32>
    %7 = vector.shape_cast %6 : vector<256xf32> to vector<1x256xf32>
    %8 = vector.broadcast %7 : vector<1x256xf32> to vector<32x256xf32>
    %9 = arith.addf %4, %8 : vector<32x256xf32>
    %cst_6 = arith.constant 5.000000e-01 : f32
    %10 = vector.broadcast %cst_6 : f32 to vector<32x256xf32>
    %11 = arith.mulf %10, %9 : vector<32x256xf32>
    %cst_7 = arith.constant 0.707106769 : f32
    %12 = vector.broadcast %cst_7 : f32 to vector<32x256xf32>
    %13 = arith.mulf %9, %12 : vector<32x256xf32>
    %14 = math.erf %13 : vector<32x256xf32>
    %cst_8 = arith.constant 1.000000e+00 : f32
    %15 = vector.broadcast %cst_8 : f32 to vector<32x256xf32>
    %16 = arith.addf %15, %14 : vector<32x256xf32>
    %17 = arith.mulf %11, %16 : vector<32x256xf32>
    %18 = arith.truncf %17 : vector<32x256xf32> to vector<32x256xbf16>
    %c0_9 = arith.constant 0 : index
    %c0_10 = arith.constant 0 : index
    %c0_11 = arith.constant 0 : index
    %19 = vector.load %arg4[%c0_9, %c0_10, %c0_11] : memref<3x256x256xbf16, #tpu.memory_space<vmem>>, vector<1x256x256xbf16>
    %20 = vector.shape_cast %19 : vector<1x256x256xbf16> to vector<256x256xbf16>
    %cst_12 = arith.constant dense<0.000000e+00> : vector<32x256xf32>
    %21 = tpu.matmul %18, %20, %cst_12 {dimension_numbers = #tpu.dot_dimension_numbers<[1], [0], [0], [1], [0, 0, 1, 1], [], []>} : vector<32x256xbf16>, vector<256x256xbf16>, vector<32x256xf32> -> vector<32x256xf32>
    %c0_13 = arith.constant 0 : index
    %c0_14 = arith.constant 0 : index
    %22 = vector.load %arg5[%c0_13, %c0_14] : memref<3x256xf32, #tpu.memory_space<vmem>>, vector<1x256xf32>
    %23 = vector.shape_cast %22 : vector<1x256xf32> to vector<256xf32>
    %24 = vector.shape_cast %23 : vector<256xf32> to vector<1x256xf32>
    %25 = vector.broadcast %24 : vector<1x256xf32> to vector<32x256xf32>
    %26 = arith.addf %21, %25 : vector<32x256xf32>
    %cst_15 = arith.constant dense<0.000000e+00> : vector<32xf32>
    %27 = vector.multi_reduction <add>, %26, %cst_15 [1] : vector<32x256xf32> to vector<32xf32>
    %28 = vector.shape_cast %27 : vector<32xf32> to vector<32x1xf32>
    %cst_16 = arith.constant 2.560000e+02 : f32
    %29 = vector.broadcast %cst_16 : f32 to vector<32x1xf32>
    %30 = arith.divf %28, %29 : vector<32x1xf32>
    %31 = vector.broadcast %30 : vector<32x1xf32> to vector<32x256xf32>
    %32 = arith.subf %26, %31 : vector<32x256xf32>
    %33 = arith.mulf %32, %32 : vector<32x256xf32>
    %cst_17 = arith.constant dense<0.000000e+00> : vector<32xf32>
    %34 = vector.multi_reduction <add>, %33, %cst_17 [1] : vector<32x256xf32> to vector<32xf32>
    %35 = vector.shape_cast %34 : vector<32xf32> to vector<32x1xf32>
    %cst_18 = arith.constant 2.560000e+02 : f32
    %36 = vector.broadcast %cst_18 : f32 to vector<32x1xf32>
    %37 = arith.divf %35, %36 : vector<32x1xf32>
    %38 = vector.broadcast %30 : vector<32x1xf32> to vector<32x256xf32>
    %39 = arith.subf %26, %38 : vector<32x256xf32>
    %cst_19 = arith.constant 9.99999997E-7 : f32
    %40 = vector.broadcast %cst_19 : f32 to vector<32x1xf32>
    %41 = arith.addf %37, %40 : vector<32x1xf32>
    %42 = math.rsqrt %41 : vector<32x1xf32>
    %43 = vector.broadcast %42 : vector<32x1xf32> to vector<32x256xf32>
    %44 = arith.mulf %39, %43 : vector<32x256xf32>
    %c0_20 = arith.constant 0 : index
    %c0_21 = arith.constant 0 : index
    %45 = vector.load %arg6[%c0_20, %c0_21] : memref<3x256xf32, #tpu.memory_space<vmem>>, vector<1x256xf32>
    %46 = vector.shape_cast %45 : vector<1x256xf32> to vector<256xf32>
    %47 = vector.shape_cast %46 : vector<256xf32> to vector<1x256xf32>
    %48 = vector.broadcast %47 : vector<1x256xf32> to vector<32x256xf32>
    %49 = arith.mulf %44, %48 : vector<32x256xf32>
    %c0_22 = arith.constant 0 : index
    %c0_23 = arith.constant 0 : index
    %50 = vector.load %arg7[%c0_22, %c0_23] : memref<3x256xf32, #tpu.memory_space<vmem>>, vector<1x256xf32>
    %51 = vector.shape_cast %50 : vector<1x256xf32> to vector<256xf32>
    %52 = vector.shape_cast %51 : vector<256xf32> to vector<1x256xf32>
    %53 = vector.broadcast %52 : vector<1x256xf32> to vector<32x256xf32>
    %54 = arith.addf %49, %53 : vector<32x256xf32>
    %55 = arith.truncf %54 : vector<32x256xf32> to vector<32x256xbf16>
    %c0_24 = arith.constant 0 : index
    %c0_25 = arith.constant 0 : index
    %56 = vector.load %arg10[%c0_24, %c0_25] : memref<32x256xbf16, #tpu.memory_space<vmem>>, vector<32x256xbf16>
    tpu.vector_store %arg10[%c0_24, %c0_25], %55 {strides = array<i32>} : memref<32x256xbf16, #tpu.memory_space<vmem>>, vector<32x256xbf16>,
    %c1 = arith.constant 1 : index
    %c0_26 = arith.constant 0 : index
    %c0_27 = arith.constant 0 : index
    %57 = vector.load %arg2[%c1, %c0_26, %c0_27] : memref<3x256x256xbf16, #tpu.memory_space<vmem>>, vector<1x256x256xbf16>
    %58 = vector.shape_cast %57 : vector<1x256x256xbf16> to vector<256x256xbf16>
    %cst_28 = arith.constant dense<0.000000e+00> : vector<32x256xf32>
    %59 = tpu.matmul %1, %58, %cst_28 {dimension_numbers = #tpu.dot_dimension_numbers<[1], [0], [0], [1], [0, 0, 1, 1], [], []>} : vector<32x256xbf16>, vector<256x256xbf16>, vector<32x256xf32> -> vector<32x256xf32>
    %c1_29 = arith.constant 1 : index
    %c0_30 = arith.constant 0 : index
    %60 = vector.load %arg3[%c1_29, %c0_30] : memref<3x256xf32, #tpu.memory_space<vmem>>, vector<1x256xf32>
    %61 = vector.shape_cast %60 : vector<1x256xf32> to vector<256xf32>
    %62 = vector.shape_cast %61 : vector<256xf32> to vector<1x256xf32>
    %63 = vector.broadcast %62 : vector<1x256xf32> to vector<32x256xf32>
    %64 = arith.addf %59, %63 : vector<32x256xf32>
    %cst_31 = arith.constant 5.000000e-01 : f32
    %65 = vector.broadcast %cst_31 : f32 to vector<32x256xf32>
    %66 = arith.mulf %65, %64 : vector<32x256xf32>
    %cst_32 = arith.constant 0.707106769 : f32
    %67 = vector.broadcast %cst_32 : f32 to vector<32x256xf32>
    %68 = arith.mulf %64, %67 : vector<32x256xf32>
    %69 = math.erf %68 : vector<32x256xf32>
    %cst_33 = arith.constant 1.000000e+00 : f32
    %70 = vector.broadcast %cst_33 : f32 to vector<32x256xf32>
    %71 = arith.addf %70, %69 : vector<32x256xf32>
    %72 = arith.mulf %66, %71 : vector<32x256xf32>
    %73 = arith.truncf %72 : vector<32x256xf32> to vector<32x256xbf16>
    %c1_34 = arith.constant 1 : index
    %c0_35 = arith.constant 0 : index
    %c0_36 = arith.constant 0 : index
    %74 = vector.load %arg4[%c1_34, %c0_35, %c0_36] : memref<3x256x256xbf16, #tpu.memory_space<vmem>>, vector<1x256x256xbf16>
    %75 = vector.shape_cast %74 : vector<1x256x256xbf16> to vector<256x256xbf16>
    %cst_37 = arith.constant dense<0.000000e+00> : vector<32x256xf32>
    %76 = tpu.matmul %73, %75, %cst_37 {dimension_numbers = #tpu.dot_dimension_numbers<[1], [0], [0], [1], [0, 0, 1, 1], [], []>} : vector<32x256xbf16>, vector<256x256xbf16>, vector<32x256xf32> -> vector<32x256xf32>
    %c1_38 = arith.constant 1 : index
    %c0_39 = arith.constant 0 : index
    %77 = vector.load %arg5[%c1_38, %c0_39] : memref<3x256xf32, #tpu.memory_space<vmem>>, vector<1x256xf32>
    %78 = vector.shape_cast %77 : vector<1x256xf32> to vector<256xf32>
    %79 = vector.shape_cast %78 : vector<256xf32> to vector<1x256xf32>
    %80 = vector.broadcast %79 : vector<1x256xf32> to vector<32x256xf32>
    %81 = arith.addf %76, %80 : vector<32x256xf32>
    %cst_40 = arith.constant dense<0.000000e+00> : vector<32xf32>
    %82 = vector.multi_reduction <add>, %81, %cst_40 [1] : vector<32x256xf32> to vector<32xf32>
    %83 = vector.shape_cast %82 : vector<32xf32> to vector<32x1xf32>
    %cst_41 = arith.constant 2.560000e+02 : f32
    %84 = vector.broadcast %cst_41 : f32 to vector<32x1xf32>
    %85 = arith.divf %83, %84 : vector<32x1xf32>
    %86 = vector.broadcast %85 : vector<32x1xf32> to vector<32x256xf32>
    %87 = arith.subf %81, %86 : vector<32x256xf32>
    %88 = arith.mulf %87, %87 : vector<32x256xf32>
    %cst_42 = arith.constant dense<0.000000e+00> : vector<32xf32>
    %89 = vector.multi_reduction <add>, %88, %cst_42 [1] : vector<32x256xf32> to vector<32xf32>
    %90 = vector.shape_cast %89 : vector<32xf32> to vector<32x1xf32>
    %cst_43 = arith.constant 2.560000e+02 : f32
    %91 = vector.broadcast %cst_43 : f32 to vector<32x1xf32>
    %92 = arith.divf %90, %91 : vector<32x1xf32>
    %93 = vector.broadcast %85 : vector<32x1xf32> to vector<32x256xf32>
    %94 = arith.subf %81, %93 : vector<32x256xf32>
    %cst_44 = arith.constant 9.99999997E-7 : f32
    %95 = vector.broadcast %cst_44 : f32 to vector<32x1xf32>
    %96 = arith.addf %92, %95 : vector<32x1xf32>
    %97 = math.rsqrt %96 : vector<32x1xf32>
    %98 = vector.broadcast %97 : vector<32x1xf32> to vector<32x256xf32>
    %99 = arith.mulf %94, %98 : vector<32x256xf32>
    %c1_45 = arith.constant 1 : index
    %c0_46 = arith.constant 0 : index
    %100 = vector.load %arg6[%c1_45, %c0_46] : memref<3x256xf32, #tpu.memory_space<vmem>>, vector<1x256xf32>
    %101 = vector.shape_cast %100 : vector<1x256xf32> to vector<256xf32>
    %102 = vector.shape_cast %101 : vector<256xf32> to vector<1x256xf32>
    %103 = vector.broadcast %102 : vector<1x256xf32> to vector<32x256xf32>
    %104 = arith.mulf %99, %103 : vector<32x256xf32>
    %c1_47 = arith.constant 1 : index
    %c0_48 = arith.constant 0 : index
    %105 = vector.load %arg7[%c1_47, %c0_48] : memref<3x256xf32, #tpu.memory_space<vmem>>, vector<1x256xf32>
    %106 = vector.shape_cast %105 : vector<1x256xf32> to vector<256xf32>
    %107 = vector.shape_cast %106 : vector<256xf32> to vector<1x256xf32>
    %108 = vector.broadcast %107 : vector<1x256xf32> to vector<32x256xf32>
    %109 = arith.addf %104, %108 : vector<32x256xf32>
    %110 = arith.truncf %109 : vector<32x256xf32> to vector<32x256xbf16>
    %c0_49 = arith.constant 0 : index
    %c0_50 = arith.constant 0 : index
    %c0_51 = arith.constant 0 : index
    %111 = vector.load %arg8[%c0_49, %c0_50, %c0_51] : memref<2x256x256xbf16, #tpu.memory_space<vmem>>, vector<1x256x256xbf16>
    %112 = vector.shape_cast %111 : vector<1x256x256xbf16> to vector<256x256xbf16>
    %cst_52 = arith.constant dense<0.000000e+00> : vector<32x256xf32>
    %113 = tpu.matmul %110, %112, %cst_52 {dimension_numbers = #tpu.dot_dimension_numbers<[1], [0], [0], [1], [0, 0, 1, 1], [], []>} : vector<32x256xbf16>, vector<256x256xbf16>, vector<32x256xf32> -> vector<32x256xf32>
    %c0_53 = arith.constant 0 : index
    %c0_54 = arith.constant 0 : index
    %114 = vector.load %arg9[%c0_53, %c0_54] : memref<2x256xf32, #tpu.memory_space<vmem>>, vector<1x256xf32>
    %115 = vector.shape_cast %114 : vector<1x256xf32> to vector<256xf32>
    %116 = vector.shape_cast %115 : vector<256xf32> to vector<1x256xf32>
    %117 = vector.broadcast %116 : vector<1x256xf32> to vector<32x256xf32>
    %118 = arith.addf %113, %117 : vector<32x256xf32>
    %119 = arith.truncf %118 : vector<32x256xf32> to vector<32x256xbf16>
    %c0_55 = arith.constant 0 : index
    %c0_56 = arith.constant 0 : index
    %120 = vector.load %arg11[%c0_55, %c0_56] : memref<32x256xbf16, #tpu.memory_space<vmem>>, vector<32x256xbf16>
    tpu.vector_store %arg11[%c0_55, %c0_56], %119 {strides = array<i32>} : memref<32x256xbf16, #tpu.memory_space<vmem>>, vector<32x256xbf16>,
    %c2 = arith.constant 2 : index
    %c0_57 = arith.constant 0 : index
    %c0_58 = arith.constant 0 : index
    %121 = vector.load %arg2[%c2, %c0_57, %c0_58] : memref<3x256x256xbf16, #tpu.memory_space<vmem>>, vector<1x256x256xbf16>
    %122 = vector.shape_cast %121 : vector<1x256x256xbf16> to vector<256x256xbf16>
    %cst_59 = arith.constant dense<0.000000e+00> : vector<32x256xf32>
    %123 = tpu.matmul %1, %122, %cst_59 {dimension_numbers = #tpu.dot_dimension_numbers<[1], [0], [0], [1], [0, 0, 1, 1], [], []>} : vector<32x256xbf16>, vector<256x256xbf16>, vector<32x256xf32> -> vector<32x256xf32>
    %c2_60 = arith.constant 2 : index
    %c0_61 = arith.constant 0 : index
    %124 = vector.load %arg3[%c2_60, %c0_61] : memref<3x256xf32, #tpu.memory_space<vmem>>, vector<1x256xf32>
    %125 = vector.shape_cast %124 : vector<1x256xf32> to vector<256xf32>
    %126 = vector.shape_cast %125 : vector<256xf32> to vector<1x256xf32>
    %127 = vector.broadcast %126 : vector<1x256xf32> to vector<32x256xf32>
    %128 = arith.addf %123, %127 : vector<32x256xf32>
    %cst_62 = arith.constant 5.000000e-01 : f32
    %129 = vector.broadcast %cst_62 : f32 to vector<32x256xf32>
    %130 = arith.mulf %129, %128 : vector<32x256xf32>
    %cst_63 = arith.constant 0.707106769 : f32
    %131 = vector.broadcast %cst_63 : f32 to vector<32x256xf32>
    %132 = arith.mulf %128, %131 : vector<32x256xf32>
    %133 = math.erf %132 : vector<32x256xf32>
    %cst_64 = arith.constant 1.000000e+00 : f32
    %134 = vector.broadcast %cst_64 : f32 to vector<32x256xf32>
    %135 = arith.addf %134, %133 : vector<32x256xf32>
    %136 = arith.mulf %130, %135 : vector<32x256xf32>
    %137 = arith.truncf %136 : vector<32x256xf32> to vector<32x256xbf16>
    %c2_65 = arith.constant 2 : index
    %c0_66 = arith.constant 0 : index
    %c0_67 = arith.constant 0 : index
    %138 = vector.load %arg4[%c2_65, %c0_66, %c0_67] : memref<3x256x256xbf16, #tpu.memory_space<vmem>>, vector<1x256x256xbf16>
    %139 = vector.shape_cast %138 : vector<1x256x256xbf16> to vector<256x256xbf16>
    %cst_68 = arith.constant dense<0.000000e+00> : vector<32x256xf32>
    %140 = tpu.matmul %137, %139, %cst_68 {dimension_numbers = #tpu.dot_dimension_numbers<[1], [0], [0], [1], [0, 0, 1, 1], [], []>} : vector<32x256xbf16>, vector<256x256xbf16>, vector<32x256xf32> -> vector<32x256xf32>
    %c2_69 = arith.constant 2 : index
    %c0_70 = arith.constant 0 : index
    %141 = vector.load %arg5[%c2_69, %c0_70] : memref<3x256xf32, #tpu.memory_space<vmem>>, vector<1x256xf32>
    %142 = vector.shape_cast %141 : vector<1x256xf32> to vector<256xf32>
    %143 = vector.shape_cast %142 : vector<256xf32> to vector<1x256xf32>
    %144 = vector.broadcast %143 : vector<1x256xf32> to vector<32x256xf32>
    %145 = arith.addf %140, %144 : vector<32x256xf32>
    %cst_71 = arith.constant dense<0.000000e+00> : vector<32xf32>
    %146 = vector.multi_reduction <add>, %145, %cst_71 [1] : vector<32x256xf32> to vector<32xf32>
    %147 = vector.shape_cast %146 : vector<32xf32> to vector<32x1xf32>
    %cst_72 = arith.constant 2.560000e+02 : f32
    %148 = vector.broadcast %cst_72 : f32 to vector<32x1xf32>
    %149 = arith.divf %147, %148 : vector<32x1xf32>
    %150 = vector.broadcast %149 : vector<32x1xf32> to vector<32x256xf32>
    %151 = arith.subf %145, %150 : vector<32x256xf32>
    %152 = arith.mulf %151, %151 : vector<32x256xf32>
    %cst_73 = arith.constant dense<0.000000e+00> : vector<32xf32>
    %153 = vector.multi_reduction <add>, %152, %cst_73 [1] : vector<32x256xf32> to vector<32xf32>
    %154 = vector.shape_cast %153 : vector<32xf32> to vector<32x1xf32>
    %cst_74 = arith.constant 2.560000e+02 : f32
    %155 = vector.broadcast %cst_74 : f32 to vector<32x1xf32>
    %156 = arith.divf %154, %155 : vector<32x1xf32>
    %157 = vector.broadcast %149 : vector<32x1xf32> to vector<32x256xf32>
    %158 = arith.subf %145, %157 : vector<32x256xf32>
    %cst_75 = arith.constant 9.99999997E-7 : f32
    %159 = vector.broadcast %cst_75 : f32 to vector<32x1xf32>
    %160 = arith.addf %156, %159 : vector<32x1xf32>
    %161 = math.rsqrt %160 : vector<32x1xf32>
    %162 = vector.broadcast %161 : vector<32x1xf32> to vector<32x256xf32>
    %163 = arith.mulf %158, %162 : vector<32x256xf32>
    %c2_76 = arith.constant 2 : index
    %c0_77 = arith.constant 0 : index
    %164 = vector.load %arg6[%c2_76, %c0_77] : memref<3x256xf32, #tpu.memory_space<vmem>>, vector<1x256xf32>
    %165 = vector.shape_cast %164 : vector<1x256xf32> to vector<256xf32>
    %166 = vector.shape_cast %165 : vector<256xf32> to vector<1x256xf32>
    %167 = vector.broadcast %166 : vector<1x256xf32> to vector<32x256xf32>
    %168 = arith.mulf %163, %167 : vector<32x256xf32>
    %c2_78 = arith.constant 2 : index
    %c0_79 = arith.constant 0 : index
    %169 = vector.load %arg7[%c2_78, %c0_79] : memref<3x256xf32, #tpu.memory_space<vmem>>, vector<1x256xf32>
    %170 = vector.shape_cast %169 : vector<1x256xf32> to vector<256xf32>
    %171 = vector.shape_cast %170 : vector<256xf32> to vector<1x256xf32>
    %172 = vector.broadcast %171 : vector<1x256xf32> to vector<32x256xf32>
    %173 = arith.addf %168, %172 : vector<32x256xf32>
    %174 = arith.truncf %173 : vector<32x256xf32> to vector<32x256xbf16>
    %c1_80 = arith.constant 1 : index
    %c0_81 = arith.constant 0 : index
    %c0_82 = arith.constant 0 : index
    %175 = vector.load %arg8[%c1_80, %c0_81, %c0_82] : memref<2x256x256xbf16, #tpu.memory_space<vmem>>, vector<1x256x256xbf16>
    %176 = vector.shape_cast %175 : vector<1x256x256xbf16> to vector<256x256xbf16>
    %cst_83 = arith.constant dense<0.000000e+00> : vector<32x256xf32>
    %177 = tpu.matmul %174, %176, %cst_83 {dimension_numbers = #tpu.dot_dimension_numbers<[1], [0], [0], [1], [0, 0, 1, 1], [], []>} : vector<32x256xbf16>, vector<256x256xbf16>, vector<32x256xf32> -> vector<32x256xf32>
    %c1_84 = arith.constant 1 : index
    %c0_85 = arith.constant 0 : index
    %178 = vector.load %arg9[%c1_84, %c0_85] : memref<2x256xf32, #tpu.memory_space<vmem>>, vector<1x256xf32>
    %179 = vector.shape_cast %178 : vector<1x256xf32> to vector<256xf32>
    %180 = vector.shape_cast %179 : vector<256xf32> to vector<1x256xf32>
    %181 = vector.broadcast %180 : vector<1x256xf32> to vector<32x256xf32>
    %182 = arith.addf %177, %181 : vector<32x256xf32>
    %183 = arith.truncf %182 : vector<32x256xf32> to vector<32x256xbf16>
    %c0_86 = arith.constant 0 : index
    %c0_87 = arith.constant 0 : index
    %184 = vector.load %arg12[%c0_86, %c0_87] : memref<32x256xbf16, #tpu.memory_space<vmem>>, vector<32x256xbf16>
    tpu.vector_store %arg12[%c0_86, %c0_87], %183 {strides = array<i32>} : memref<32x256xbf16, #tpu.memory_space<vmem>>, vector<32x256xbf16>,
    return
  }
  func.func @transform_0(%arg0: i32) -> (i32, i32) {
    %c0_i32 = arith.constant 0 : i32
    %c0_i32_0 = arith.constant 0 : i32
    return %arg0, %c0_i32 : i32, i32
  }
  func.func @transform_1(%arg0: i32) -> (i32, i32, i32) {
    %c0_i32 = arith.constant 0 : i32
    %c0_i32_0 = arith.constant 0 : i32
    %c0_i32_1 = arith.constant 0 : i32
    %c0_i32_2 = arith.constant 0 : i32
    return %c0_i32, %c0_i32_0, %c0_i32_1 : i32, i32, i32
  }
  func.func @transform_2(%arg0: i32) -> (i32, i32) {
    %c0_i32 = arith.constant 0 : i32
    %c0_i32_0 = arith.constant 0 : i32
    %c0_i32_1 = arith.constant 0 : i32
    return %c0_i32, %c0_i32_0 : i32, i32
  }
  func.func @transform_3(%arg0: i32) -> (i32, i32, i32) {
    %c0_i32 = arith.constant 0 : i32
    %c0_i32_0 = arith.constant 0 : i32
    %c0_i32_1 = arith.constant 0 : i32
    %c0_i32_2 = arith.constant 0 : i32
    return %c0_i32, %c0_i32_0, %c0_i32_1 : i32, i32, i32
  }
  func.func @transform_4(%arg0: i32) -> (i32, i32) {
    %c0_i32 = arith.constant 0 : i32
    %c0_i32_0 = arith.constant 0 : i32
    %c0_i32_1 = arith.constant 0 : i32
    return %c0_i32, %c0_i32_0 : i32, i32
  }
  func.func @transform_5(%arg0: i32) -> (i32, i32) {
    %c0_i32 = arith.constant 0 : i32
    %c0_i32_0 = arith.constant 0 : i32
    %c0_i32_1 = arith.constant 0 : i32
    return %c0_i32, %c0_i32_0 : i32, i32
  }
  func.func @transform_6(%arg0: i32) -> (i32, i32) {
    %c0_i32 = arith.constant 0 : i32
    %c0_i32_0 = arith.constant 0 : i32
    %c0_i32_1 = arith.constant 0 : i32
    return %c0_i32, %c0_i32_0 : i32, i32
  }
  func.func @transform_7(%arg0: i32) -> (i32, i32, i32) {
    %c0_i32 = arith.constant 0 : i32
    %c0_i32_0 = arith.constant 0 : i32
    %c0_i32_1 = arith.constant 0 : i32
    %c0_i32_2 = arith.constant 0 : i32
    return %c0_i32, %c0_i32_0, %c0_i32_1 : i32, i32, i32
  }
  func.func @transform_8(%arg0: i32) -> (i32, i32) {
    %c0_i32 = arith.constant 0 : i32
    %c0_i32_0 = arith.constant 0 : i32
    %c0_i32_1 = arith.constant 0 : i32
    return %c0_i32, %c0_i32_0 : i32, i32
  }
  func.func @transform_9(%arg0: i32) -> (i32, i32) {
    %c0_i32 = arith.constant 0 : i32
    %c0_i32_0 = arith.constant 0 : i32
    return %arg0, %c0_i32 : i32, i32
  }
  func.func @transform_10(%arg0: i32) -> (i32, i32) {
    %c0_i32 = arith.constant 0 : i32
    %c0_i32_0 = arith.constant 0 : i32
    return %arg0, %c0_i32 : i32, i32
  }
  func.func @transform_11(%arg0: i32) -> (i32, i32) {
    %c0_i32 = arith.constant 0 : i32
    %c0_i32_0 = arith.constant 0 : i32
    return %arg0, %c0_i32 : i32, i32
  }
}

module attributes {stable_mosaic.version = 11 : i64} {
  func.func @kernel(%arg0: i32, %arg1: memref<1x4x256xbf16, #tpu.memory_space<vmem>>, %arg2: memref<1x16x256xbf16, #tpu.memory_space<vmem>>, %arg3: memref<1x16x256xbf16, #tpu.memory_space<vmem>>, %arg4: memref<256x256xbf16, #tpu.memory_space<vmem>>, %arg5: memref<1x256xf32, #tpu.memory_space<vmem>>, %arg6: memref<256x256xbf16, #tpu.memory_space<vmem>>, %arg7: memref<1x256xf32, #tpu.memory_space<vmem>>, %arg8: memref<1x4x256xf32, #tpu.memory_space<vmem>>, %arg9: memref<4x256xbf16, #tpu.memory_space<vmem>>, %arg10: memref<4x256xbf16, #tpu.memory_space<vmem>>) attributes {dimension_semantics = [#tpu.dimension_semantics<parallel>], iteration_bounds = array<i64: 2>, scalar_prefetch = 0 : i64, scratch_operands = 2 : i64, tpu.core_type = #tpu.core_type<tc>, window_params = [{transform_indices = @transform_0, window_bounds = array<i64: 1, 4, 256>}, {transform_indices = @transform_1, window_bounds = array<i64: 1, 16, 256>}, {transform_indices = @transform_2, window_bounds = array<i64: 1, 16, 256>}, {pipeline_mode = #tpu.pipeline_mode<synchronous>, transform_indices = @transform_3, window_bounds = array<i64: 256, 256>}, {pipeline_mode = #tpu.pipeline_mode<synchronous>, transform_indices = @transform_4, window_bounds = array<i64: 1, 256>}, {pipeline_mode = #tpu.pipeline_mode<synchronous>, transform_indices = @transform_5, window_bounds = array<i64: 256, 256>}, {pipeline_mode = #tpu.pipeline_mode<synchronous>, transform_indices = @transform_6, window_bounds = array<i64: 1, 256>}, {transform_indices = @transform_7, window_bounds = array<i64: 1, 4, 256>}]} {
    %c0 = arith.constant 0 : index
    %c0_0 = arith.constant 0 : index
    %c0_1 = arith.constant 0 : index
    %0 = vector.load %arg1[%c0, %c0_0, %c0_1] : memref<1x4x256xbf16, #tpu.memory_space<vmem>>, vector<1x4x256xbf16>
    %1 = vector.shape_cast %0 : vector<1x4x256xbf16> to vector<4x256xbf16>
    %c0_2 = arith.constant 0 : index
    %c0_3 = arith.constant 0 : index
    %2 = vector.load %arg4[%c0_2, %c0_3] : memref<256x256xbf16, #tpu.memory_space<vmem>>, vector<256x256xbf16>
    %cst = arith.constant dense<0.000000e+00> : vector<4x256xf32>
    %3 = tpu.matmul %1, %2, %cst {dimension_numbers = #tpu.dot_dimension_numbers<[1], [0], [0], [1], [0, 0, 1, 1], [], []>} : vector<4x256xbf16>, vector<256x256xbf16>, vector<4x256xf32> -> vector<4x256xf32>
    %c0_4 = arith.constant 0 : index
    %c0_5 = arith.constant 0 : index
    %4 = vector.load %arg5[%c0_4, %c0_5] : memref<1x256xf32, #tpu.memory_space<vmem>>, vector<1x256xf32>
    %5 = vector.broadcast %4 : vector<1x256xf32> to vector<4x256xf32>
    %6 = arith.addf %3, %5 : vector<4x256xf32>
    %7 = arith.truncf %6 : vector<4x256xf32> to vector<4x256xbf16>
    %c0_6 = arith.constant 0 : index
    %c0_7 = arith.constant 0 : index
    %8 = vector.load %arg9[%c0_6, %c0_7] : memref<4x256xbf16, #tpu.memory_space<vmem>>, vector<4x256xbf16>
    tpu.vector_store %arg9[%c0_6, %c0_7], %7 {strides = array<i32>} : memref<4x256xbf16, #tpu.memory_space<vmem>>, vector<4x256xbf16>,
    %c0_8 = arith.constant 0 : index
    %c0_9 = arith.constant 0 : index
    %9 = vector.load %arg9[%c0_8, %c0_9] : memref<4x256xbf16, #tpu.memory_space<vmem>>, vector<4x128xbf16>
    %c0_10 = arith.constant 0 : index
    %c0_11 = arith.constant 0 : index
    %c0_12 = arith.constant 0 : index
    %10 = vector.load %arg2[%c0_10, %c0_11, %c0_12] : memref<1x16x256xbf16, #tpu.memory_space<vmem>>, vector<1x16x128xbf16>
    %11 = vector.shape_cast %10 : vector<1x16x128xbf16> to vector<16x128xbf16>
    %c0_13 = arith.constant 0 : index
    %c0_14 = arith.constant 0 : index
    %c0_15 = arith.constant 0 : index
    %12 = vector.load %arg3[%c0_13, %c0_14, %c0_15] : memref<1x16x256xbf16, #tpu.memory_space<vmem>>, vector<1x16x128xbf16>
    %13 = vector.shape_cast %12 : vector<1x16x128xbf16> to vector<16x128xbf16>
    %cst_16 = arith.constant dense<0.000000e+00> : vector<4x16xf32>
    %14 = tpu.matmul %9, %11, %cst_16 {dimension_numbers = #tpu.dot_dimension_numbers<[1], [1], [0], [0], [0, 0, 1, 0], [], []>} : vector<4x128xbf16>, vector<16x128xbf16>, vector<4x16xf32> -> vector<4x16xf32>
    %cst_17 = arith.constant dense<0xFF800000> : vector<4xf32>
    %15 = vector.multi_reduction <maximumf>, %14, %cst_17 [1] : vector<4x16xf32> to vector<4xf32>
    %16 = vector.shape_cast %15 : vector<4xf32> to vector<4x1xf32>
    %17 = vector.broadcast %16 : vector<4x1xf32> to vector<4x16xf32>
    %18 = arith.subf %14, %17 : vector<4x16xf32>
    %19 = math.exp %18 : vector<4x16xf32>
    %cst_18 = arith.constant dense<0.000000e+00> : vector<4xf32>
    %20 = vector.multi_reduction <add>, %19, %cst_18 [1] : vector<4x16xf32> to vector<4xf32>
    %21 = vector.shape_cast %20 : vector<4xf32> to vector<4x1xf32>
    %22 = arith.truncf %19 : vector<4x16xf32> to vector<4x16xbf16>
    %cst_19 = arith.constant dense<0.000000e+00> : vector<4x128xf32>
    %23 = tpu.matmul %22, %13, %cst_19 {dimension_numbers = #tpu.dot_dimension_numbers<[1], [0], [0], [1], [0, 0, 1, 1], [], []>} : vector<4x16xbf16>, vector<16x128xbf16>, vector<4x128xf32> -> vector<4x128xf32>
    %24 = tpu.reciprocal %21 {approx = true} : vector<4x1xf32> -> vector<4x1xf32>
    %25 = vector.broadcast %24 : vector<4x1xf32> to vector<4x128xf32>
    %26 = arith.mulf %23, %25 : vector<4x128xf32>
    %27 = arith.truncf %26 : vector<4x128xf32> to vector<4x128xbf16>
    %c0_20 = arith.constant 0 : index
    %c0_21 = arith.constant 0 : index
    %28 = vector.load %arg10[%c0_20, %c0_21] : memref<4x256xbf16, #tpu.memory_space<vmem>>, vector<4x128xbf16>
    tpu.vector_store %arg10[%c0_20, %c0_21], %27 {strides = array<i32>} : memref<4x256xbf16, #tpu.memory_space<vmem>>, vector<4x128xbf16>,
    %c0_22 = arith.constant 0 : index
    %c128 = arith.constant 128 : index
    %29 = vector.load %arg9[%c0_22, %c128] : memref<4x256xbf16, #tpu.memory_space<vmem>>, vector<4x128xbf16>
    %c0_23 = arith.constant 0 : index
    %c0_24 = arith.constant 0 : index
    %c128_25 = arith.constant 128 : index
    %30 = vector.load %arg2[%c0_23, %c0_24, %c128_25] : memref<1x16x256xbf16, #tpu.memory_space<vmem>>, vector<1x16x128xbf16>
    %31 = vector.shape_cast %30 : vector<1x16x128xbf16> to vector<16x128xbf16>
    %c0_26 = arith.constant 0 : index
    %c0_27 = arith.constant 0 : index
    %c128_28 = arith.constant 128 : index
    %32 = vector.load %arg3[%c0_26, %c0_27, %c128_28] : memref<1x16x256xbf16, #tpu.memory_space<vmem>>, vector<1x16x128xbf16>
    %33 = vector.shape_cast %32 : vector<1x16x128xbf16> to vector<16x128xbf16>
    %cst_29 = arith.constant dense<0.000000e+00> : vector<4x16xf32>
    %34 = tpu.matmul %29, %31, %cst_29 {dimension_numbers = #tpu.dot_dimension_numbers<[1], [1], [0], [0], [0, 0, 1, 0], [], []>} : vector<4x128xbf16>, vector<16x128xbf16>, vector<4x16xf32> -> vector<4x16xf32>
    %cst_30 = arith.constant dense<0xFF800000> : vector<4xf32>
    %35 = vector.multi_reduction <maximumf>, %34, %cst_30 [1] : vector<4x16xf32> to vector<4xf32>
    %36 = vector.shape_cast %35 : vector<4xf32> to vector<4x1xf32>
    %37 = vector.broadcast %36 : vector<4x1xf32> to vector<4x16xf32>
    %38 = arith.subf %34, %37 : vector<4x16xf32>
    %39 = math.exp %38 : vector<4x16xf32>
    %cst_31 = arith.constant dense<0.000000e+00> : vector<4xf32>
    %40 = vector.multi_reduction <add>, %39, %cst_31 [1] : vector<4x16xf32> to vector<4xf32>
    %41 = vector.shape_cast %40 : vector<4xf32> to vector<4x1xf32>
    %42 = arith.truncf %39 : vector<4x16xf32> to vector<4x16xbf16>
    %cst_32 = arith.constant dense<0.000000e+00> : vector<4x128xf32>
    %43 = tpu.matmul %42, %33, %cst_32 {dimension_numbers = #tpu.dot_dimension_numbers<[1], [0], [0], [1], [0, 0, 1, 1], [], []>} : vector<4x16xbf16>, vector<16x128xbf16>, vector<4x128xf32> -> vector<4x128xf32>
    %44 = tpu.reciprocal %41 {approx = true} : vector<4x1xf32> -> vector<4x1xf32>
    %45 = vector.broadcast %44 : vector<4x1xf32> to vector<4x128xf32>
    %46 = arith.mulf %43, %45 : vector<4x128xf32>
    %47 = arith.truncf %46 : vector<4x128xf32> to vector<4x128xbf16>
    %c0_33 = arith.constant 0 : index
    %c128_34 = arith.constant 128 : index
    %48 = vector.load %arg10[%c0_33, %c128_34] : memref<4x256xbf16, #tpu.memory_space<vmem>>, vector<4x128xbf16>
    tpu.vector_store %arg10[%c0_33, %c128_34], %47 {strides = array<i32>} : memref<4x256xbf16, #tpu.memory_space<vmem>>, vector<4x128xbf16>,
    %c0_35 = arith.constant 0 : index
    %c0_36 = arith.constant 0 : index
    %49 = vector.load %arg10[%c0_35, %c0_36] : memref<4x256xbf16, #tpu.memory_space<vmem>>, vector<4x256xbf16>
    %c0_37 = arith.constant 0 : index
    %c0_38 = arith.constant 0 : index
    %50 = vector.load %arg6[%c0_37, %c0_38] : memref<256x256xbf16, #tpu.memory_space<vmem>>, vector<256x256xbf16>
    %cst_39 = arith.constant dense<0.000000e+00> : vector<4x256xf32>
    %51 = tpu.matmul %49, %50, %cst_39 {dimension_numbers = #tpu.dot_dimension_numbers<[1], [0], [0], [1], [0, 0, 1, 1], [], []>} : vector<4x256xbf16>, vector<256x256xbf16>, vector<4x256xf32> -> vector<4x256xf32>
    %c0_40 = arith.constant 0 : index
    %c0_41 = arith.constant 0 : index
    %52 = vector.load %arg7[%c0_40, %c0_41] : memref<1x256xf32, #tpu.memory_space<vmem>>, vector<1x256xf32>
    %53 = vector.broadcast %52 : vector<1x256xf32> to vector<4x256xf32>
    %54 = arith.addf %51, %53 : vector<4x256xf32>
    %c0_42 = arith.constant 0 : index
    %c0_43 = arith.constant 0 : index
    %c0_44 = arith.constant 0 : index
    %55 = vector.load %arg8[%c0_42, %c0_43, %c0_44] : memref<1x4x256xf32, #tpu.memory_space<vmem>>, vector<1x4x256xf32>
    %56 = vector.shape_cast %55 : vector<1x4x256xf32> to vector<4x256xf32>
    %57 = vector.shape_cast %54 : vector<4x256xf32> to vector<1x4x256xf32>
    tpu.vector_store %arg8[%c0_42, %c0_43, %c0_44], %57 {strides = array<i32>} : memref<1x4x256xf32, #tpu.memory_space<vmem>>, vector<1x4x256xf32>,
    return
  }
  func.func @transform_0(%arg0: i32) -> (i32, i32, i32) {
    %c0_i32 = arith.constant 0 : i32
    %c0_i32_0 = arith.constant 0 : i32
    %c0_i32_1 = arith.constant 0 : i32
    return %arg0, %c0_i32, %c0_i32_0 : i32, i32, i32
  }
  func.func @transform_1(%arg0: i32) -> (i32, i32, i32) {
    %c0_i32 = arith.constant 0 : i32
    %c0_i32_0 = arith.constant 0 : i32
    %c0_i32_1 = arith.constant 0 : i32
    return %arg0, %c0_i32, %c0_i32_0 : i32, i32, i32
  }
  func.func @transform_2(%arg0: i32) -> (i32, i32, i32) {
    %c0_i32 = arith.constant 0 : i32
    %c0_i32_0 = arith.constant 0 : i32
    %c0_i32_1 = arith.constant 0 : i32
    return %arg0, %c0_i32, %c0_i32_0 : i32, i32, i32
  }
  func.func @transform_3(%arg0: i32) -> (i32, i32) {
    %c0_i32 = arith.constant 0 : i32
    %c0_i32_0 = arith.constant 0 : i32
    %c0_i32_1 = arith.constant 0 : i32
    return %c0_i32, %c0_i32_0 : i32, i32
  }
  func.func @transform_4(%arg0: i32) -> (i32, i32) {
    %c0_i32 = arith.constant 0 : i32
    %c0_i32_0 = arith.constant 0 : i32
    %c0_i32_1 = arith.constant 0 : i32
    return %c0_i32, %c0_i32_0 : i32, i32
  }
  func.func @transform_5(%arg0: i32) -> (i32, i32) {
    %c0_i32 = arith.constant 0 : i32
    %c0_i32_0 = arith.constant 0 : i32
    %c0_i32_1 = arith.constant 0 : i32
    return %c0_i32, %c0_i32_0 : i32, i32
  }
  func.func @transform_6(%arg0: i32) -> (i32, i32) {
    %c0_i32 = arith.constant 0 : i32
    %c0_i32_0 = arith.constant 0 : i32
    %c0_i32_1 = arith.constant 0 : i32
    return %c0_i32, %c0_i32_0 : i32, i32
  }
  func.func @transform_7(%arg0: i32) -> (i32, i32, i32) {
    %c0_i32 = arith.constant 0 : i32
    %c0_i32_0 = arith.constant 0 : i32
    %c0_i32_1 = arith.constant 0 : i32
    return %arg0, %c0_i32, %c0_i32_0 : i32, i32, i32
  }
}

</mosaic_0001>

<bundles_post_ra>
// kernel: token_conv_attention.4
= control target key start
LH: loop header
LB: loop body
LE: loop exit
PB: predicated region body
PF: predicated region fallthrough
CT: control target
= control target key end

     0   :  { %v16_v0 = vlaneseq  ;;  %vm69_vm0 = vcmask 1041409   ;;  %vm72_vm1 = vcmask 1042434   ;;  %vm75_vm2 = vcmask 1043459   ;;  %s900_s0 = inlined_call_operand.vmem [shape: bf16[4,8,256], index: 0, kind: input, shape index: {}]   ;;  %s901_s1 = inlined_call_operand.vmem [shape: f32[4,256], index: 1, kind: input, shape index: {}]   ;;  %s902_s2 = inlined_call_operand.vmem [shape: f32[1,256], index: 2, kind: input, shape index: {}]   ;;  %s903_s3 = inlined_call_operand.vmem [shape: bf16[4,2,256], index: 3, kind: output, shape index: {}]  }
   0x1   :  { %v14_v1 = vld [vmem:[%s902_s2] sm:$0x3]  ;;  %v29_v3 = vld [vmem:[%s900_s0 + $0x8] sm:$0x11]  ;;  %v30_v5 = vld [vmem:[%s900_s0 + $0x10] sm:$0x11] }
   0x2   :  { %v28_v2 = vld [vmem:[%s900_s0] sm:$0x11]  ;;  %v603_v4 = vshrl.u32 %v16_v0, 7  ;;  %v31_v6 = vld [vmem:[%s900_s0 + $0x18] sm:$0x11]  ;;  %v34_v9 = vunpack.c.l.bf16 %v29_v3  ;;  %v35_v10 = vunpack.c.h.bf16 %v29_v3  ;;  %v36_v11 = vunpack.c.l.bf16 %v30_v5 }
   0x3   :  { %v32_v7 = vunpack.c.l.bf16 %v28_v2  ;;  %v33_v8 = vunpack.c.h.bf16 %v28_v2  ;;  %v37_v12 = vunpack.c.h.bf16 %v30_v5  ;;  %v40_v13 = vld [vmem:[%s901_s1] ss:$4 sm:$0x3]  ;;  %v560_v14 = vld [vmem:[%s901_s1 + $0x1] ss:$4 sm:$0x3]  ;;  %v38_v17 = vunpack.c.l.bf16 %v31_v6 }
   0x4   :  { %v618_v15 = vsub.s32 0, %v603_v4  ;;  %v621_v16 = vsub.s32 1, %v603_v4  ;;  %v39_v18 = vunpack.c.h.bf16 %v31_v6  ;;  %v626_v19 = vld [vmem:[%s900_s0] sm:$0x44]  ;;  %v631_v20 = vld [vmem:[%s900_s0 + $0x8] sm:$0x44] }
   0x5   :  { %v636_v21 = vld [vmem:[%s900_s0 + $0x10] sm:$0x44]  ;;  %v136_v22 = vunpack.c.l.bf16 %v626_v19  ;;  %v137_v23 = vunpack.c.h.bf16 %v626_v19  ;;  %v138_v24 = vunpack.c.l.bf16 %v631_v20  ;;  %v139_v25 = vunpack.c.h.bf16 %v631_v20  ;;  %v135_v62 = vld [vmem:[%s900_s0 + $0x18] sm:$0x44] }
   0x6   :  { %v643_v26 = vrot.slane %v14_v1, %v618_v15  ;;  %v646_v27 = vrot.slane %v14_v1, %v621_v16  ;;  %v45_v28 = vrot.slane %v40_v13, %v618_v15  ;;  %v49_v29 = vrot.slane %v40_v13, %v621_v16  ;;  %v561_v63 = vld [vmem:[%s901_s1 + $0x2] ss:$4 sm:$0x3]  ;;  %v562_v5 = vld [vmem:[%s901_s1 + $0x3] ss:$4 sm:$0x3] }
   0x7   :  { %v93_v30 = vrot.slane %v560_v14, %v618_v15  ;;  %v97_v31 = vrot.slane %v560_v14, %v621_v16  ;;  %v140_v32 = vunpack.c.l.bf16 %v636_v21  ;;  %v141_v33 = vunpack.c.h.bf16 %v636_v21 }
   0x8   :  { %v52_v34 = vmul.f32 %v45_v28, %v32_v7  ;;  %v53_v35 = vmul.f32 %v49_v29, %v33_v8  ;;  %v54_v36 = vmul.f32 %v45_v28, %v34_v9  ;;  %v55_v37 = vmul.f32 %v49_v29, %v35_v10 }
   0x9   :  { %v56_v38 = vmul.f32 %v45_v28, %v36_v11  ;;  %v57_v39 = vmul.f32 %v49_v29, %v37_v12  ;;  %v58_v40 = vmul.f32 %v45_v28, %v38_v17  ;;  %v59_v41 = vmul.f32 %v49_v29, %v39_v18 }
   0xa   :  { %v68_v42 = vrot.slane %v54_v36, 7  ;;  %v77_v43 = vrot.slane %v55_v37, 7  ;;  %v100_v44 = vmul.f32 %v93_v30, %v32_v7  ;;  %v101_v45 = vmul.f32 %v97_v31, %v33_v8 }
   0xb   :  { %v71_v46 = vrot.slane %v56_v38, 6  ;;  %v74_v47 = vrot.slane %v58_v40, 5  ;;  %v79_v48 = vrot.slane %v57_v39, 6  ;;  %v81_v49 = vrot.slane %v59_v41, 5 }
   0xc   :  { %v70_v50 = vsel %vm69_vm0, %v68_v42, %v52_v34  ;;  %v78_v51 = vsel %vm69_vm0, %v77_v43, %v53_v35  ;;  %v102_v52 = vmul.f32 %v93_v30, %v34_v9  ;;  %v103_v53 = vmul.f32 %v97_v31, %v35_v10 }
   0xd   :  { %v73_v54 = vsel %vm72_vm1, %v71_v46, %v70_v50  ;;  %v80_v55 = vsel %vm72_vm1, %v79_v48, %v78_v51  ;;  %v104_v56 = vmul.f32 %v93_v30, %v36_v11  ;;  %v105_v57 = vmul.f32 %v97_v31, %v37_v12 }
   0xe   :  { %v76_v58 = vsel %vm75_vm2, %v74_v47, %v73_v54  ;;  %v82_v59 = vsel %vm75_vm2, %v81_v49, %v80_v55  ;;  %v106_v60 = vmul.f32 %v93_v30, %v38_v17  ;;  %v107_v61 = vmul.f32 %v97_v31, %v39_v18 }
   0xf   :  { %v85_v0 = vadd.f32 %v76_v58, %v643_v26  ;;  %v86_v1 = vadd.f32 %v82_v59, %v646_v27  ;;  %v116_v2 = vrot.slane %v100_v44, 1  ;;  %v118_v3 = vrot.slane %v104_v56, 7 }
  0x10   :  { %v120_v6 = vrot.slane %v106_v60, 6  ;;  %v122_v7 = vrot.slane %v101_v45, 1  ;;  %v124_v8 = vrot.slane %v105_v57, 7  ;;  %v126_v9 = vrot.slane %v107_v61, 6 }
  0x11   :  { %v117_v10 = vsel %vm69_vm0, %v102_v52, %v116_v2  ;;  %v142_v11 = vunpack.c.l.bf16 %v135_v62  ;;  %v143_v12 = vunpack.c.h.bf16 %v135_v62  ;;  %v150_v13 = vrot.slane %v561_v63, %v618_v15 }
  0x12   :  { %v119_v14 = vsel %vm72_vm1, %v118_v3, %v117_v10  ;;  %v123_v17 = vsel %vm69_vm0, %v103_v53, %v122_v7  ;;  %v154_v18 = vrot.slane %v561_v63, %v621_v16  ;;  %v197_v28 = vrot.slane %v562_v5, %v618_v15 }
  0x13   :  { %v121_v29 = vsel %vm75_vm2, %v120_v6, %v119_v14  ;;  %v125_v30 = vsel %vm72_vm1, %v124_v8, %v123_v17  ;;  %v157_v31 = vmul.f32 %v150_v13, %v136_v22  ;;  %v159_v34 = vmul.f32 %v150_v13, %v138_v24  ;;  %v732_v17 = vld [vmem:[%s900_s0 + $0x18] sm:$0x22] }
  0x14   :  { %v127_v35 = vsel %vm75_vm2, %v126_v9, %v125_v30  ;;  %v130_v36 = vadd.f32 %v121_v29, %v85_v0  ;;  %v158_v37 = vmul.f32 %v154_v18, %v137_v23  ;;  %v160_v38 = vmul.f32 %v154_v18, %v139_v25  ;;  %v308_v30 = vld [vmem:[%s901_s1] ss:$4 sm:$0x3] }
  0x15   :  { %v131_v39 = vadd.f32 %v127_v35, %v86_v1  ;;  %v161_v40 = vmul.f32 %v150_v13, %v140_v32  ;;  %v162_v41 = vmul.f32 %v154_v18, %v141_v33  ;;  %v163_v42 = vmul.f32 %v150_v13, %v142_v11 }
  0x16   :  { %v164_v43 = vmul.f32 %v154_v18, %v143_v12  ;;  %v173_v44 = vrot.slane %v157_v31, 4  ;;  %v174_v45 = vrot.slane %v159_v34, 3  ;;  %v180_v46 = vrot.slane %v158_v37, 4  ;;  %v566_v37 = vld [vmem:[%s901_s1 + $0x1] ss:$4 sm:$0x3] }
  0x17   :  { %v176_v47 = vrot.slane %v161_v40, 2  ;;  %v178_v48 = vrot.slane %v163_v42, 1  ;;  %v181_v49 = vrot.slane %v160_v38, 3  ;;  %v183_v50 = vrot.slane %v162_v41, 2  ;;  %v745_v38 = vld [vmem:[%s900_s0] sm:$0x88] }
  0x18   :  { %v175_v51 = vsel %vm69_vm0, %v174_v45, %v173_v44  ;;  %v185_v52 = vrot.slane %v164_v43, 1  ;;  %v201_v53 = vrot.slane %v562_v5, %v621_v16  ;;  %v204_v54 = vmul.f32 %v197_v28, %v136_v22 }
  0x19   :  { %v177_v55 = vsel %vm72_vm1, %v176_v47, %v175_v51  ;;  %v182_v56 = vsel %vm69_vm0, %v181_v49, %v180_v46  ;;  %v206_v57 = vmul.f32 %v197_v28, %v138_v24  ;;  %v208_v58 = vmul.f32 %v197_v28, %v140_v32 }
  0x1a   :  { %v179_v59 = vsel %vm75_vm2, %v178_v48, %v177_v55  ;;  %v184_v60 = vsel %vm72_vm1, %v183_v50, %v182_v56  ;;  %v205_v61 = vmul.f32 %v201_v53, %v137_v23  ;;  %v207_v22 = vmul.f32 %v201_v53, %v139_v25 }
  0x1b   :  { %v186_v62 = vsel %vm75_vm2, %v185_v52, %v184_v60  ;;  %v189_v63 = vadd.f32 %v179_v59, %v130_v36  ;;  %v209_v0 = vmul.f32 %v201_v53, %v141_v33  ;;  %v210_v24 = vmul.f32 %v197_v28, %v142_v11  ;;  %v296_v33 = vld [vmem:[%s900_s0] sm:$0x22]  ;;  %v720_v11 = vld [vmem:[%s900_s0 + $0x8] sm:$0x22] }
  0x1c   :  { %v190_v1 = vadd.f32 %v186_v62, %v131_v39  ;;  %v211_v2 = vmul.f32 %v201_v53, %v143_v12  ;;  %v220_v32 = vrot.slane %v204_v54, 5  ;;  %v221_v3 = vrot.slane %v206_v57, 4  ;;  %v725_v12 = vld [vmem:[%s900_s0 + $0x10] sm:$0x22] }
  0x1d   :  { %v223_v5 = vrot.slane %v208_v58, 3  ;;  %v225_v6 = vrot.slane %v210_v24, 2  ;;  %v227_v7 = vrot.slane %v205_v61, 5  ;;  %v228_v8 = vrot.slane %v207_v22, 4 }
  0x1e   :  { %v222_v19 = vsel %vm69_vm0, %v221_v3, %v220_v32  ;;  %v230_v23 = vrot.slane %v209_v0, 3  ;;  %v232_v20 = vrot.slane %v211_v2, 2  ;;  %v573_v10 = vmov 1966171168  }
  0x1f   :  { %v224_v25 = vsel %vm72_vm1, %v223_v5, %v222_v19  ;;  %v229_v9 = vsel %vm69_vm0, %v228_v8, %v227_v7  ;;  %v244_v21 = vunpack.c.l.s4 %v573_v10  ;;  %vm277_vm3 = vcmask 1040384   ;;  %v287_v7 = vld [vmem:[%s903_s3 + $0x2] sm:$0x3]  ;;  %v290_v8 = vld [vmem:[%s903_s3 + $0x4] sm:$0x3] }
  0x20   :  { %v226_v13 = vsel %vm75_vm2, %v225_v6, %v224_v25  ;;  %v231_v14 = vsel %vm72_vm1, %v230_v23, %v229_v9  ;;  %vm278_vm4 = vsmask.f32 256  ;;  %vm281_vm5 = vsmask.f32 1280 }
  0x21   :  { %v233_v18 = vsel %vm75_vm2, %v232_v20, %v231_v14  ;;  %v236_v28 = vadd.f32 %v226_v13, %v189_v63  ;;  %v245_v29 = vunpack.c.0.s8 %v244_v21  ;;  %v300_v34 = vunpack.c.l.bf16 %v296_v33  ;;  %vm758_vm6 = vmand %vm277_vm3, %vm278_vm4  ;;  %v284_v63 = vld [vmem:[%s903_s3] sm:$0x3] }
  0x22   :  { %v237_v31 = vadd.f32 %v233_v18, %v190_v1  ;;  %v301_v35 = vunpack.c.h.bf16 %v296_v33  ;;  %v302_v36 = vunpack.c.l.bf16 %v720_v11  ;;  %v303_v40 = vunpack.c.h.bf16 %v720_v11  ;;  %vm282_vm7 = vmand %vm69_vm0, %vm281_vm5  ;;  %v293_v11 = vld [vmem:[%s903_s3 + $0x6] sm:$0x3] }
  0x23   :  { %v748_v39 = vsub.s32 %v245_v29, %v603_v4  ;;  %v304_v41 = vunpack.c.l.bf16 %v725_v12  ;;  %v305_v42 = vunpack.c.h.bf16 %v725_v12  ;;  %v306_v44 = vunpack.c.l.bf16 %v732_v17  ;;  %vm772_vm8 = vmor %vm282_vm7, %vm758_vm6 }
  0x24   :  { %v563_v43 = vpack.c.bf16 %v237_v31, %v236_v28  ;;  %v307_v45 = vunpack.c.h.bf16 %v732_v17  ;;  %v313_v46 = vrot.slane %v308_v30, %v618_v15  ;;  %v317_v4 = vrot.slane %v308_v30, %v621_v16 }
  0x25   :  { %v357_v48 = vrot.slane %v566_v37, %v618_v15  ;;  %v361_v49 = vrot.slane %v566_v37, %v621_v16  ;;  %v400_v50 = vunpack.c.l.bf16 %v745_v38  ;;  %v397_v37 = vld [vmem:[%s900_s0 + $0x8] sm:$0x88]  ;;  %vm539_vm9 = vsmask.f32 7938 }
  0x26   :  { %v249_v51 = vrot.slane %v563_v43, %v748_v39  ;;  %v320_v52 = vmul.f32 %v313_v46, %v300_v34  ;;  %v322_v53 = vmul.f32 %v313_v46, %v302_v36  ;;  %v324_v54 = vmul.f32 %v313_v46, %v304_v41  ;;  %vm540_vm11 = vmand %vm277_vm3, %vm539_vm9 }
  0x27   :  { %v321_v55 = vmul.f32 %v317_v4, %v301_v35  ;;  %v323_v56 = vmul.f32 %v317_v4, %v303_v40  ;;  %v325_v57 = vmul.f32 %v317_v4, %v305_v42  ;;  %v326_v58 = vmul.f32 %v313_v46, %v306_v44 }
  0x28   :  { %v257_v59 = vrot.slane %v249_v51, %v748_v39  ;;  %v250_v60 = vcombine.high %v249_v51, %v249_v51  ;;  %v327_v61 = vmul.f32 %v317_v4, %v307_v45  ;;  %v336_v22 = vrot.slane %v320_v52, 2  ;;  %v398_v4 = vld [vmem:[%s900_s0 + $0x10] sm:$0x88]  ;;  %v399_v52 = vld [vmem:[%s900_s0 + $0x18] sm:$0x88] }
  0x29   :  { %v337_v0 = vrot.slane %v322_v53, 1  ;;  %v340_v24 = vrot.slane %v326_v58, 7  ;;  %v342_v1 = vrot.slane %v321_v55, 2  ;;  %v343_v2 = vrot.slane %v323_v56, 1 }
  0x2a   :  { %v564_v32 = vpack.i.b16 %v257_v59, %v257_v59  ;;  %v266_v3 = vunpack.i.h.s16 %v257_v59  ;;  %v264_v5 = vrot.slane %v250_v60, %v748_v39  ;;  %v346_v6 = vrot.slane %v327_v61, 7 }
  0x2b   :  { %v338_v19 = vsel %vm69_vm0, %v337_v0, %v336_v22  ;;  %v344_v23 = vsel %vm69_vm0, %v343_v2, %v342_v1  ;;  %v364_v20 = vmul.f32 %v357_v48, %v300_v34  ;;  %v365_v25 = vmul.f32 %v361_v49, %v301_v35 }
  0x2c   :  { %v285_v9 = vsel %vm772_vm8, %v564_v32, %v284_v63  ;;  %v270_v10 = vpack.i.b16 %v266_v3, %v266_v3  ;;  %v565_v21 = vpack.i.b16 %v264_v5, %v264_v5  ;;  %v268_v33 = vunpack.i.h.s16 %v264_v5 }
  0x2d   :  { %286 = vst [vmem:[%s903_s3] sm:$0x3] %v285_v9  ;;  %v339_v12 = vsel %vm72_vm1, %v324_v54, %v338_v19  ;;  %v345_v13 = vsel %vm72_vm1, %v325_v57, %v344_v23  ;;  %v366_v14 = vmul.f32 %v357_v48, %v302_v36  ;;  %v367_v17 = vmul.f32 %v361_v49, %v303_v40  ;;  %v568_v57 = vld [vmem:[%s901_s1 + $0x3] ss:$4 sm:$0x3] }
  0x2e   :  { %v288_v18 = vsel %vm772_vm8, %v270_v10, %v287_v7  ;;  %v291_v28 = vsel %vm772_vm8, %v565_v21, %v290_v8  ;;  %v272_v29 = vpack.i.b16 %v268_v33, %v268_v33  ;;  %v341_v30 = vsel %vm75_vm2, %v340_v24, %v339_v12 }
  0x2f   :  { %289 = vst [vmem:[%s903_s3 + $0x2] sm:$0x3] %v288_v18  ;;  %292 = vst [vmem:[%s903_s3 + $0x4] sm:$0x3] %v291_v28  ;;  %v347_v31 = vsel %vm75_vm2, %v346_v6, %v345_v13  ;;  %v350_v34 = vadd.f32 %v341_v30, %v643_v26  ;;  %v368_v35 = vmul.f32 %v357_v48, %v304_v41  ;;  %v380_v26 = vrot.slane %v364_v20, 3 }
  0x30   :  { %v369_v36 = vmul.f32 %v361_v49, %v305_v42  ;;  %v294_v40 = vsel %vm772_vm8, %v272_v29, %v293_v11  ;;  %v351_v43 = vadd.f32 %v347_v31, %v646_v27  ;;  %v370_v46 = vmul.f32 %v357_v48, %v306_v44  ;;  %v567_v48 = vld [vmem:[%s901_s1 + $0x2] ss:$4 sm:$0x3] }
  0x31   :  { %v371_v47 = vmul.f32 %v361_v49, %v307_v45  ;;  %295 = vst [vmem:[%s903_s3 + $0x6] sm:$0x3] %v294_v40  ;;  %v381_v41 = vrot.slane %v366_v14, 2  ;;  %v383_v42 = vrot.slane %v368_v35, 1  ;;  %v386_v51 = vrot.slane %v365_v25, 3 }
  0x32   :  { %v387_v53 = vrot.slane %v367_v17, 2  ;;  %v389_v27 = vrot.slane %v369_v36, 1  ;;  %v401_v44 = vunpack.c.h.bf16 %v745_v38  ;;  %v402_v45 = vunpack.c.l.bf16 %v397_v37 }
  0x33   :  { %v382_v49 = vsel %vm69_vm0, %v381_v41, %v380_v26  ;;  %v403_v54 = vunpack.c.h.bf16 %v397_v37  ;;  %v404_v55 = vunpack.c.l.bf16 %v398_v4  ;;  %v405_v56 = vunpack.c.h.bf16 %v398_v4 }
  0x34   :  { %v384_v58 = vsel %vm72_vm1, %v383_v42, %v382_v49  ;;  %v388_v59 = vsel %vm69_vm0, %v387_v53, %v386_v51  ;;  %v406_v60 = vunpack.c.l.bf16 %v399_v52  ;;  %v407_v61 = vunpack.c.h.bf16 %v399_v52 }
  0x35   :  { %v385_v22 = vsel %vm75_vm2, %v370_v46, %v384_v58  ;;  %v390_v62 = vsel %vm72_vm1, %v389_v27, %v388_v59  ;;  %v413_v63 = vrot.slane %v567_v48, %v618_v15  ;;  %v417_v0 = vrot.slane %v567_v48, %v621_v16 }
  0x36   :  { %v391_v24 = vsel %vm75_vm2, %v371_v47, %v390_v62  ;;  %v394_v1 = vadd.f32 %v385_v22, %v350_v34  ;;  %v459_v2 = vrot.slane %v568_v57, %v618_v15  ;;  %v463_v32 = vrot.slane %v568_v57, %v621_v16 }
  0x37   :  { %v395_v3 = vadd.f32 %v391_v24, %v351_v43  ;;  %v420_v5 = vmul.f32 %v413_v63, %v400_v50  ;;  %v421_v6 = vmul.f32 %v417_v0, %v401_v44  ;;  %v422_v7 = vmul.f32 %v413_v63, %v402_v45  ;;  %v550_v24 = vld [vmem:[%s903_s3 + $0x4] sm:$0x3] }
  0x38   :  { %v423_v8 = vmul.f32 %v417_v0, %v403_v54  ;;  %v424_v19 = vmul.f32 %v413_v63, %v404_v55  ;;  %v425_v23 = vmul.f32 %v417_v0, %v405_v56  ;;  %v426_v20 = vmul.f32 %v413_v63, %v406_v60 }
  0x39   :  { %v427_v25 = vmul.f32 %v417_v0, %v407_v61  ;;  %v436_v9 = vrot.slane %v420_v5, 6  ;;  %v437_v10 = vrot.slane %v422_v7, 5  ;;  %v443_v21 = vrot.slane %v421_v6, 6  ;;  %v547_v0 = vld [vmem:[%s903_s3 + $0x2] sm:$0x3] }
  0x3a   :  { %v439_v33 = vrot.slane %v424_v19, 4  ;;  %v441_v11 = vrot.slane %v426_v20, 3  ;;  %v444_v12 = vrot.slane %v423_v8, 5  ;;  %v446_v15 = vrot.slane %v425_v23, 4 }
  0x3b   :  { %v438_v16 = vsel %vm69_vm0, %v437_v10, %v436_v9  ;;  %v448_v13 = vrot.slane %v427_v25, 3  ;;  %v466_v14 = vmul.f32 %v459_v2, %v400_v50  ;;  %v467_v17 = vmul.f32 %v463_v32, %v401_v44 }
  0x3c   :  { %v440_v18 = vsel %vm72_vm1, %v439_v33, %v438_v16  ;;  %v445_v28 = vsel %vm69_vm0, %v444_v12, %v443_v21  ;;  %v468_v29 = vmul.f32 %v459_v2, %v402_v45  ;;  %v469_v30 = vmul.f32 %v463_v32, %v403_v54 }
  0x3d   :  { %v442_v31 = vsel %vm75_vm2, %v441_v11, %v440_v18  ;;  %v447_v34 = vsel %vm72_vm1, %v446_v15, %v445_v28  ;;  %v470_v35 = vmul.f32 %v459_v2, %v404_v55  ;;  %v471_v36 = vmul.f32 %v463_v32, %v405_v56 }
  0x3e   :  { %v449_v37 = vsel %vm75_vm2, %v448_v13, %v447_v34  ;;  %v472_v40 = vmul.f32 %v459_v2, %v406_v60  ;;  %v473_v43 = vmul.f32 %v463_v32, %v407_v61  ;;  %v452_v46 = vadd.f32 %v442_v31, %v394_v1  ;;  %v544_v61 = vld [vmem:[%s903_s3] sm:$0x3] }
  0x3f   :  { %v482_v38 = vrot.slane %v466_v14, 7  ;;  %v483_v50 = vrot.slane %v468_v29, 6  ;;  %v485_v47 = vrot.slane %v470_v35, 5  ;;  %v489_v26 = vrot.slane %v467_v17, 7 }
  0x40   :  { %v487_v4 = vrot.slane %v472_v40, 4  ;;  %v490_v41 = vrot.slane %v469_v30, 6  ;;  %v492_v42 = vrot.slane %v471_v36, 5  ;;  %v453_v51 = vadd.f32 %v449_v37, %v395_v3 }
  0x41   :  { %v484_v52 = vsel %vm69_vm0, %v483_v50, %v482_v38  ;;  %v494_v53 = vrot.slane %v473_v43, 4  ;;  %vm541_vm10 = vsmask.f32 7942 }
  0x42   :  { %v486_v27 = vsel %vm72_vm1, %v485_v47, %v484_v52  ;;  %v491_v44 = vsel %vm69_vm0, %v490_v41, %v489_v26  ;;  %vm542_vm12 = vmand %vm69_vm0, %vm541_vm10 }
  0x43   :  { %v488_v45 = vsel %vm75_vm2, %v487_v4, %v486_v27  ;;  %v493_v48 = vsel %vm72_vm1, %v492_v42, %v491_v44  ;;  %vm863_vm13 = vmor %vm542_vm12, %vm540_vm11 }
  0x44   :  { %v495_v49 = vsel %vm75_vm2, %v494_v53, %v493_v48  ;;  %v498_v54 = vadd.f32 %v488_v45, %v452_v46 }
  0x45   :  { %v499_v55 = vadd.f32 %v495_v49, %v453_v51 }
  0x47   :  { %v569_v56 = vpack.c.bf16 %v499_v55, %v498_v54 }
  0x49   :  { %v511_v57 = vrot.slane %v569_v56, %v748_v39 }
  0x4b   :  { %v519_v58 = vrot.slane %v511_v57, %v748_v39  ;;  %v512_v59 = vcombine.high %v511_v57, %v511_v57 }
  0x4d   :  { %v570_v22 = vpack.i.b16 %v519_v58, %v519_v58  ;;  %v528_v62 = vunpack.i.h.s16 %v519_v58  ;;  %v526_v63 = vrot.slane %v512_v59, %v748_v39  ;;  %v553_v39 = vld [vmem:[%s903_s3 + $0x6] sm:$0x3] }
  0x4f   :  { %v545_v1 = vsel %vm863_vm13, %v570_v22, %v544_v61  ;;  %v532_v2 = vpack.i.b16 %v528_v62, %v528_v62  ;;  %v571_v32 = vpack.i.b16 %v526_v63, %v526_v63  ;;  %v530_v3 = vunpack.i.h.s16 %v526_v63 }
  0x50   :  { %546 = vst [vmem:[%s903_s3] sm:$0x3] %v545_v1 }
  0x51   :  { %v548_v5 = vsel %vm863_vm13, %v532_v2, %v547_v0  ;;  %v551_v6 = vsel %vm863_vm13, %v571_v32, %v550_v24  ;;  %v534_v7 = vpack.i.b16 %v530_v3, %v530_v3 }
  0x52   :  { %549 = vst [vmem:[%s903_s3 + $0x2] sm:$0x3] %v548_v5  ;;  %552 = vst [vmem:[%s903_s3 + $0x4] sm:$0x3] %v551_v6 }
  0x53   :  { %v554_v8 = vsel %vm863_vm13, %v534_v7, %v553_v39 }
  0x54   :  { %555 = vst [vmem:[%s903_s3 + $0x6] sm:$0x3] %v554_v8 }

// kernel: token_conv_attention.5
= control target key start
LH: loop header
LB: loop body
LE: loop exit
PB: predicated region body
PF: predicated region fallthrough
CT: control target
= control target key end

     0   :  { %12 = vsyncpa [#allocation5], 0  ;;  %s1893_s0 = inlined_call_operand.vmem [shape: bf16[2,4,256], index: 0, kind: input, shape index: {}]   ;;  %s1894_s1 = inlined_call_operand.vmem [shape: bf16[2,16,256], index: 1, kind: input, shape index: {}]   ;;  %s1895_s2 = inlined_call_operand.vmem [shape: bf16[2,16,256], index: 2, kind: input, shape index: {}]   ;;  %s1896_s3 = inlined_call_operand.vmem [shape: bf16[256,256], index: 3, kind: input, shape index: {}]   ;;  %s1897_s4 = inlined_call_operand.vmem [shape: f32[1,256], index: 4, kind: input, shape index: {}]   ;;  %s1898_s5 = inlined_call_operand.vmem [shape: bf16[256,256], index: 5, kind: input, shape index: {}]   ;;  %s1899_s6 = inlined_call_operand.vmem [shape: f32[1,256], index: 6, kind: input, shape index: {}]   ;;  %s1900_s7 = inlined_call_operand.hbm [shape: f32[2,4,256], index: 7, kind: output, shape index: {}]  }
   0x1   :  { %14 = vsyncpa [#allocation5 + $0x1], 0  ;;  %s1561_s24 = smov 0   ;;  %s1563_s25 = smov 0  }
   0x2   :  { %s1565_s26 = smov 0   ;;  %s1567_s27 = smov 0  }
   0x3 LB: > { %s1582_s28 = sadd.s32 4294967295, %s1516_s27   ;;  %s1179_s29 = sadd.s32 4294967294, %s1516_s27   ;;  %s1516_s27 = sphi %s1567_s27, %s1906_s27   ;;  %s1512_s26 = sphi %s1565_s26, %s1905_s26   ;;  %s1508_s25 = sphi %s1563_s25, %s1904_s25   ;;  %s1504_s24 = sphi %s1561_s24, %s1903_s24  }
   0x4   : > { %s1586_s30 = sadd.s32 1, %s1516_s27   ;;  %s189_s8 = sadd.s32 1, %s1512_s26 }
   0x5   : > { %s186_s9 = ssub.s32 %s1516_s27, %s1586_s30  ;;  %p199_p0 = scmp.ne.s32.totalorder %s1512_s26, %s1508_s25 }
   0x6   : > { %p187_p1 = scmp.eq.s32.totalorder %s186_s9, 0  ;;  %p200_p2 = scmp.eq.s32.totalorder %s1582_s28, 1 }
   0x7   : > { %p205_p3 = scmp.ne.s32.totalorder %s1508_s25, %s1504_s24  ;;  %p206_p4 = scmp.eq.s32.totalorder %s1179_s29, 1 }
   0x8   : > { %s1597_s10 = scalar_select %p187_p1, %s1512_s26, %s189_s8  }
   0x9   : > { %p1599_p5 = por %p200_p2, %p199_p0  ;;  %p1603_p6 = por %p206_p4, %p205_p3 }
   0xa   : > { %p1182_p7 = scmp.ge.s32.totalorder %s1516_s27, 1  ;;  %p260_p8 = scmp.lt.s32.totalorder %s1516_s27, 3 }
   0xc   : > { %p261_p9 = pnand %p1182_p7, %p260_p8 }
   0xd   : > { %v1346_v0 = vld [vmem:[%s1896_s3 + $0x4] ss:$8 sps:$4 sm:$0xff] (!%p261_p9)   ;;  %v1348_v1 = vld [vmem:[%s1896_s3] ss:$8 sps:$4 sm:$0xff] (!%p261_p9)   ;;  %v1349_v2 = vld [vmem:[%s1896_s3 + $0x14] ss:$8 sps:$4 sm:$0xff] (!%p261_p9)   ;;  %v353_v37 = vlaneseq (!%p261_p9) }
   0xe   : > { %264 = sbr.rel (%p261_p9) target bundleno = 1137 (0x471), region = 48  ;;  %534 = vmatprep.subr.bf16.mxu0 (!%p261_p9), %v1346_v0  ;;  %v1351_v3 = vld [vmem:[%s1896_s3 + $0x10] ss:$8 sps:$4 sm:$0xff] (!%p261_p9)   ;;  %v1352_v4 = vld [vmem:[%s1896_s3 + $0x24] ss:$8 sps:$4 sm:$0xff] (!%p261_p9)   ;;  %p302_p10 = scmp.lt.s32.totalorder (!%p261_p9), %s1582_s28, 1 }
   0xf   : > { %535 = vmatpush1.bf16.msra.mxu0 (!%p261_p9), %v1348_v1  ;;  %v1354_v5 = vld [vmem:[%s1896_s3 + $0x20] ss:$8 sps:$4 sm:$0xff] (!%p261_p9)   ;;  %v1355_v6 = vld [vmem:[%s1896_s3 + $0x34] ss:$8 sps:$4 sm:$0xff] (!%p261_p9)   ;;  %v1357_v7 = vld [vmem:[%s1896_s3 + $0x30] ss:$8 sps:$4 sm:$0xff] (!%p261_p9)  }
  0x10   : > { %536 = vmatprep.subr.bf16.mxu0 (!%p261_p9), %v1349_v2  ;;  %v1358_v8 = vld [vmem:[%s1896_s3 + $0x44] ss:$8 sps:$4 sm:$0xff] (!%p261_p9)   ;;  %v1360_v9 = vld [vmem:[%s1896_s3 + $0x40] ss:$8 sps:$4 sm:$0xff] (!%p261_p9)   ;;  %v1361_v10 = vld [vmem:[%s1896_s3 + $0x54] ss:$8 sps:$4 sm:$0xff] (!%p261_p9)  }
  0x11   : > { %v1363_v11 = vld [vmem:[%s1896_s3 + $0x50] ss:$8 sps:$4 sm:$0xff] (!%p261_p9)   ;;  %v1364_v12 = vld [vmem:[%s1896_s3 + $0x64] ss:$8 sps:$4 sm:$0xff] (!%p261_p9)   ;;  %v1366_v13 = vld [vmem:[%s1896_s3 + $0x60] ss:$8 sps:$4 sm:$0xff] (!%p261_p9)  }
  0x12   : > { %v1367_v15 = vld [vmem:[%s1896_s3 + $0x74] ss:$8 sps:$4 sm:$0xff] (!%p261_p9)   ;;  %v1369_v17 = vld [vmem:[%s1896_s3 + $0x70] ss:$8 sps:$4 sm:$0xff] (!%p261_p9)   ;;  %v1370_v18 = vld [vmem:[%s1896_s3 + $0x84] ss:$8 sps:$4 sm:$0xff] (!%p261_p9)  }
  0x13   : > { %537 = vmatpush1.bf16.msra.mxu0 (!%p261_p9), %v1351_v3  ;;  %v1372_v19 = vld [vmem:[%s1896_s3 + $0x80] ss:$8 sps:$4 sm:$0xff] (!%p261_p9)   ;;  %v1373_v20 = vld [vmem:[%s1896_s3 + $0x94] ss:$8 sps:$4 sm:$0xff] (!%p261_p9)   ;;  %v1375_v21 = vld [vmem:[%s1896_s3 + $0x90] ss:$8 sps:$4 sm:$0xff] (!%p261_p9)  }
  0x14   : > { %538 = vmatprep.subr.bf16.mxu0 (!%p261_p9), %v1352_v4  ;;  %v1376_v22 = vld [vmem:[%s1896_s3 + $0xa4] ss:$8 sps:$4 sm:$0xff] (!%p261_p9)   ;;  %v1378_v23 = vld [vmem:[%s1896_s3 + $0xa0] ss:$8 sps:$4 sm:$0xff] (!%p261_p9)   ;;  %v1379_v24 = vld [vmem:[%s1896_s3 + $0xb4] ss:$8 sps:$4 sm:$0xff] (!%p261_p9)  }
  0x15   : > { %s303_s15 = scalar_select %p302_p10, %s1582_s28, 1  ;;  %v1381_v25 = vld [vmem:[%s1896_s3 + $0xb0] ss:$8 sps:$4 sm:$0xff]   ;;  %v1382_v26 = vld [vmem:[%s1896_s3 + $0xc4] ss:$8 sps:$4 sm:$0xff]   ;;  %v1518_v36 = vmov 0.0  }
  0x16   : > { %v1384_v27 = vld [vmem:[%s1896_s3 + $0xc0] ss:$8 sps:$4 sm:$0xff]   ;;  %v1385_v28 = vld [vmem:[%s1896_s3 + $0xd4] ss:$8 sps:$4 sm:$0xff]   ;;  %v1387_v29 = vld [vmem:[%s1896_s3 + $0xd0] ss:$8 sps:$4 sm:$0xff]   ;;  %1293 = vmatprep.subr.bf16.mxu1 %v1518_v36 }
  0x17   : > { %539 = vmatpush1.bf16.msra.mxu0 %v1354_v5  ;;  %s1269_s20 = sshll.u32 %s303_s15, 2  ;;  %s1270_s9 = sshll.u32 %s303_s15, 4  ;;  %v1388_v30 = vld [vmem:[%s1896_s3 + $0xe4] ss:$8 sps:$4 sm:$0xff]   ;;  %v1390_v31 = vld [vmem:[%s1896_s3 + $0xe0] ss:$8 sps:$4 sm:$0xff]  }
  0x18   : > { %540 = vmatprep.subr.bf16.mxu0 %v1355_v6  ;;  %s306_s8 = scalar_lea.vmem %s1893_s0, %s1269_s20  ;;  %s1659_s23 = scalar_lea.vmem %s1894_s1, %s1270_s9  ;;  %v1391_v32 = vld [vmem:[%s1896_s3 + $0xf4] ss:$8 sps:$4 sm:$0xff]   ;;  %v1393_v33 = vld [vmem:[%s1896_s3 + $0xf0] ss:$8 sps:$4 sm:$0xff]   ;;  %vm1519_vm0 = vmmov 0   ;;  %v1724_v38 = vshrl.u32 %v353_v37, 7 }
  0x19   : > { %v1190_v14 = vld.sshfl [vmem:[%s306_s8] sm:$0x33 pattern:$0x76325410]  ;;  %s1667_s14 = scalar_lea.vmem %s1895_s2, %s1270_s9  ;;  %v1395_v35 = vld [vmem:[%s1659_s23 + $0x4] ss:$8 sps:$4 sm:$0xff]   ;;  %1295 = vmatprep.mubr.msk.bf16.mxu1 %vm1519_vm0, %v1518_v36 }
  0x1a   : > { %v371_v16 = vcombine.high %v1190_v14, %v1190_v14  ;;  %v1394_v34 = vld [vmem:[%s1659_s23] ss:$8 sps:$4 sm:$0xff]   ;;  %1294 = vmatpush3.bf16.xpose.msra.mxu1 %v1395_v35  ;;  %v355_v39 = vsub.s32 0, %v1724_v38  ;;  %v359_v41 = vsub.s32 1, %v1724_v38  ;;  %vm640_vm1 = vcmask 125952   ;;  %s299_s9 = sand.u32 1, %s1508_s25  }
  0x1b   : > { %541 = vmatpush1.bf16.msra.mxu0 %v1357_v7  ;;  %1299 = vmatprep.subr.bf16.mxu1 %v1518_v36  ;;  %v351_v40 = vld [vmem:[%s1897_s4] sm:$0x3]  ;;  %v1397_v0 = vld [vmem:[%s1667_s14 + $0x4] ss:$8 sps:$4 sm:$0xff]   ;;  %vm657_vm2 = vcmask 130048   ;;  %s1183_s20 = sshll.u32 %s299_s9, 3 }
  0x1c   : > { %542 = vmatprep.subr.bf16.mxu0 %v1358_v8  ;;  %566 = vmatprep.mubr.bf16.mxu0 %v371_v16  ;;  %v356_v42 = vrot.slane %v351_v40, %v355_v39  ;;  %v360_v43 = vrot.slane %v351_v40, %v359_v41  ;;  %v1396_v63 = vld [vmem:[%s1667_s14] ss:$8 sps:$4 sm:$0xff]   ;;  %v1401_v16 = vld [vmem:[%s1898_s5 + $0x10] ss:$8 sps:$4 sm:$0xff]   ;;  %v1433_v35 = vld [vmem:[%s1898_s5 + $0xb4] ss:$8 sps:$4 sm:$0xff]  }
  0x1d   : > { %v1436_v37 = vld [vmem:[%s1898_s5 + $0xc4] ss:$8 sps:$4 sm:$0xff]   ;;  %v1434_v40 = vld [vmem:[%s1898_s5 + $0xc0] ss:$8 sps:$4 sm:$0xff]   ;;  %s1272_s29 = sshll.u32 %s1582_s28, 7  ;;  %s301_s13 = scalar_lea.vmem [#allocation4], %s1183_s20 }
  0x1e   : > { %s1096_s23 = sshll.u32 %s301_s13, 4  ;;  %s1851_s17 = scalar_lea.hbm %s1900_s7, %s1272_s29  ;;  %s1853_s23 = int_to_ptr.vmem [resolvable:$true] %s1096_s23 }
  0x1f   : > { %543 = vmatpush1.bf16.msra.mxu0 %v1360_v9  ;;  %s1082_s18 = scalar_lea.sflag [#allocation5], %s299_s9  ;;  %s1454_s19 = scalar_lea.vmem %s1853_s23, 128 }
  0x20   : > { %544 = vmatprep.subr.bf16.mxu0 %v1361_v10  ;;  %p1455_p11 = scmp.ne.s32.totalorder %s1853_s23, %s1454_s19  ;;  %s1520_s28 = smov [#allocation4]  }
  0x21   : > { %s1458_s8 = sshll.u32 %s1520_s28, 4  ;;  %s1459_s8 = int_to_ptr.vmem [resolvable:$false] %s1458_s8 }
  0x22   : > { %p1456_p12 = pnand %p1455_p11, %p1599_p5  ;;  %s1460_s21 = scalar_lea.vmem %s1459_s8, 256 }
  0x23   : > { %545 = vmatpush1.bf16.msra.mxu0 %v1363_v11  ;;  %p1461_p0 = scmp.lt.s32.totalorder %s1853_s23, %s1459_s8  ;;  %p1462_p1 = scmp.lt.s32.totalorder %s1460_s21, %s1454_s19 }
  0x24   : > { %546 = vmatprep.subr.bf16.mxu0 %v1364_v12  ;;  %p1457_p13 = pneg %p1456_p12 }
  0x25   : > { %p1463_p2 = por %p1462_p1, %p1461_p0 }
  0x27   : > { %547 = vmatpush1.bf16.msra.mxu0 %v1366_v13  ;;  %v1398_v13 = vld [vmem:[%s1898_s5] ss:$8 sps:$4 sm:$0xff]   ;;  %p1464_p3 = pnand %p1463_p2, %p1457_p13 }
  0x28   : > { %548 = vmatprep.subr.bf16.mxu0 %v1367_v15  ;;  %v1403_v15 = vld [vmem:[%s1898_s5 + $0x14] ss:$8 sps:$4 sm:$0xff]  }
  0x2b   : > { %549 = vmatpush1.bf16.msra.mxu0 %v1369_v17  ;;  %v1406_v17 = vld [vmem:[%s1898_s5 + $0x24] ss:$8 sps:$4 sm:$0xff]  }
  0x2c   : > { %550 = vmatprep.subr.bf16.mxu0 %v1370_v18  ;;  %v1404_v18 = vld [vmem:[%s1898_s5 + $0x20] ss:$8 sps:$4 sm:$0xff]  }
  0x2f   : > { %551 = vmatpush1.bf16.msra.mxu0 %v1372_v19  ;;  %v1409_v19 = vld [vmem:[%s1898_s5 + $0x34] ss:$8 sps:$4 sm:$0xff]  }
  0x30   : > { %552 = vmatprep.subr.bf16.mxu0 %v1373_v20  ;;  %v1407_v20 = vld [vmem:[%s1898_s5 + $0x30] ss:$8 sps:$4 sm:$0xff]  }
  0x33   : > { %553 = vmatpush1.bf16.msra.mxu0 %v1375_v21  ;;  %v1412_v21 = vld [vmem:[%s1898_s5 + $0x44] ss:$8 sps:$4 sm:$0xff]  }
  0x34   : > { %554 = vmatprep.subr.bf16.mxu0 %v1376_v22  ;;  %v1410_v22 = vld [vmem:[%s1898_s5 + $0x40] ss:$8 sps:$4 sm:$0xff]  }
  0x37   : > { %555 = vmatpush1.bf16.msra.mxu0 %v1378_v23  ;;  %v1415_v23 = vld [vmem:[%s1898_s5 + $0x54] ss:$8 sps:$4 sm:$0xff]  }
  0x38   : > { %556 = vmatprep.subr.bf16.mxu0 %v1379_v24  ;;  %v1413_v24 = vld [vmem:[%s1898_s5 + $0x50] ss:$8 sps:$4 sm:$0xff]  }
  0x3b   : > { %557 = vmatpush1.bf16.msra.mxu0 %v1381_v25  ;;  %v1418_v25 = vld [vmem:[%s1898_s5 + $0x64] ss:$8 sps:$4 sm:$0xff]  }
  0x3c   : > { %558 = vmatprep.subr.bf16.mxu0 %v1382_v26  ;;  %v1416_v26 = vld [vmem:[%s1898_s5 + $0x60] ss:$8 sps:$4 sm:$0xff]  }
  0x3f   : > { %559 = vmatpush1.bf16.msra.mxu0 %v1384_v27  ;;  %v1421_v27 = vld [vmem:[%s1898_s5 + $0x74] ss:$8 sps:$4 sm:$0xff]  }
  0x40   : > { %560 = vmatprep.subr.bf16.mxu0 %v1385_v28  ;;  %v1419_v28 = vld [vmem:[%s1898_s5 + $0x70] ss:$8 sps:$4 sm:$0xff]  }
  0x43   : > { %561 = vmatpush1.bf16.msra.mxu0 %v1387_v29  ;;  %v1424_v29 = vld [vmem:[%s1898_s5 + $0x84] ss:$8 sps:$4 sm:$0xff]  }
  0x44   : > { %562 = vmatprep.subr.bf16.mxu0 %v1388_v30  ;;  %v1422_v30 = vld [vmem:[%s1898_s5 + $0x80] ss:$8 sps:$4 sm:$0xff]  }
  0x47   : > { %563 = vmatpush1.bf16.msra.mxu0 %v1390_v31  ;;  %v1427_v31 = vld [vmem:[%s1898_s5 + $0x94] ss:$8 sps:$4 sm:$0xff]  }
  0x48   : > { %564 = vmatprep.subr.bf16.mxu0 %v1391_v32  ;;  %v1425_v32 = vld [vmem:[%s1898_s5 + $0x90] ss:$8 sps:$4 sm:$0xff]  }
  0x4b   : > { %565 = vmatpush1.bf16.msra.mxu0 %v1393_v33  ;;  %v1430_v33 = vld [vmem:[%s1898_s5 + $0xa4] ss:$8 sps:$4 sm:$0xff]  }
  0x4c   : > { %1281 = vmatprep.subr.bf16.mxu0 %v1518_v36 }
  0x4e   : > { %567 = vmatmul.mubr.bf16.vlgmr.msra.gmra.mrb[0].mxu0 %v1190_v14  ;;  %v1400_v14 = vld [vmem:[%s1898_s5 + $0x4] ss:$8 sps:$4 sm:$0xff]  }
  0x4f   : > { %1283 = vmatprep.mubr.msk.bf16.mxu0 %vm1519_vm0, %v1518_v36 }
  0x54   : > { %1282 = vmatpush3.bf16.xpose.msra.mxu0 %v1394_v34  ;;  %v1428_v34 = vld [vmem:[%s1898_s5 + $0xa0] ss:$8 sps:$4 sm:$0xff]  }
  0x55   : > { %1287 = vmatprep.subr.bf16.mxu0 %v1518_v36 }
 0x121   : > { %v568_v44 = vpop.f32.mrb[0].mxu0 }
 0x122   : > { %v569_v45 = vadd.f32 %v568_v44, %v356_v42  ;;  %v570_v46 = vpop.f32.mrb[1].mxu0  ;;  %v1439_v42 = vld [vmem:[%s1898_s5 + $0xd4] ss:$8 sps:$4 sm:$0xff]   ;;  %v1440_v44 = vld [vmem:[%s1898_s5 + $0xe0] ss:$8 sps:$4 sm:$0xff]  }
 0x123   : > { %v571_v47 = vadd.f32 %v570_v46, %v360_v43  ;;  %v572_v48 = vpop.f32.mrb[2].mxu0  ;;  %v1437_v43 = vld [vmem:[%s1898_s5 + $0xd0] ss:$8 sps:$4 sm:$0xff]   ;;  %v1445_v46 = vld [vmem:[%s1898_s5 + $0xf4] ss:$8 sps:$4 sm:$0xff]  }
 0x124   : > { %v573_v49 = vpop.f32.mrb[3].mxu0 }
 0x125   : > { %v1223_v50 = vpack.c.bf16 %v571_v47, %v569_v45  ;;  %v1442_v45 = vld [vmem:[%s1898_s5 + $0xe4] ss:$8 sps:$4 sm:$0xff]   ;;  %v1443_v47 = vld [vmem:[%s1898_s5 + $0xf0] ss:$8 sps:$4 sm:$0xff]  }
 0x127   : > { %1224 = vst.sshfl [vmem:[#allocation2] sm:$0x33 pattern:$0x76325410] %v1223_v50 }
 0x12e   : > { %v589_v51 = vld [vmem:[#allocation2] sm:$0x3]  ;;  %v705_v52 = vld [vmem:[#allocation2 + $0x2] sm:$0x3] }
 0x12f   : > { %1284 = vmatmul.mubr.bf16.vlgmr.msra.gmra.mrb[4].mxu0 %v589_v51  ;;  %1296 = vmatmul.mubr.bf16.vlgmr.msra.gmra.mrb[0].mxu1 %v705_v52 }
 0x130   : > { %1289 = vmatprep.mubr.msk.bf16.mxu0 %vm1519_vm0, %v1518_v36  ;;  %1301 = vmatprep.mubr.msk.bf16.mxu1 %vm1519_vm0, %v1518_v36  ;;  %v1431_v36 = vld [vmem:[%s1898_s5 + $0xb0] ss:$8 sps:$4 sm:$0xff]  }
 0x131   : > { %1288 = vmatpush3.bf16.msra.mxu0 %v1396_v63  ;;  %1300 = vmatpush3.bf16.msra.mxu1 %v1397_v0 }
 0x132   : > { %1035 = vmatprep.subr.bf16.mxu1 %v1400_v14 }
 0x202   : > { %v634_v53 = vpop.f32.mrb[4].mxu0  ;;  %v750_v54 = vpop.f32.mrb[0].mxu1 }
 0x203   : > { %v1285_v55 = vpop.f32.mrb[5].mxu0  ;;  %v1297_v56 = vpop.f32.mrb[1].mxu1  ;;  %v641_v57 = vsel %vm640_vm1, %v634_v53, -inf  ;;  %v756_v62 = vsel %vm640_vm1, %v750_v54, -inf }
 0x204   : > { %v753_v58 = vpop.f32.mrb[2].mxu1  ;;  %642 = vmax.xlane.f32.xlu0 %v641_v57  ;;  %v637_v59 = vpop.f32.mrb[6].mxu0 }
 0x205   : > { %v1286_v60 = vpop.f32.mrb[7].mxu0  ;;  %v1298_v61 = vpop.f32.mrb[3].mxu1 }
 0x208   : > { %757 = vmax.xlane.f32.xlu0 %v756_v62 }
 0x291   : > { %v643_v1 = vpop.xlane.xlu0 %642 }
 0x292   : > { %v644_v2 = vsub.f32 %v634_v53, %v643_v1 }
 0x294   : > { %v645_v3 = vmul.f32 1.442695, %v644_v2  ;;  %v852_v2 = vld [vmem:[%s1899_s6] sm:$0x3] }
 0x295   : > { %v758_v4 = vpop.xlane.xlu0 %757 }
 0x296   : > { %1446 = vpow2.f32 %v645_v3  ;;  %v759_v5 = vsub.f32 %v750_v54, %v758_v4  ;;  %v857_v3 = vrot.slane %v852_v2, %v355_v39  ;;  %v861_v4 = vrot.slane %v852_v2, %v359_v41 }
 0x298   : > { %v760_v6 = vmul.f32 1.442695, %v759_v5 }
 0x29a   : > { %1448 = vpow2.f32 %v760_v6 }
 0x2a0   : > { %v1447_v7 = vpop.eup %1446 }
 0x2a1   : > { %v647_v8 = vsel %vm640_vm1, %v1447_v7, 0.0  ;;  %v650_v9 = vpack.c.bf16 %v1447_v7, %v1447_v7 }
 0x2a2   : > { %648 = vadd.xlane.f32.xlu1 %v647_v8 }
 0x2a3   : > { %1290 = vmatmul.mubr.msk.bf16.vlgmr.msra.gmra.mrb[8].mxu0 %vm657_vm2, %v650_v9 }
 0x2a4   : > { %v1449_v10 = vpop.eup %1448 }
 0x2a5   : > { %v762_v11 = vsel %vm640_vm1, %v1449_v10, 0.0  ;;  %v765_v12 = vpack.c.bf16 %v1449_v10, %v1449_v10 }
 0x2a6   : > { %763 = vadd.xlane.f32.xlu1 %v762_v11 }
 0x2a7   : > { %1302 = vmatmul.mubr.msk.bf16.vlgmr.msra.gmra.mrb[4].mxu1 %vm657_vm2, %v765_v12 }
 0x2a8   : > { %1036 = vmatpush1.bf16.msra.mxu1 %v1398_v13 }
 0x2a9   : > { %1037 = vmatprep.subr.bf16.mxu1 %v1403_v15 }
 0x2ac   : > { %1038 = vmatpush1.bf16.msra.mxu1 %v1401_v16 }
 0x2ad   : > { %1039 = vmatprep.subr.bf16.mxu1 %v1406_v17 }
 0x2b0   : > { %1040 = vmatpush1.bf16.msra.mxu1 %v1404_v18 }
 0x2b1   : > { %1041 = vmatprep.subr.bf16.mxu1 %v1409_v19 }
 0x2b4   : > { %1042 = vmatpush1.bf16.msra.mxu1 %v1407_v20 }
 0x2b5   : > { %1043 = vmatprep.subr.bf16.mxu1 %v1412_v21 }
 0x2b8   : > { %1044 = vmatpush1.bf16.msra.mxu1 %v1410_v22 }
 0x2b9   : > { %1045 = vmatprep.subr.bf16.mxu1 %v1415_v23 }
 0x2bc   : > { %1046 = vmatpush1.bf16.msra.mxu1 %v1413_v24 }
 0x2bd   : > { %1047 = vmatprep.subr.bf16.mxu1 %v1418_v25 }
 0x2c0   : > { %1048 = vmatpush1.bf16.msra.mxu1 %v1416_v26 }
 0x2c1   : > { %1049 = vmatprep.subr.bf16.mxu1 %v1421_v27 }
 0x2c4   : > { %1050 = vmatpush1.bf16.msra.mxu1 %v1419_v28 }
 0x2c5   : > { %1051 = vmatprep.subr.bf16.mxu1 %v1424_v29 }
 0x2c8   : > { %1052 = vmatpush1.bf16.msra.mxu1 %v1422_v30 }
 0x2c9   : > { %1053 = vmatprep.subr.bf16.mxu1 %v1427_v31 }
 0x2cc   : > { %1054 = vmatpush1.bf16.msra.mxu1 %v1425_v32 }
 0x2cd   : > { %1055 = vmatprep.subr.bf16.mxu1 %v1430_v33 }
 0x2d0   : > { %1056 = vmatpush1.bf16.msra.mxu1 %v1428_v34 }
 0x2d1   : > { %1057 = vmatprep.subr.bf16.mxu1 %v1433_v35 }
 0x2d4   : > { %1058 = vmatpush1.bf16.msra.mxu1 %v1431_v36 }
 0x2d5   : > { %1059 = vmatprep.subr.bf16.mxu1 %v1436_v37 }
 0x2d8   : > { %1060 = vmatpush1.bf16.msra.mxu1 %v1434_v40 }
 0x2d9   : > { %1061 = vmatprep.subr.bf16.mxu1 %v1439_v42 }
 0x2dc   : > { %1062 = vmatpush1.bf16.msra.mxu1 %v1437_v43 }
 0x2dd   : > { %1063 = vmatprep.subr.bf16.mxu1 %v1442_v45 }
 0x2e0   : > { %1064 = vmatpush1.bf16.msra.mxu1 %v1440_v44 }
 0x2e1   : > { %1065 = vmatprep.subr.bf16.mxu1 %v1445_v46 }
 0x2e4   : > { %1066 = vmatpush1.bf16.msra.mxu1 %v1443_v47 }
 0x32f   : > { %v649_v48 = vpop.xlane.xlu1 %648 }
 0x330   : > { %1450 = vrcp.f32 %v649_v48 }
 0x333   : > { %v764_v49 = vpop.xlane.xlu1 %763 }
 0x334   : > { %1452 = vrcp.f32 %v764_v49 }
 0x33a   : > { %v1451_v50 = vpop.eup %1450 }
 0x33e   : > { %v1453_v57 = vpop.eup %1452 }
 0x376   : > { %v695_v51 = vpop.f32.mrb[8].mxu0 }
 0x377   : > { %v702_v52 = vmul.f32 %v1451_v50, %v695_v51  ;;  %v1291_v53 = vpop.f32.mrb[9].mxu0 }
 0x378   : > { %v698_v54 = vpop.f32.mrb[10].mxu0 }
 0x379   : > { %v703_v55 = vpack.c.bf16 %v702_v52, %v702_v52  ;;  %v1292_v56 = vpop.f32.mrb[11].mxu0 }
 0x37a   : > { %v809_v58 = vpop.f32.mrb[4].mxu1 }
 0x37b   : > { %704 = vst [vmem:[#allocation3] sm:$0x3] %v703_v55  ;;  %v816_v59 = vmul.f32 %v1453_v57, %v809_v58  ;;  %v1303_v60 = vpop.f32.mrb[5].mxu1 }
 0x37c   : > { %v812_v61 = vpop.f32.mrb[6].mxu1 }
 0x37d   : > { %v817_v62 = vpack.c.bf16 %v816_v59, %v816_v59  ;;  %v1304_v63 = vpop.f32.mrb[7].mxu1 }
 0x37f   : > { %818 = vst [vmem:[#allocation3 + $0x2] sm:$0x3] %v817_v62 }
 0x386   : > { %v1231_v0 = vld.sshfl [vmem:[#allocation3] sm:$0x33 pattern:$0x76325410] }
 0x387   : > { %v872_v1 = vcombine.high %v1231_v0, %v1231_v0 }
 0x389   : > { %1067 = vmatprep.mubr.bf16.mxu1 %v872_v1 }
 0x38a   : > { %1068 = vmatmul.mubr.bf16.vlgmr.msra.gmra.mrb[8].mxu1 %v1231_v0 }
 0x45d   : > { %v1069_v5 = vpop.f32.mrb[8].mxu1 }
 0x45e   : > { %v1070_v6 = vadd.f32 %v1069_v5, %v857_v3  ;;  %v1071_v7 = vpop.f32.mrb[9].mxu1 }
 0x45f   : > { %v1072_v8 = vadd.f32 %v1071_v7, %v861_v4  ;;  %v1073_v9 = vpop.f32.mrb[10].mxu1 }
 0x460   : > { %v1074_v10 = vpop.f32.mrb[11].mxu1 }
 0x461   : > { %v1078_v11 = vcombine.low %v1070_v6, %v1072_v8 }
 0x463   : > { %1080 = vst [vmem:[%s301_s13] sm:$0xff] %v1078_v11 }
 0x464   : > { %1467 = shalt.err (!%p1464_p3)
}
 0x465   : > { %s1468_s9 = scalar_lea.hbm %s1851_s17, 128  ;;  %s1472_s20 = scalar_lea.hbm %s1900_s7, 256 }
 0x466   : > { %p1469_p4 = scmp.ne.s32.totalorder %s1851_s17, %s1468_s9  ;;  %p1473_p9 = scmp.lt.u32.totalorder %s1851_s17, %s1900_s7 }
 0x467   : > { %p1474_p10 = scmp.lt.u32.totalorder %s1472_s20, %s1468_s9  ;;  %p1476_p12 = scmp.lt.u32.totalorder %s1468_s9, %s1851_s17 }
 0x468   : > { %p1470_p7 = pnand %p1469_p4, %p1599_p5 }
 0x469   : > { %p1475_p11 = por %p1474_p10, %p1473_p9 }
 0x46a   : > { %p1471_p8 = pneg %p1470_p7 }
 0x46b   : > { %p1477_p13 = por %p1476_p12, %p1475_p11 }
 0x46d   : > { %p1478_p0 = pnand %p1477_p13, %p1471_p8 }
 0x46f   : > { %1481 = shalt.err (!%p1478_p0)
}
 0x470   : > { %1305 = dma.vmem_to_hbm [thread:$0]  (%p1599_p5), %s1853_s23, 128, %s1851_s17, %s1082_s18  }
 0x471 PF: > { %p1311_p1 = scmp.ge.s32.totalorder %s1516_s27, 2  ;;  %s1108_s14 = sand.u32 1, %s1504_s24  }
 0x472   : > { %s1109_s16 = scalar_lea.sflag [#allocation5], %s1108_s14 }
 0x473   : > { %p1308_p2 = pnand %p1311_p1, %p1603_p6 }
 0x475   : > { %1499 = dma.done.wait (!%p1308_p2), %s1109_s16, 128  }
 0x476   : > { %1501 = vsyncadd (!%p1308_p2), %s1109_s16, 4294967168  ;;  %p17_p3 = scmp.ge.s32.totalorder %s1586_s30, 4   ;;  %s1903_s24 = smov %s1508_s25 }
 0x477   : > { %s1904_s25 = smov %s1512_s26  ;;  %s1905_s26 = smov %s1597_s10 }
 0x478   : > { %s1906_s27 = smov %s1586_s30  ;;  %19 = sbr.rel (!%p17_p3) target bundleno = 3 (0x3), region = 89 }
 0x47f   :  { %1114 = vsyncpa [#allocation5], 1 }
 0x480   :  { %1116 = vsyncpa [#allocation5 + $0x1], 1 }

// kernel: token_conv_attention.3
= control target key start
LH: loop header
LB: loop body
LE: loop exit
PB: predicated region body
PF: predicated region fallthrough
CT: control target
= control target key end

     0   :  { %s4829_s1 = inlined_call_operand.vmem [shape: bf16[3,256,256], index: 1, kind: input, shape index: {}]   ;;  %s4830_s0 = inlined_call_operand.vmem [shape: f32[32,256], index: 0, kind: input, shape index: {}]   ;;  %s4831_s3 = inlined_call_operand.vmem [shape: bf16[3,256,256], index: 3, kind: input, shape index: {}]   ;;  %s4832_s2 = inlined_call_operand.vmem [shape: f32[3,256], index: 2, kind: input, shape index: {}]   ;;  %s4833_s4 = inlined_call_operand.vmem [shape: f32[3,256], index: 4, kind: input, shape index: {}]   ;;  %s4834_s7 = inlined_call_operand.vmem [shape: bf16[2,256,256], index: 7, kind: input, shape index: {}]   ;;  %s4835_s5 = inlined_call_operand.vmem [shape: f32[3,256], index: 5, kind: input, shape index: {}]   ;;  %s4836_s6 = inlined_call_operand.vmem [shape: f32[3,256], index: 6, kind: input, shape index: {}]   ;;  %s4837_s8 = inlined_call_operand.vmem [shape: f32[2,256], index: 8, kind: input, shape index: {}]   ;;  %s4838_s10 = inlined_call_operand.vmem [shape: bf16[32,256], index: 10, kind: output, shape index: {1}]   ;;  %s4839_s9 = inlined_call_operand.vmem [shape: bf16[32,256], index: 9, kind: output, shape index: {0}]   ;;  %s4840_s11 = inlined_call_operand.vmem [shape: bf16[32,256], index: 11, kind: output, shape index: {2}]  }
   0x1   :  { %v3115_v0 = vld [vmem:[%s4829_s1 + $0x4] ss:$8 sps:$4 sm:$0xff]   ;;  %v3117_v1 = vld [vmem:[%s4829_s1] ss:$8 sps:$4 sm:$0xff]   ;;  %v3118_v2 = vld [vmem:[%s4829_s1 + $0x14] ss:$8 sps:$4 sm:$0xff]  }
   0x2   :  { %251 = vmatprep.subr.bf16.mxu0 %v3115_v0  ;;  %v3120_v3 = vld [vmem:[%s4829_s1 + $0x10] ss:$8 sps:$4 sm:$0xff]   ;;  %v3121_v4 = vld [vmem:[%s4829_s1 + $0x24] ss:$8 sps:$4 sm:$0xff]   ;;  %v3123_v5 = vld [vmem:[%s4829_s1 + $0x20] ss:$8 sps:$4 sm:$0xff]  }
   0x3   :  { %252 = vmatpush1.bf16.msra.mxu0 %v3117_v1  ;;  %v3124_v6 = vld [vmem:[%s4829_s1 + $0x34] ss:$8 sps:$4 sm:$0xff]   ;;  %v3126_v7 = vld [vmem:[%s4829_s1 + $0x30] ss:$8 sps:$4 sm:$0xff]   ;;  %v3127_v8 = vld [vmem:[%s4829_s1 + $0x44] ss:$8 sps:$4 sm:$0xff]  }
   0x4   :  { %253 = vmatprep.subr.bf16.mxu0 %v3118_v2  ;;  %v3129_v9 = vld [vmem:[%s4829_s1 + $0x40] ss:$8 sps:$4 sm:$0xff]   ;;  %v3130_v10 = vld [vmem:[%s4829_s1 + $0x54] ss:$8 sps:$4 sm:$0xff]   ;;  %v3132_v11 = vld [vmem:[%s4829_s1 + $0x50] ss:$8 sps:$4 sm:$0xff]  }
   0x5   :  { %v3133_v12 = vld [vmem:[%s4829_s1 + $0x64] ss:$8 sps:$4 sm:$0xff]   ;;  %v38_v14 = vld [vmem:[%s4830_s0 + $0x18] sm:$0xff]  ;;  %v3135_v16 = vld [vmem:[%s4829_s1 + $0x60] ss:$8 sps:$4 sm:$0xff]  }
   0x6   :  { %v36_v13 = vld [vmem:[%s4830_s0 + $0x8] sm:$0xff]  ;;  %v3136_v17 = vld [vmem:[%s4829_s1 + $0x74] ss:$8 sps:$4 sm:$0xff]   ;;  %v3138_v18 = vld [vmem:[%s4829_s1 + $0x70] ss:$8 sps:$4 sm:$0xff]  }
   0x7   :  { %254 = vmatpush1.bf16.msra.mxu0 %v3120_v3  ;;  %v3676_v15 = vpack.c.bf16 %v38_v14, %v36_v13  ;;  %v3139_v19 = vld [vmem:[%s4829_s1 + $0x84] ss:$8 sps:$4 sm:$0xff]   ;;  %v3141_v20 = vld [vmem:[%s4829_s1 + $0x80] ss:$8 sps:$4 sm:$0xff]   ;;  %v3142_v21 = vld [vmem:[%s4829_s1 + $0x94] ss:$8 sps:$4 sm:$0xff]  }
   0x8   :  { %255 = vmatprep.subr.bf16.mxu0 %v3121_v4  ;;  %v3144_v22 = vld [vmem:[%s4829_s1 + $0x90] ss:$8 sps:$4 sm:$0xff]   ;;  %v3145_v23 = vld [vmem:[%s4829_s1 + $0xa4] ss:$8 sps:$4 sm:$0xff]   ;;  %v3147_v24 = vld [vmem:[%s4829_s1 + $0xa0] ss:$8 sps:$4 sm:$0xff]  }
   0x9   :  { %283 = vmatprep.mubr.bf16.mxu0 %v3676_v15  ;;  %v3148_v25 = vld [vmem:[%s4829_s1 + $0xb4] ss:$8 sps:$4 sm:$0xff]   ;;  %v3150_v26 = vld [vmem:[%s4829_s1 + $0xb0] ss:$8 sps:$4 sm:$0xff]   ;;  %v3151_v27 = vld [vmem:[%s4829_s1 + $0xc4] ss:$8 sps:$4 sm:$0xff]  }
   0xa   :  { %v3211_v28 = vld [vmem:[%s4831_s3 + $0x4] ss:$8 sps:$4 sm:$0xff]   ;;  %v3213_v29 = vld [vmem:[%s4831_s3] ss:$8 sps:$4 sm:$0xff]   ;;  %v3214_v31 = vld [vmem:[%s4831_s3 + $0x14] ss:$8 sps:$4 sm:$0xff]  }
   0xb   :  { %256 = vmatpush1.bf16.msra.mxu0 %v3123_v5  ;;  %v3153_v30 = vld [vmem:[%s4829_s1 + $0xc0] ss:$8 sps:$4 sm:$0xff]   ;;  %v3154_v32 = vld [vmem:[%s4829_s1 + $0xd4] ss:$8 sps:$4 sm:$0xff]   ;;  %552 = vmatprep.subr.bf16.mxu1 %v3211_v28  ;;  %v3216_v33 = vld [vmem:[%s4831_s3 + $0x10] ss:$8 sps:$4 sm:$0xff]  }
   0xc   :  { %257 = vmatprep.subr.bf16.mxu0 %v3124_v6  ;;  %553 = vmatpush1.bf16.msra.mxu1 %v3213_v29  ;;  %v3217_v34 = vld [vmem:[%s4831_s3 + $0x24] ss:$8 sps:$4 sm:$0xff]   ;;  %v3156_v35 = vld [vmem:[%s4829_s1 + $0xd0] ss:$8 sps:$4 sm:$0xff]   ;;  %v3219_v37 = vld [vmem:[%s4831_s3 + $0x20] ss:$8 sps:$4 sm:$0xff]  }
   0xd   :  { %554 = vmatprep.subr.bf16.mxu1 %v3214_v31  ;;  %v3157_v36 = vld [vmem:[%s4829_s1 + $0xe4] ss:$8 sps:$4 sm:$0xff]   ;;  %v3220_v38 = vld [vmem:[%s4831_s3 + $0x34] ss:$8 sps:$4 sm:$0xff]   ;;  %v3159_v39 = vld [vmem:[%s4829_s1 + $0xe0] ss:$8 sps:$4 sm:$0xff]  }
   0xe   :  { %v3160_v40 = vld [vmem:[%s4829_s1 + $0xf4] ss:$8 sps:$4 sm:$0xff]   ;;  %v3162_v41 = vld [vmem:[%s4829_s1 + $0xf0] ss:$8 sps:$4 sm:$0xff]   ;;  %v35_v42 = vld [vmem:[%s4830_s0] sm:$0xff] }
   0xf   :  { %258 = vmatpush1.bf16.msra.mxu0 %v3126_v7  ;;  %v37_v43 = vld [vmem:[%s4830_s0 + $0x10] sm:$0xff]  ;;  %v3165_v45 = vld [vmem:[%s4829_s1 + $0x104] ss:$8 sps:$4 sm:$0xff]   ;;  %v42_v47 = vld [vmem:[%s4830_s0 + $0x38] sm:$0xff] }
  0x10   :  { %259 = vmatprep.subr.bf16.mxu0 %v3127_v8  ;;  %555 = vmatpush1.bf16.msra.mxu1 %v3216_v33  ;;  %v3222_v44 = vld [vmem:[%s4831_s3 + $0x30] ss:$8 sps:$4 sm:$0xff]   ;;  %v40_v46 = vld [vmem:[%s4830_s0 + $0x28] sm:$0xff]  ;;  %v3226_v50 = vld [vmem:[%s4831_s3 + $0x54] ss:$8 sps:$4 sm:$0xff]   ;;  %v3787_v52 = vpack.c.bf16 %v37_v43, %v35_v42 }
  0x11   :  { %556 = vmatprep.subr.bf16.mxu1 %v3217_v34  ;;  %v3223_v48 = vld [vmem:[%s4831_s3 + $0x44] ss:$8 sps:$4 sm:$0xff]   ;;  %v3225_v49 = vld [vmem:[%s4831_s3 + $0x40] ss:$8 sps:$4 sm:$0xff]   ;;  %v3168_v53 = vld [vmem:[%s4829_s1 + $0x114] ss:$8 sps:$4 sm:$0xff]   ;;  %v3792_v54 = vpack.c.bf16 %v42_v47, %v40_v46  ;;  %v81_v46 = vlaneseq }
  0x12   :  { %v3163_v51 = vld [vmem:[%s4829_s1 + $0x100] ss:$8 sps:$4 sm:$0xff]   ;;  %v3228_v55 = vld [vmem:[%s4831_s3 + $0x50] ss:$8 sps:$4 sm:$0xff]   ;;  %v3229_v56 = vld [vmem:[%s4831_s3 + $0x64] ss:$8 sps:$4 sm:$0xff]  }
  0x13   :  { %260 = vmatpush1.bf16.msra.mxu0 %v3129_v9  ;;  %v3166_v57 = vld [vmem:[%s4829_s1 + $0x110] ss:$8 sps:$4 sm:$0xff]   ;;  %v39_v58 = vld [vmem:[%s4830_s0 + $0x20] sm:$0xff]  ;;  %v3232_v62 = vld [vmem:[%s4831_s3 + $0x74] ss:$8 sps:$4 sm:$0xff]   ;;  %v82_v47 = vshrl.u32 %v81_v46, 7 }
  0x14   :  { %261 = vmatprep.subr.bf16.mxu0 %v3130_v10  ;;  %557 = vmatpush1.bf16.msra.mxu1 %v3219_v37  ;;  %v41_v59 = vld [vmem:[%s4830_s0 + $0x30] sm:$0xff]  ;;  %v3171_v60 = vld [vmem:[%s4829_s1 + $0x124] ss:$8 sps:$4 sm:$0xff]   ;;  %v3231_v61 = vld [vmem:[%s4831_s3 + $0x60] ss:$8 sps:$4 sm:$0xff]  }
  0x15   :  { %558 = vmatprep.subr.bf16.mxu1 %v3220_v38  ;;  %v3169_v63 = vld [vmem:[%s4829_s1 + $0x120] ss:$8 sps:$4 sm:$0xff]   ;;  %v3174_v0 = vld [vmem:[%s4829_s1 + $0x134] ss:$8 sps:$4 sm:$0xff]   ;;  %v3826_v1 = vpack.c.bf16 %v41_v59, %v39_v58  ;;  %v3234_v2 = vld [vmem:[%s4831_s3 + $0x70] ss:$8 sps:$4 sm:$0xff]  }
  0x16   :  { %v3235_v3 = vld [vmem:[%s4831_s3 + $0x84] ss:$8 sps:$4 sm:$0xff]   ;;  %v3172_v4 = vld [vmem:[%s4829_s1 + $0x130] ss:$8 sps:$4 sm:$0xff]   ;;  %v3237_v6 = vld [vmem:[%s4831_s3 + $0x80] ss:$8 sps:$4 sm:$0xff]  }
  0x17   :  { %262 = vmatpush1.bf16.msra.mxu0 %v3132_v11  ;;  %v3177_v5 = vld [vmem:[%s4829_s1 + $0x144] ss:$8 sps:$4 sm:$0xff]   ;;  %v3238_v7 = vld [vmem:[%s4831_s3 + $0x94] ss:$8 sps:$4 sm:$0xff]   ;;  %v3175_v8 = vld [vmem:[%s4829_s1 + $0x140] ss:$8 sps:$4 sm:$0xff]  }
  0x18   :  { %263 = vmatprep.subr.bf16.mxu0 %v3133_v12  ;;  %559 = vmatpush1.bf16.msra.mxu1 %v3222_v44  ;;  %v3180_v9 = vld [vmem:[%s4829_s1 + $0x154] ss:$8 sps:$4 sm:$0xff]   ;;  %v3240_v10 = vld [vmem:[%s4831_s3 + $0x90] ss:$8 sps:$4 sm:$0xff]   ;;  %v3183_v12 = vld [vmem:[%s4829_s1 + $0x164] ss:$8 sps:$4 sm:$0xff]  }
  0x19   :  { %560 = vmatprep.subr.bf16.mxu1 %v3223_v48  ;;  %v3178_v11 = vld [vmem:[%s4829_s1 + $0x150] ss:$8 sps:$4 sm:$0xff]   ;;  %v3181_v13 = vld [vmem:[%s4829_s1 + $0x160] ss:$8 sps:$4 sm:$0xff]   ;;  %v3186_v14 = vld [vmem:[%s4829_s1 + $0x174] ss:$8 sps:$4 sm:$0xff]  }
  0x1a   :  { %v3202_v28 = vld [vmem:[%s4829_s1 + $0x1d0] ss:$8 sps:$4 sm:$0xff]   ;;  %v3207_v29 = vld [vmem:[%s4829_s1 + $0x1e4] ss:$8 sps:$4 sm:$0xff]   ;;  %v3210_v31 = vld [vmem:[%s4829_s1 + $0x1f4] ss:$8 sps:$4 sm:$0xff]  }
  0x1b   :  { %264 = vmatpush1.bf16.msra.mxu0 %v3135_v16  ;;  %v3184_v16 = vld [vmem:[%s4829_s1 + $0x170] ss:$8 sps:$4 sm:$0xff]   ;;  %v3241_v33 = vld [vmem:[%s4831_s3 + $0xa4] ss:$8 sps:$4 sm:$0xff]   ;;  %v3243_v34 = vld [vmem:[%s4831_s3 + $0xa0] ss:$8 sps:$4 sm:$0xff]  }
  0x1c   :  { %265 = vmatprep.subr.bf16.mxu0 %v3136_v17  ;;  %561 = vmatpush1.bf16.msra.mxu1 %v3225_v49  ;;  %v3189_v17 = vld [vmem:[%s4829_s1 + $0x184] ss:$8 sps:$4 sm:$0xff]   ;;  %v3249_v38 = vld [vmem:[%s4831_s3 + $0xc0] ss:$8 sps:$4 sm:$0xff]   ;;  %v3256_v43 = vld [vmem:[%s4831_s3 + $0xf4] ss:$8 sps:$4 sm:$0xff]  }
  0x1d   :  { %562 = vmatprep.subr.bf16.mxu1 %v3226_v50  ;;  %v3247_v37 = vld [vmem:[%s4831_s3 + $0xc4] ss:$8 sps:$4 sm:$0xff]   ;;  %v3255_v42 = vld [vmem:[%s4831_s3 + $0xe0] ss:$8 sps:$4 sm:$0xff]   ;;  %v3258_v44 = vld [vmem:[%s4831_s3 + $0xf0] ss:$8 sps:$4 sm:$0xff]  }
  0x1e   :  { %v3962_v48 = vsub.s32 0, %v82_v47  ;;  %v79_v49 = vld [vmem:[%s4832_s2] ss:$4 sm:$0x3]  ;;  %v3967_v50 = vsub.s32 1, %v82_v47 }
  0x1f   :  { %266 = vmatpush1.bf16.msra.mxu0 %v3138_v18  ;;  %v3187_v18 = vld [vmem:[%s4829_s1 + $0x180] ss:$8 sps:$4 sm:$0xff]  }
  0x20   :  { %267 = vmatprep.subr.bf16.mxu0 %v3139_v19  ;;  %563 = vmatpush1.bf16.msra.mxu1 %v3228_v55  ;;  %v3192_v19 = vld [vmem:[%s4829_s1 + $0x194] ss:$8 sps:$4 sm:$0xff]  }
  0x21   :  { %564 = vmatprep.subr.bf16.mxu1 %v3229_v56 }
  0x23   :  { %268 = vmatpush1.bf16.msra.mxu0 %v3141_v20  ;;  %v3190_v20 = vld [vmem:[%s4829_s1 + $0x190] ss:$8 sps:$4 sm:$0xff]  }
  0x24   :  { %269 = vmatprep.subr.bf16.mxu0 %v3142_v21  ;;  %565 = vmatpush1.bf16.msra.mxu1 %v3231_v61  ;;  %v3195_v21 = vld [vmem:[%s4829_s1 + $0x1a4] ss:$8 sps:$4 sm:$0xff]  }
  0x25   :  { %566 = vmatprep.subr.bf16.mxu1 %v3232_v62 }
  0x27   :  { %270 = vmatpush1.bf16.msra.mxu0 %v3144_v22  ;;  %v3193_v22 = vld [vmem:[%s4829_s1 + $0x1a0] ss:$8 sps:$4 sm:$0xff]  }
  0x28   :  { %271 = vmatprep.subr.bf16.mxu0 %v3145_v23  ;;  %567 = vmatpush1.bf16.msra.mxu1 %v3234_v2  ;;  %v3198_v23 = vld [vmem:[%s4829_s1 + $0x1b4] ss:$8 sps:$4 sm:$0xff]  }
  0x29   :  { %568 = vmatprep.subr.bf16.mxu1 %v3235_v3 }
  0x2b   :  { %272 = vmatpush1.bf16.msra.mxu0 %v3147_v24  ;;  %v3196_v24 = vld [vmem:[%s4829_s1 + $0x1b0] ss:$8 sps:$4 sm:$0xff]  }
  0x2c   :  { %273 = vmatprep.subr.bf16.mxu0 %v3148_v25  ;;  %569 = vmatpush1.bf16.msra.mxu1 %v3237_v6  ;;  %v3201_v25 = vld [vmem:[%s4829_s1 + $0x1c4] ss:$8 sps:$4 sm:$0xff]  }
  0x2d   :  { %570 = vmatprep.subr.bf16.mxu1 %v3238_v7 }
  0x2f   :  { %274 = vmatpush1.bf16.msra.mxu0 %v3150_v26  ;;  %v3199_v26 = vld [vmem:[%s4829_s1 + $0x1c0] ss:$8 sps:$4 sm:$0xff]  }
  0x30   :  { %275 = vmatprep.subr.bf16.mxu0 %v3151_v27  ;;  %571 = vmatpush1.bf16.msra.mxu1 %v3240_v10  ;;  %v3204_v27 = vld [vmem:[%s4829_s1 + $0x1d4] ss:$8 sps:$4 sm:$0xff]  }
  0x31   :  { %572 = vmatprep.subr.bf16.mxu1 %v3241_v33 }
  0x33   :  { %276 = vmatpush1.bf16.msra.mxu0 %v3153_v30  ;;  %v3205_v30 = vld [vmem:[%s4829_s1 + $0x1e0] ss:$8 sps:$4 sm:$0xff]  }
  0x34   :  { %277 = vmatprep.subr.bf16.mxu0 %v3154_v32  ;;  %v3208_v32 = vld [vmem:[%s4829_s1 + $0x1f0] ss:$8 sps:$4 sm:$0xff]   ;;  %573 = vmatpush1.bf16.msra.mxu1 %v3243_v34 }
  0x37   :  { %278 = vmatpush1.bf16.msra.mxu0 %v3156_v35  ;;  %v3244_v35 = vld [vmem:[%s4831_s3 + $0xb4] ss:$8 sps:$4 sm:$0xff]  }
  0x38   :  { %279 = vmatprep.subr.bf16.mxu0 %v3157_v36  ;;  %v3246_v36 = vld [vmem:[%s4831_s3 + $0xb0] ss:$8 sps:$4 sm:$0xff]   ;;  %574 = vmatprep.subr.bf16.mxu1 %v3244_v35 }
  0x39   :  { %575 = vmatpush1.bf16.msra.mxu1 %v3246_v36 }
  0x3a   :  { %576 = vmatprep.subr.bf16.mxu1 %v3247_v37  ;;  %v3259_v37 = vld [vmem:[%s4831_s3 + $0x100] ss:$8 sps:$4 sm:$0xff]  }
  0x3b   :  { %280 = vmatpush1.bf16.msra.mxu0 %v3159_v39  ;;  %v3250_v39 = vld [vmem:[%s4831_s3 + $0xd4] ss:$8 sps:$4 sm:$0xff]  }
  0x3c   :  { %281 = vmatprep.subr.bf16.mxu0 %v3160_v40  ;;  %v3252_v40 = vld [vmem:[%s4831_s3 + $0xd0] ss:$8 sps:$4 sm:$0xff]  }
  0x3d   :  { %577 = vmatpush1.bf16.msra.mxu1 %v3249_v38 }
  0x3e   :  { %578 = vmatprep.subr.bf16.mxu1 %v3250_v39 }
  0x3f   :  { %282 = vmatpush1.bf16.msra.mxu0 %v3162_v41  ;;  %v3253_v41 = vld [vmem:[%s4831_s3 + $0xe4] ss:$8 sps:$4 sm:$0xff]  }
  0x40   :  { %944 = vmatprep.subr.bf16.mxu0 %v3165_v45  ;;  %v3261_v45 = vld [vmem:[%s4831_s3 + $0x104] ss:$8 sps:$4 sm:$0xff]  }
  0x41   :  { %579 = vmatpush1.bf16.msra.mxu1 %v3252_v40  ;;  %v3264_v40 = vld [vmem:[%s4831_s3 + $0x114] ss:$8 sps:$4 sm:$0xff]  }
  0x42   :  { %284 = vmatmul.mubr.bf16.vlgmr.msra.gmra.mrb[0].mxu0 %v3787_v52  ;;  %580 = vmatprep.subr.bf16.mxu1 %v3253_v41 }
  0x43   :  { %945 = vmatpush1.bf16.msra.mxu0 %v3163_v51  ;;  %293 = vmatprep.mubr.bf16.mxu0 %v3792_v54  ;;  %v84_v51 = vrot.slane %v79_v49, %v3962_v48 }
  0x44   :  { %946 = vmatprep.subr.bf16.mxu0 %v3168_v53  ;;  %v88_v53 = vrot.slane %v79_v49, %v3967_v50 }
  0x45   :  { %581 = vmatpush1.bf16.msra.mxu1 %v3255_v42 }
  0x46   :  { %582 = vmatprep.subr.bf16.mxu1 %v3256_v43 }
  0x47   :  { %947 = vmatpush1.bf16.msra.mxu0 %v3166_v57 }
  0x48   :  { %948 = vmatprep.subr.bf16.mxu0 %v3171_v60 }
  0x49   :  { %583 = vmatpush1.bf16.msra.mxu1 %v3258_v44 }
  0x4a   :  { %294 = vmatmul.mubr.bf16.gmra.mrb[4].mxu0 %v3826_v1  ;;  %1247 = vmatprep.subr.bf16.mxu1 %v3261_v45 }
  0x4b   :  { %949 = vmatpush1.bf16.msra.mxu0 %v3169_v63  ;;  %976 = vmatprep.mubr.bf16.mxu0 %v3676_v15 }
  0x4c   :  { %950 = vmatprep.subr.bf16.mxu0 %v3174_v0 }
  0x4f   :  { %951 = vmatpush1.bf16.msra.mxu0 %v3172_v4 }
  0x50   :  { %952 = vmatprep.subr.bf16.mxu0 %v3177_v5 }
  0x53   :  { %953 = vmatpush1.bf16.msra.mxu0 %v3175_v8 }
  0x54   :  { %954 = vmatprep.subr.bf16.mxu0 %v3180_v9 }
  0x57   :  { %955 = vmatpush1.bf16.msra.mxu0 %v3178_v11 }
  0x58   :  { %956 = vmatprep.subr.bf16.mxu0 %v3183_v12 }
  0x5b   :  { %957 = vmatpush1.bf16.msra.mxu0 %v3181_v13 }
  0x5c   :  { %958 = vmatprep.subr.bf16.mxu0 %v3186_v14 }
  0x5f   :  { %959 = vmatpush1.bf16.msra.mxu0 %v3184_v16 }
  0x60   :  { %960 = vmatprep.subr.bf16.mxu0 %v3189_v17 }
  0x63   :  { %961 = vmatpush1.bf16.msra.mxu0 %v3187_v18 }
  0x64   :  { %962 = vmatprep.subr.bf16.mxu0 %v3192_v19 }
  0x67   :  { %963 = vmatpush1.bf16.msra.mxu0 %v3190_v20 }
  0x68   :  { %964 = vmatprep.subr.bf16.mxu0 %v3195_v21 }
  0x6b   :  { %965 = vmatpush1.bf16.msra.mxu0 %v3193_v22 }
  0x6c   :  { %966 = vmatprep.subr.bf16.mxu0 %v3198_v23 }
  0x6f   :  { %967 = vmatpush1.bf16.msra.mxu0 %v3196_v24 }
  0x70   :  { %968 = vmatprep.subr.bf16.mxu0 %v3201_v25 }
  0x73   :  { %969 = vmatpush1.bf16.msra.mxu0 %v3199_v26 }
  0x74   :  { %970 = vmatprep.subr.bf16.mxu0 %v3204_v27 }
  0x77   :  { %971 = vmatpush1.bf16.msra.mxu0 %v3202_v28 }
  0x78   :  { %972 = vmatprep.subr.bf16.mxu0 %v3207_v29 }
  0x7b   :  { %973 = vmatpush1.bf16.msra.mxu0 %v3205_v30 }
  0x7c   :  { %974 = vmatprep.subr.bf16.mxu0 %v3210_v31 }
  0x7f   :  { %975 = vmatpush1.bf16.msra.mxu0 %v3208_v32 }
  0x82   :  { %977 = vmatmul.mubr.bf16.vlgmr.msra.gmra.mrb[8].mxu0 %v3787_v52 }
  0x83   :  { %986 = vmatprep.mubr.bf16.mxu0 %v3792_v54 }
  0x8a   :  { %987 = vmatmul.mubr.bf16.gmra.mrb[12].mxu0 %v3826_v1 }
 0x115   :  { %v285_v55 = vpop.f32.mrb[0].mxu0 }
 0x116   :  { %v286_v56 = vadd.f32 %v285_v55, %v84_v51  ;;  %v287_v57 = vpop.f32.mrb[1].mxu0 }
 0x117   :  { %v288_v58 = vadd.f32 %v287_v57, %v88_v53  ;;  %v289_v59 = vpop.f32.mrb[2].mxu0 }
 0x118   :  { %v312_v60 = vmul.f32 0.70710677, %v286_v56  ;;  %v290_v61 = vadd.f32 %v289_v59, %v84_v51  ;;  %v291_v62 = vpop.f32.mrb[3].mxu0  ;;  %v304_v23 = vmul.f32 0.5, %v286_v56  ;;  %v3267_v56 = vld [vmem:[%s4831_s3 + $0x124] ss:$8 sps:$4 sm:$0xff]  }
 0x119   :  { %v313_v63 = vmul.f32 0.70710677, %v288_v58  ;;  %v292_v0 = vadd.f32 %v291_v62, %v88_v53  ;;  %v305_v26 = vmul.f32 0.5, %v288_v58  ;;  %v3270_v62 = vld [vmem:[%s4831_s3 + $0x134] ss:$8 sps:$4 sm:$0xff]  }
 0x11a   :  { %3499 = verf.f32 %v312_v60  ;;  %v314_v2 = vmul.f32 0.70710677, %v290_v61  ;;  %v306_v24 = vmul.f32 0.5, %v290_v61  ;;  %v3265_v60 = vld [vmem:[%s4831_s3 + $0x120] ss:$8 sps:$4 sm:$0xff]  }
 0x11b   :  { %3501 = verf.f32 %v313_v63  ;;  %v315_v3 = vmul.f32 0.70710677, %v292_v0  ;;  %v307_v27 = vmul.f32 0.5, %v292_v0  ;;  %v3268_v63 = vld [vmem:[%s4831_s3 + $0x130] ss:$8 sps:$4 sm:$0xff]  }
 0x11c   :  { %3503 = verf.f32 %v314_v2  ;;  %v3273_v0 = vld [vmem:[%s4831_s3 + $0x144] ss:$8 sps:$4 sm:$0xff]   ;;  %v3271_v2 = vld [vmem:[%s4831_s3 + $0x140] ss:$8 sps:$4 sm:$0xff]  }
 0x11d   :  { %3505 = verf.f32 %v315_v3  ;;  %v295_v4 = vpop.f32.mrb[4].mxu0  ;;  %v3276_v3 = vld [vmem:[%s4831_s3 + $0x154] ss:$8 sps:$4 sm:$0xff]  }
 0x11e   :  { %v296_v5 = vadd.f32 %v295_v4, %v84_v51  ;;  %v297_v6 = vpop.f32.mrb[5].mxu0  ;;  %v3274_v4 = vld [vmem:[%s4831_s3 + $0x150] ss:$8 sps:$4 sm:$0xff]  }
 0x11f   :  { %v298_v7 = vadd.f32 %v297_v6, %v88_v53  ;;  %v299_v8 = vpop.f32.mrb[6].mxu0  ;;  %v3277_v6 = vld [vmem:[%s4831_s3 + $0x160] ss:$8 sps:$4 sm:$0xff]  }
 0x120   :  { %v316_v9 = vmul.f32 0.70710677, %v296_v5  ;;  %v300_v10 = vadd.f32 %v299_v8, %v84_v51  ;;  %v301_v11 = vpop.f32.mrb[7].mxu0  ;;  %v308_v34 = vmul.f32 0.5, %v296_v5  ;;  %v3262_v51 = vld [vmem:[%s4831_s3 + $0x110] ss:$8 sps:$4 sm:$0xff]  }
 0x121   :  { %v317_v12 = vmul.f32 0.70710677, %v298_v7  ;;  %v302_v13 = vadd.f32 %v301_v11, %v88_v53  ;;  %v309_v38 = vmul.f32 0.5, %v298_v7  ;;  %v3279_v5 = vld [vmem:[%s4831_s3 + $0x164] ss:$8 sps:$4 sm:$0xff]  }
 0x122   :  { %3507 = verf.f32 %v316_v9  ;;  %v318_v14 = vmul.f32 0.70710677, %v300_v10  ;;  %v310_v42 = vmul.f32 0.5, %v300_v10  ;;  %v3282_v7 = vld [vmem:[%s4831_s3 + $0x174] ss:$8 sps:$4 sm:$0xff]  }
 0x123   :  { %3509 = verf.f32 %v317_v12  ;;  %v319_v16 = vmul.f32 0.70710677, %v302_v13  ;;  %v311_v45 = vmul.f32 0.5, %v302_v13  ;;  %v3280_v8 = vld [vmem:[%s4831_s3 + $0x170] ss:$8 sps:$4 sm:$0xff]  }
 0x124   :  { %v3500_v17 = vpop.eup %3499  ;;  %3511 = verf.f32 %v318_v14  ;;  %v3285_v9 = vld [vmem:[%s4831_s3 + $0x184] ss:$8 sps:$4 sm:$0xff]   ;;  %v3283_v10 = vld [vmem:[%s4831_s3 + $0x180] ss:$8 sps:$4 sm:$0xff]   ;;  %v3288_v11 = vld [vmem:[%s4831_s3 + $0x194] ss:$8 sps:$4 sm:$0xff]  }
 0x125   :  { %v3502_v18 = vpop.eup %3501  ;;  %v328_v19 = vadd.f32 1.0, %v3500_v17  ;;  %3513 = verf.f32 %v319_v16  ;;  %v2766_v12 = vld [vmem:[%s4832_s2 + $0x1] ss:$4 sm:$0x3]  ;;  %v3286_v13 = vld [vmem:[%s4831_s3 + $0x190] ss:$8 sps:$4 sm:$0xff]  }
 0x126   :  { %v3504_v20 = vpop.eup %3503  ;;  %v329_v21 = vadd.f32 1.0, %v3502_v18  ;;  %v3291_v14 = vld [vmem:[%s4831_s3 + $0x1a4] ss:$8 sps:$4 sm:$0xff]   ;;  %v777_v16 = vrot.slane %v2766_v12, %v3962_v48  ;;  %v781_v17 = vrot.slane %v2766_v12, %v3967_v50  ;;  %v3289_v18 = vld [vmem:[%s4831_s3 + $0x1a0] ss:$8 sps:$4 sm:$0xff]  }
 0x127   :  { %v3506_v22 = vpop.eup %3505  ;;  %v330_v25 = vadd.f32 1.0, %v3504_v20  ;;  %v336_v29 = vmul.f32 %v328_v19, %v304_v23  ;;  %v3294_v20 = vld [vmem:[%s4831_s3 + $0x1b4] ss:$8 sps:$4 sm:$0xff]  }
 0x128   :  { %v331_v28 = vadd.f32 1.0, %v3506_v22  ;;  %v337_v31 = vmul.f32 %v329_v21, %v305_v26 }
 0x129   :  { %v338_v30 = vmul.f32 %v330_v25, %v306_v24 }
 0x12a   :  { %v339_v32 = vmul.f32 %v331_v28, %v307_v27  ;;  %v3292_v28 = vld [vmem:[%s4831_s3 + $0x1b0] ss:$8 sps:$4 sm:$0xff]  }
 0x12b   :  { %v344_v33 = vpack.c.bf16 %v338_v30, %v336_v29 }
 0x12c   :  { %v3508_v35 = vpop.eup %3507  ;;  %v345_v36 = vpack.c.bf16 %v339_v32, %v337_v31  ;;  %v3297_v31 = vld [vmem:[%s4831_s3 + $0x1c4] ss:$8 sps:$4 sm:$0xff]  }
 0x12d   :  { %v3510_v39 = vpop.eup %3509  ;;  %v332_v41 = vadd.f32 1.0, %v3508_v35 }
 0x12e   :  { %v3512_v43 = vpop.eup %3511  ;;  %584 = vmatprep.mubr.bf16.mxu1 %v345_v36  ;;  %v333_v44 = vadd.f32 1.0, %v3510_v39  ;;  %v3300_v36 = vld [vmem:[%s4831_s3 + $0x1d4] ss:$8 sps:$4 sm:$0xff]  }
 0x12f   :  { %v3514_v46 = vpop.eup %3513  ;;  %585 = vmatmul.mubr.bf16.vlgmr.msra.gmra.mrb[0].mxu1 %v344_v33  ;;  %v340_v47 = vmul.f32 %v332_v41, %v308_v34  ;;  %v334_v49 = vadd.f32 1.0, %v3512_v43  ;;  %v3295_v34 = vld [vmem:[%s4831_s3 + $0x1c0] ss:$8 sps:$4 sm:$0xff]  }
 0x130   :  { %1248 = vmatpush1.bf16.msra.mxu1 %v3259_v37  ;;  %v341_v53 = vmul.f32 %v333_v44, %v309_v38  ;;  %v335_v55 = vadd.f32 1.0, %v3514_v46  ;;  %v3298_v44 = vld [vmem:[%s4831_s3 + $0x1d0] ss:$8 sps:$4 sm:$0xff]  }
 0x131   :  { %1249 = vmatprep.subr.bf16.mxu1 %v3264_v40  ;;  %v342_v57 = vmul.f32 %v334_v49, %v310_v42 }
 0x132   :  { %v343_v58 = vmul.f32 %v335_v55, %v311_v45  ;;  %v3301_v55 = vld [vmem:[%s4831_s3 + $0x1e0] ss:$8 sps:$4 sm:$0xff]  }
 0x133   :  { %v346_v59 = vpack.c.bf16 %v342_v57, %v340_v47  ;;  %v3303_v47 = vld [vmem:[%s4831_s3 + $0x1e4] ss:$8 sps:$4 sm:$0xff]  }
 0x134   :  { %1250 = vmatpush1.bf16.msra.mxu1 %v3262_v51  ;;  %v347_v61 = vpack.c.bf16 %v343_v58, %v341_v53  ;;  %v3306_v58 = vld [vmem:[%s4831_s3 + $0x1f4] ss:$8 sps:$4 sm:$0xff]  }
 0x135   :  { %1251 = vmatprep.subr.bf16.mxu1 %v3267_v56 }
 0x136   :  { %594 = vmatprep.mubr.bf16.mxu1 %v347_v61 }
 0x137   :  { %595 = vmatmul.mubr.bf16.gmra.mrb[4].mxu1 %v346_v59 }
 0x138   :  { %1252 = vmatpush1.bf16.msra.mxu1 %v3265_v60 }
 0x139   :  { %1253 = vmatprep.subr.bf16.mxu1 %v3270_v62 }
 0x13c   :  { %1254 = vmatpush1.bf16.msra.mxu1 %v3268_v63 }
 0x13d   :  { %1255 = vmatprep.subr.bf16.mxu1 %v3273_v0 }
 0x140   :  { %1256 = vmatpush1.bf16.msra.mxu1 %v3271_v2 }
 0x141   :  { %1257 = vmatprep.subr.bf16.mxu1 %v3276_v3 }
 0x144   :  { %1258 = vmatpush1.bf16.msra.mxu1 %v3274_v4 }
 0x145   :  { %1259 = vmatprep.subr.bf16.mxu1 %v3279_v5  ;;  %v3304_v5 = vld [vmem:[%s4831_s3 + $0x1f0] ss:$8 sps:$4 sm:$0xff]  }
 0x148   :  { %1260 = vmatpush1.bf16.msra.mxu1 %v3277_v6 }
 0x149   :  { %1261 = vmatprep.subr.bf16.mxu1 %v3282_v7 }
 0x14c   :  { %1262 = vmatpush1.bf16.msra.mxu1 %v3280_v8 }
 0x14d   :  { %1263 = vmatprep.subr.bf16.mxu1 %v3285_v9 }
 0x150   :  { %1264 = vmatpush1.bf16.msra.mxu1 %v3283_v10 }
 0x151   :  { %1265 = vmatprep.subr.bf16.mxu1 %v3288_v11 }
 0x154   :  { %1266 = vmatpush1.bf16.msra.mxu1 %v3286_v13 }
 0x155   :  { %v978_v19 = vpop.f32.mrb[8].mxu0  ;;  %1267 = vmatprep.subr.bf16.mxu1 %v3291_v14 }
 0x156   :  { %v979_v21 = vadd.f32 %v978_v19, %v777_v16  ;;  %v980_v22 = vpop.f32.mrb[9].mxu0 }
 0x157   :  { %v981_v23 = vadd.f32 %v980_v22, %v781_v17  ;;  %v982_v24 = vpop.f32.mrb[10].mxu0 }
 0x158   :  { %v1005_v25 = vmul.f32 0.70710677, %v979_v21  ;;  %v983_v26 = vadd.f32 %v982_v24, %v777_v16  ;;  %v984_v27 = vpop.f32.mrb[11].mxu0  ;;  %1268 = vmatpush1.bf16.msra.mxu1 %v3289_v18  ;;  %v997_v62 = vmul.f32 0.5, %v979_v21 }
 0x159   :  { %v1006_v29 = vmul.f32 0.70710677, %v981_v23  ;;  %v985_v30 = vadd.f32 %v984_v27, %v781_v17  ;;  %1269 = vmatprep.subr.bf16.mxu1 %v3294_v20  ;;  %v998_v2 = vmul.f32 0.5, %v981_v23 }
 0x15a   :  { %3515 = verf.f32 %v1005_v25  ;;  %v1007_v32 = vmul.f32 0.70710677, %v983_v26  ;;  %v999_v63 = vmul.f32 0.5, %v983_v26 }
 0x15b   :  { %3517 = verf.f32 %v1006_v29  ;;  %v1008_v33 = vmul.f32 0.70710677, %v985_v30  ;;  %v1000_v3 = vmul.f32 0.5, %v985_v30 }
 0x15c   :  { %3519 = verf.f32 %v1007_v32  ;;  %1270 = vmatpush1.bf16.msra.mxu1 %v3292_v28  ;;  %v3309_v32 = vld [vmem:[%s4829_s1 + $0x204] ss:$8 sps:$4 sm:$0xff]  }
 0x15d   :  { %3521 = verf.f32 %v1008_v33  ;;  %v988_v35 = vpop.f32.mrb[12].mxu0  ;;  %1271 = vmatprep.subr.bf16.mxu1 %v3297_v31  ;;  %v3307_v31 = vld [vmem:[%s4829_s1 + $0x200] ss:$8 sps:$4 sm:$0xff]   ;;  %v3312_v33 = vld [vmem:[%s4829_s1 + $0x214] ss:$8 sps:$4 sm:$0xff]  }
 0x15e   :  { %v989_v37 = vadd.f32 %v988_v35, %v777_v16  ;;  %v990_v38 = vpop.f32.mrb[13].mxu0  ;;  %v3313_v35 = vld [vmem:[%s4829_s1 + $0x220] ss:$8 sps:$4 sm:$0xff]  }
 0x15f   :  { %v991_v39 = vadd.f32 %v990_v38, %v781_v17  ;;  %v992_v40 = vpop.f32.mrb[14].mxu0  ;;  %v3321_v38 = vld [vmem:[%s4829_s1 + $0x244] ss:$8 sps:$4 sm:$0xff]  }
 0x160   :  { %v1009_v41 = vmul.f32 0.70710677, %v989_v37  ;;  %v993_v42 = vadd.f32 %v992_v40, %v777_v16  ;;  %v994_v43 = vpop.f32.mrb[15].mxu0  ;;  %1272 = vmatpush1.bf16.msra.mxu1 %v3295_v34  ;;  %v1001_v11 = vmul.f32 0.5, %v989_v37  ;;  %v3310_v34 = vld [vmem:[%s4829_s1 + $0x210] ss:$8 sps:$4 sm:$0xff]  }
 0x161   :  { %v1010_v45 = vmul.f32 0.70710677, %v991_v39  ;;  %v995_v46 = vadd.f32 %v994_v43, %v781_v17  ;;  %1273 = vmatprep.subr.bf16.mxu1 %v3300_v36  ;;  %v1002_v13 = vmul.f32 0.5, %v991_v39  ;;  %v3318_v36 = vld [vmem:[%s4829_s1 + $0x234] ss:$8 sps:$4 sm:$0xff]  }
 0x162   :  { %3523 = verf.f32 %v1009_v41  ;;  %v1011_v49 = vmul.f32 0.70710677, %v993_v42  ;;  %v1003_v18 = vmul.f32 0.5, %v993_v42  ;;  %v3316_v37 = vld [vmem:[%s4829_s1 + $0x230] ss:$8 sps:$4 sm:$0xff]  }
 0x163   :  { %3525 = verf.f32 %v1010_v45  ;;  %v1012_v51 = vmul.f32 0.70710677, %v995_v46  ;;  %v1004_v21 = vmul.f32 0.5, %v995_v46  ;;  %v3319_v39 = vld [vmem:[%s4829_s1 + $0x240] ss:$8 sps:$4 sm:$0xff]  }
 0x164   :  { %v3516_v53 = vpop.eup %3515  ;;  %3527 = verf.f32 %v1011_v49  ;;  %1274 = vmatpush1.bf16.msra.mxu1 %v3298_v44  ;;  %v3324_v40 = vld [vmem:[%s4829_s1 + $0x254] ss:$8 sps:$4 sm:$0xff]   ;;  %v3322_v41 = vld [vmem:[%s4829_s1 + $0x250] ss:$8 sps:$4 sm:$0xff]   ;;  %v3327_v42 = vld [vmem:[%s4829_s1 + $0x264] ss:$8 sps:$4 sm:$0xff]  }
 0x165   :  { %v3518_v56 = vpop.eup %3517  ;;  %v1021_v57 = vadd.f32 1.0, %v3516_v53  ;;  %3529 = verf.f32 %v1012_v51  ;;  %1275 = vmatprep.subr.bf16.mxu1 %v3303_v47  ;;  %v3325_v43 = vld [vmem:[%s4829_s1 + $0x260] ss:$8 sps:$4 sm:$0xff]   ;;  %v3330_v44 = vld [vmem:[%s4829_s1 + $0x274] ss:$8 sps:$4 sm:$0xff]  }
 0x166   :  { %v3520_v59 = vpop.eup %3519  ;;  %v1022_v60 = vadd.f32 1.0, %v3518_v56  ;;  %v3328_v45 = vld [vmem:[%s4829_s1 + $0x270] ss:$8 sps:$4 sm:$0xff]   ;;  %v3333_v46 = vld [vmem:[%s4829_s1 + $0x284] ss:$8 sps:$4 sm:$0xff]  }
 0x167   :  { %v3522_v61 = vpop.eup %3521  ;;  %v1023_v0 = vadd.f32 1.0, %v3520_v59  ;;  %v1029_v6 = vmul.f32 %v1021_v57, %v997_v62  ;;  %v3331_v47 = vld [vmem:[%s4829_s1 + $0x280] ss:$8 sps:$4 sm:$0xff]   ;;  %v3336_v49 = vld [vmem:[%s4829_s1 + $0x294] ss:$8 sps:$4 sm:$0xff]  }
 0x168   :  { %v1024_v4 = vadd.f32 1.0, %v3522_v61  ;;  %1276 = vmatpush1.bf16.msra.mxu1 %v3301_v55  ;;  %v1030_v8 = vmul.f32 %v1022_v60, %v998_v2  ;;  %v3334_v51 = vld [vmem:[%s4829_s1 + $0x290] ss:$8 sps:$4 sm:$0xff]   ;;  %v3339_v53 = vld [vmem:[%s4829_s1 + $0x2a4] ss:$8 sps:$4 sm:$0xff]  }
 0x169   :  { %v1031_v7 = vmul.f32 %v1023_v0, %v999_v63  ;;  %1277 = vmatprep.subr.bf16.mxu1 %v3306_v58  ;;  %v3337_v55 = vld [vmem:[%s4829_s1 + $0x2a0] ss:$8 sps:$4 sm:$0xff]   ;;  %v3342_v56 = vld [vmem:[%s4829_s1 + $0x2b4] ss:$8 sps:$4 sm:$0xff]   ;;  %v3340_v57 = vld [vmem:[%s4829_s1 + $0x2b0] ss:$8 sps:$4 sm:$0xff]  }
 0x16a   :  { %v1032_v9 = vmul.f32 %v1024_v4, %v1000_v3  ;;  %v3345_v58 = vld [vmem:[%s4829_s1 + $0x2c4] ss:$8 sps:$4 sm:$0xff]   ;;  %v3343_v61 = vld [vmem:[%s4829_s1 + $0x2c0] ss:$8 sps:$4 sm:$0xff]   ;;  %v3348_v63 = vld [vmem:[%s4829_s1 + $0x2d4] ss:$8 sps:$4 sm:$0xff]  }
 0x16b   :  { %v1037_v10 = vpack.c.bf16 %v1031_v7, %v1029_v6  ;;  %v3346_v2 = vld [vmem:[%s4829_s1 + $0x2d0] ss:$8 sps:$4 sm:$0xff]   ;;  %v3351_v3 = vld [vmem:[%s4829_s1 + $0x2e4] ss:$8 sps:$4 sm:$0xff]   ;;  %v3349_v6 = vld [vmem:[%s4829_s1 + $0x2e0] ss:$8 sps:$4 sm:$0xff]  }
 0x16c   :  { %v3524_v12 = vpop.eup %3523  ;;  %1278 = vmatpush1.bf16.msra.mxu1 %v3304_v5  ;;  %v1038_v14 = vpack.c.bf16 %v1032_v9, %v1030_v8  ;;  %v3354_v8 = vld [vmem:[%s4829_s1 + $0x2f4] ss:$8 sps:$4 sm:$0xff]  }
 0x16d   :  { %v3526_v16 = vpop.eup %3525  ;;  %v1025_v17 = vadd.f32 1.0, %v3524_v12  ;;  %1901 = vmatprep.subr.bf16.mxu1 %v3309_v32  ;;  %v3355_v32 = vld [vmem:[%s4834_s7] ss:$8 sps:$4 sm:$0xff]  }
 0x16e   :  { %v3528_v19 = vpop.eup %3527  ;;  %v1026_v20 = vadd.f32 1.0, %v3526_v16  ;;  %1279 = vmatprep.mubr.bf16.mxu1 %v1038_v14 }
 0x16f   :  { %v3530_v22 = vpop.eup %3529  ;;  %v1033_v23 = vmul.f32 %v1025_v17, %v1001_v11  ;;  %v1027_v24 = vadd.f32 1.0, %v3528_v19  ;;  %1280 = vmatmul.mubr.bf16.vlgmr.msra.gmra.mrb[8].mxu1 %v1037_v10  ;;  %v3352_v10 = vld [vmem:[%s4829_s1 + $0x2f0] ss:$8 sps:$4 sm:$0xff]   ;;  %v2831_v11 = vld [vmem:[%s4833_s4 + $0x1] ss:$4 sm:$0x3] }
 0x170   :  { %v1034_v25 = vmul.f32 %v1026_v20, %v1002_v13  ;;  %v1028_v26 = vadd.f32 1.0, %v3530_v22  ;;  %1902 = vmatpush1.bf16.msra.mxu1 %v3307_v31  ;;  %v1080_v12 = vrot.slane %v2831_v11, %v3962_v48  ;;  %v1084_v13 = vrot.slane %v2831_v11, %v3967_v50 }
 0x171   :  { %v1035_v27 = vmul.f32 %v1027_v24, %v1003_v18  ;;  %1903 = vmatprep.subr.bf16.mxu1 %v3312_v33  ;;  %v3357_v33 = vld [vmem:[%s4834_s7 + $0x4] ss:$8 sps:$4 sm:$0xff]  }
 0x172   :  { %v1036_v28 = vmul.f32 %v1028_v26, %v1004_v21  ;;  %1614 = vmatprep.subr.bf16.mxu0 %v3357_v33  ;;  %v3394_v33 = vld [vmem:[%s4834_s7 + $0xd0] ss:$8 sps:$4 sm:$0xff]  }
 0x173   :  { %v1039_v29 = vpack.c.bf16 %v1035_v27, %v1033_v23  ;;  %1615 = vmatpush1.bf16.msra.mxu0 %v3355_v32  ;;  %v3396_v32 = vld [vmem:[%s4834_s7 + $0xd4] ss:$8 sps:$4 sm:$0xff]  }
 0x174   :  { %v1040_v30 = vpack.c.bf16 %v1036_v28, %v1034_v25  ;;  %1904 = vmatpush1.bf16.msra.mxu1 %v3310_v34  ;;  %v3360_v34 = vld [vmem:[%s4834_s7 + $0x14] ss:$8 sps:$4 sm:$0xff]  }
 0x175   :  { %1616 = vmatprep.subr.bf16.mxu0 %v3360_v34  ;;  %v3399_v34 = vld [vmem:[%s4834_s7 + $0xe4] ss:$8 sps:$4 sm:$0xff]  }
 0x176   :  { %1289 = vmatprep.mubr.bf16.mxu1 %v1040_v30 }
 0x177   :  { %1290 = vmatmul.mubr.bf16.gmra.mrb[12].mxu1 %v1039_v29 }
 0x178   :  { %1933 = vmatprep.mubr.bf16.mxu1 %v3676_v15  ;;  %v3315_v15 = vld [vmem:[%s4829_s1 + $0x224] ss:$8 sps:$4 sm:$0xff]  }
 0x179   :  { %1905 = vmatprep.subr.bf16.mxu1 %v3315_v15  ;;  %v3358_v15 = vld [vmem:[%s4834_s7 + $0x10] ss:$8 sps:$4 sm:$0xff]  }
 0x17a   :  { %1906 = vmatpush1.bf16.msra.mxu1 %v3313_v35  ;;  %v3363_v35 = vld [vmem:[%s4834_s7 + $0x24] ss:$8 sps:$4 sm:$0xff]   ;;  %1617 = vmatpush1.bf16.msra.mxu0 %v3358_v15  ;;  %v3397_v15 = vld [vmem:[%s4834_s7 + $0xe0] ss:$8 sps:$4 sm:$0xff]  }
 0x17b   :  { %1907 = vmatprep.subr.bf16.mxu1 %v3318_v36  ;;  %v3361_v36 = vld [vmem:[%s4834_s7 + $0x20] ss:$8 sps:$4 sm:$0xff]   ;;  %1618 = vmatprep.subr.bf16.mxu0 %v3363_v35  ;;  %v3400_v35 = vld [vmem:[%s4834_s7 + $0xf0] ss:$8 sps:$4 sm:$0xff]  }
 0x17e   :  { %1908 = vmatpush1.bf16.msra.mxu1 %v3316_v37  ;;  %v3366_v37 = vld [vmem:[%s4834_s7 + $0x34] ss:$8 sps:$4 sm:$0xff]   ;;  %1619 = vmatpush1.bf16.msra.mxu0 %v3361_v36 }
 0x17f   :  { %1909 = vmatprep.subr.bf16.mxu1 %v3321_v38  ;;  %v3364_v38 = vld [vmem:[%s4834_s7 + $0x30] ss:$8 sps:$4 sm:$0xff]   ;;  %1620 = vmatprep.subr.bf16.mxu0 %v3366_v37  ;;  %v3402_v36 = vld [vmem:[%s4834_s7 + $0xf4] ss:$8 sps:$4 sm:$0xff]   ;;  %v3405_v37 = vld [vmem:[%s4831_s3 + $0x204] ss:$8 sps:$4 sm:$0xff]  }
 0x182   :  { %1910 = vmatpush1.bf16.msra.mxu1 %v3319_v39  ;;  %v3369_v39 = vld [vmem:[%s4834_s7 + $0x44] ss:$8 sps:$4 sm:$0xff]   ;;  %1621 = vmatpush1.bf16.msra.mxu0 %v3364_v38 }
 0x183   :  { %1911 = vmatprep.subr.bf16.mxu1 %v3324_v40  ;;  %v3367_v40 = vld [vmem:[%s4834_s7 + $0x40] ss:$8 sps:$4 sm:$0xff]   ;;  %1622 = vmatprep.subr.bf16.mxu0 %v3369_v39 }
 0x184   :  { %v2934_v38 = vld [vmem:[%s4832_s2 + $0x2] ss:$4 sm:$0x3] }
 0x186   :  { %1912 = vmatpush1.bf16.msra.mxu1 %v3322_v41  ;;  %v3372_v41 = vld [vmem:[%s4834_s7 + $0x54] ss:$8 sps:$4 sm:$0xff]   ;;  %1623 = vmatpush1.bf16.msra.mxu0 %v3367_v40  ;;  %v1734_v40 = vrot.slane %v2934_v38, %v3962_v48 }
 0x187   :  { %1913 = vmatprep.subr.bf16.mxu1 %v3327_v42  ;;  %v3370_v42 = vld [vmem:[%s4834_s7 + $0x50] ss:$8 sps:$4 sm:$0xff]   ;;  %1624 = vmatprep.subr.bf16.mxu0 %v3372_v41  ;;  %v1738_v41 = vrot.slane %v2934_v38, %v3967_v50 }
 0x18a   :  { %1914 = vmatpush1.bf16.msra.mxu1 %v3325_v43  ;;  %v3375_v43 = vld [vmem:[%s4834_s7 + $0x64] ss:$8 sps:$4 sm:$0xff]   ;;  %1625 = vmatpush1.bf16.msra.mxu0 %v3370_v42 }
 0x18b   :  { %1915 = vmatprep.subr.bf16.mxu1 %v3330_v44  ;;  %v3373_v44 = vld [vmem:[%s4834_s7 + $0x60] ss:$8 sps:$4 sm:$0xff]   ;;  %1626 = vmatprep.subr.bf16.mxu0 %v3375_v43 }
 0x18e   :  { %1916 = vmatpush1.bf16.msra.mxu1 %v3328_v45  ;;  %v3378_v45 = vld [vmem:[%s4834_s7 + $0x74] ss:$8 sps:$4 sm:$0xff]   ;;  %1627 = vmatpush1.bf16.msra.mxu0 %v3373_v44 }
 0x18f   :  { %1917 = vmatprep.subr.bf16.mxu1 %v3333_v46  ;;  %v3376_v46 = vld [vmem:[%s4834_s7 + $0x70] ss:$8 sps:$4 sm:$0xff]   ;;  %1628 = vmatprep.subr.bf16.mxu0 %v3378_v45 }
 0x192   :  { %1918 = vmatpush1.bf16.msra.mxu1 %v3331_v47  ;;  %v3381_v47 = vld [vmem:[%s4834_s7 + $0x84] ss:$8 sps:$4 sm:$0xff]   ;;  %1629 = vmatpush1.bf16.msra.mxu0 %v3376_v46 }
 0x193   :  { %1919 = vmatprep.subr.bf16.mxu1 %v3336_v49  ;;  %v3379_v49 = vld [vmem:[%s4834_s7 + $0x80] ss:$8 sps:$4 sm:$0xff]   ;;  %1630 = vmatprep.subr.bf16.mxu0 %v3381_v47 }
 0x196   :  { %1920 = vmatpush1.bf16.msra.mxu1 %v3334_v51  ;;  %v3384_v51 = vld [vmem:[%s4834_s7 + $0x94] ss:$8 sps:$4 sm:$0xff]   ;;  %1631 = vmatpush1.bf16.msra.mxu0 %v3379_v49 }
 0x197   :  { %1921 = vmatprep.subr.bf16.mxu1 %v3339_v53  ;;  %v3382_v53 = vld [vmem:[%s4834_s7 + $0x90] ss:$8 sps:$4 sm:$0xff]   ;;  %1632 = vmatprep.subr.bf16.mxu0 %v3384_v51 }
 0x19a   :  { %1922 = vmatpush1.bf16.msra.mxu1 %v3337_v55  ;;  %1633 = vmatpush1.bf16.msra.mxu0 %v3382_v53 }
 0x19b   :  { %1923 = vmatprep.subr.bf16.mxu1 %v3342_v56 }
 0x19e   :  { %1924 = vmatpush1.bf16.msra.mxu1 %v3340_v57 }
 0x19f   :  { %1925 = vmatprep.subr.bf16.mxu1 %v3345_v58 }
 0x1a2   :  { %1926 = vmatpush1.bf16.msra.mxu1 %v3343_v61 }
 0x1a3   :  { %1927 = vmatprep.subr.bf16.mxu1 %v3348_v63 }
 0x1a6   :  { %1928 = vmatpush1.bf16.msra.mxu1 %v3346_v2 }
 0x1a7   :  { %1929 = vmatprep.subr.bf16.mxu1 %v3351_v3 }
 0x1aa   :  { %1930 = vmatpush1.bf16.msra.mxu1 %v3349_v6 }
 0x1ab   :  { %1931 = vmatprep.subr.bf16.mxu1 %v3354_v8 }
 0x1ae   :  { %1932 = vmatpush1.bf16.msra.mxu1 %v3352_v10 }
 0x1b1   :  { %1934 = vmatmul.mubr.bf16.vlgmr.msra.gmra.mrb[16].mxu1 %v3787_v52 }
 0x1b2   :  { %1943 = vmatprep.mubr.bf16.mxu1 %v3792_v54 }
 0x1b9   :  { %1944 = vmatmul.mubr.bf16.gmra.mrb[20].mxu1 %v3826_v1 }
 0x202   :  { %v4145_v59 = vpop.f32.mrb[0].mxu1 }
 0x203   :  { %v4147_v60 = vpop.f32.mrb[1].mxu1 }
 0x204   :  { %v4152_v62 = vpop.f32.mrb[2].mxu1 }
 0x205   :  { %v4157_v0 = vpop.f32.mrb[3].mxu1 }
 0x20a   :  { %v4165_v4 = vpop.f32.mrb[4].mxu1 }
 0x20b   :  { %v4167_v5 = vpop.f32.mrb[5].mxu1 }
 0x20c   :  { %v4172_v7 = vpop.f32.mrb[6].mxu1 }
 0x20d   :  { %v4177_v9 = vpop.f32.mrb[7].mxu1 }
 0x242   :  { %v1281_v14 = vpop.f32.mrb[8].mxu1 }
 0x243   :  { %v4190_v16 = vadd.f32 %v1281_v14, %v1080_v12  ;;  %v1283_v17 = vpop.f32.mrb[9].mxu1 }
 0x244   :  { %v4192_v18 = vadd.f32 %v1283_v17, %v1084_v13  ;;  %v1285_v19 = vpop.f32.mrb[10].mxu1 }
 0x245   :  { %v1287_v52 = vpop.f32.mrb[11].mxu1  ;;  %v4194_v20 = vadd.f32 %v1285_v19, %v1080_v12 }
 0x246   :  { %v4196_v54 = vadd.f32 %v1287_v52, %v1084_v13  ;;  %v1300_v1 = vadd.f32 %v4192_v18, %v4190_v16 }
 0x248   :  { %1301 = vadd.xlane.f32.xlu0 %v1300_v1  ;;  %v1303_v22 = vadd.f32 %v4196_v54, %v4194_v20 }
 0x24a   :  { %v1291_v21 = vpop.f32.mrb[12].mxu1 }
 0x24b   :  { %v4202_v23 = vadd.f32 %v1291_v21, %v1080_v12  ;;  %v1293_v24 = vpop.f32.mrb[13].mxu1 }
 0x24c   :  { %v4204_v25 = vadd.f32 %v1293_v24, %v1084_v13  ;;  %1304 = vadd.xlane.f32.xlu0 %v1303_v22  ;;  %v1295_v26 = vpop.f32.mrb[14].mxu1 }
 0x24d   :  { %v4206_v27 = vadd.f32 %v1295_v26, %v1080_v12  ;;  %v1297_v28 = vpop.f32.mrb[15].mxu1  ;;  %v3387_v26 = vld [vmem:[%s4834_s7 + $0xa4] ss:$8 sps:$4 sm:$0xff]  }
 0x24e   :  { %v4208_v29 = vadd.f32 %v1297_v28, %v1084_v13  ;;  %v1306_v30 = vadd.f32 %v4204_v25, %v4202_v23  ;;  %1634 = vmatprep.subr.bf16.mxu0 %v3387_v26  ;;  %v3390_v28 = vld [vmem:[%s4834_s7 + $0xb4] ss:$8 sps:$4 sm:$0xff]  }
 0x250   :  { %1307 = vadd.xlane.f32.xlu1 %v1306_v30  ;;  %v1309_v31 = vadd.f32 %v4208_v29, %v4206_v27  ;;  %v3393_v30 = vld [vmem:[%s4834_s7 + $0xc4] ss:$8 sps:$4 sm:$0xff]  }
 0x254   :  { %1310 = vadd.xlane.f32.xlu1 %v1309_v31  ;;  %v3391_v31 = vld [vmem:[%s4834_s7 + $0xc0] ss:$8 sps:$4 sm:$0xff]  }
 0x284   :  { %v1935_v39 = vpop.f32.mrb[16].mxu1 }
 0x285   :  { %v1937_v42 = vpop.f32.mrb[17].mxu1  ;;  %v1936_v44 = vadd.f32 %v1935_v39, %v1734_v40 }
 0x286   :  { %v1939_v43 = vpop.f32.mrb[18].mxu1  ;;  %v1938_v45 = vadd.f32 %v1937_v42, %v1738_v41 }
 0x287   :  { %v1940_v46 = vadd.f32 %v1939_v43, %v1734_v40  ;;  %v1941_v47 = vpop.f32.mrb[19].mxu1  ;;  %v1962_v51 = vmul.f32 0.70710677, %v1936_v44 }
 0x288   :  { %v1942_v49 = vadd.f32 %v1941_v47, %v1738_v41  ;;  %v1963_v53 = vmul.f32 0.70710677, %v1938_v45 }
 0x289   :  { %3531 = verf.f32 %v1962_v51 }
 0x28a   :  { %3533 = verf.f32 %v1963_v53 }
 0x2d5   :  { %v1302_v55 = vpop.xlane.xlu0 %1301 }
 0x2d6   :  { %v1312_v56 = vmul.f32 0.00390625, %v1302_v55  ;;  %v1964_v55 = vmul.f32 0.70710677, %v1940_v46 }
 0x2d8   :  { %v4275_v57 = vsub.f32 %v4190_v16, %v1312_v56  ;;  %v4278_v58 = vsub.f32 %v4192_v18, %v1312_v56  ;;  %v1965_v56 = vmul.f32 0.70710677, %v1942_v49  ;;  %3535 = verf.f32 %v1964_v55 }
 0x2d9   :  { %v1305_v61 = vpop.xlane.xlu0 %1304 }
 0x2da   :  { %v1313_v63 = vmul.f32 0.00390625, %v1305_v61  ;;  %v1324_v2 = vmul.f32 %v4275_v57, %v4275_v57  ;;  %v1325_v3 = vmul.f32 %v4278_v58, %v4278_v58  ;;  %v1945_v61 = vpop.f32.mrb[20].mxu1  ;;  %3537 = verf.f32 %v1965_v56 }
 0x2dc   :  { %v4285_v6 = vsub.f32 %v4194_v20, %v1313_v63  ;;  %v4288_v8 = vsub.f32 %v4196_v54, %v1313_v63  ;;  %v1332_v10 = vadd.f32 %v1325_v3, %v1324_v2  ;;  %v1946_v63 = vadd.f32 %v1945_v61, %v1734_v40  ;;  %v1947_v2 = vpop.f32.mrb[21].mxu1 }
 0x2dd   :  { %v1308_v11 = vpop.xlane.xlu1 %1307  ;;  %v1948_v3 = vadd.f32 %v1947_v2, %v1738_v41 }
 0x2de   :  { %v1314_v12 = vmul.f32 0.00390625, %v1308_v11  ;;  %1333 = vadd.xlane.f32.xlu0 %v1332_v10  ;;  %v1326_v13 = vmul.f32 %v4285_v6, %v4285_v6  ;;  %v1327_v14 = vmul.f32 %v4288_v8, %v4288_v8  ;;  %v1949_v10 = vpop.f32.mrb[22].mxu1  ;;  %v1966_v11 = vmul.f32 0.70710677, %v1946_v63 }
 0x2e0   :  { %v4295_v16 = vsub.f32 %v4202_v23, %v1314_v12  ;;  %v4298_v17 = vsub.f32 %v4204_v25, %v1314_v12  ;;  %v1335_v18 = vadd.f32 %v1327_v14, %v1326_v13  ;;  %v1950_v12 = vadd.f32 %v1949_v10, %v1734_v40  ;;  %v1951_v13 = vpop.f32.mrb[23].mxu1 }
 0x2e1   :  { %v1311_v19 = vpop.xlane.xlu1 %1310  ;;  %v1967_v14 = vmul.f32 0.70710677, %v1948_v3  ;;  %3539 = verf.f32 %v1966_v11  ;;  %v1959_v40 = vmul.f32 0.5, %v1948_v3 }
 0x2e2   :  { %v1315_v52 = vmul.f32 0.00390625, %v1311_v19  ;;  %1336 = vadd.xlane.f32.xlu1 %v1335_v18  ;;  %v1328_v20 = vmul.f32 %v4295_v16, %v4295_v16  ;;  %v1329_v54 = vmul.f32 %v4298_v17, %v4298_v17  ;;  %v1952_v18 = vadd.f32 %v1951_v13, %v1738_v41 }
 0x2e3   :  { %v1968_v19 = vmul.f32 0.70710677, %v1950_v12  ;;  %3541 = verf.f32 %v1967_v14  ;;  %v1960_v41 = vmul.f32 0.5, %v1950_v12 }
 0x2e4   :  { %v4305_v1 = vsub.f32 %v4206_v27, %v1315_v52  ;;  %v4308_v21 = vsub.f32 %v4208_v29, %v1315_v52  ;;  %v1338_v22 = vadd.f32 %v1329_v54, %v1328_v20  ;;  %v3385_v27 = vld [vmem:[%s4834_s7 + $0xa0] ss:$8 sps:$4 sm:$0xff]   ;;  %v3388_v29 = vld [vmem:[%s4834_s7 + $0xb0] ss:$8 sps:$4 sm:$0xff]   ;;  %v1969_v52 = vmul.f32 0.70710677, %v1952_v18  ;;  %v3532_v54 = vpop.eup %3531 }
 0x2e5   :  { %1635 = vmatpush1.bf16.msra.mxu0 %v3385_v27  ;;  %3543 = verf.f32 %v1968_v19  ;;  %v1954_v20 = vmul.f32 0.5, %v1936_v44  ;;  %v1961_v44 = vmul.f32 0.5, %v1952_v18 }
 0x2e6   :  { %1339 = vadd.xlane.f32.xlu0 %v1338_v22  ;;  %v1330_v23 = vmul.f32 %v4305_v1, %v4305_v1  ;;  %v1331_v24 = vmul.f32 %v4308_v21, %v4308_v21  ;;  %1636 = vmatprep.subr.bf16.mxu0 %v3390_v28  ;;  %3545 = verf.f32 %v1969_v52  ;;  %v1955_v22 = vmul.f32 0.5, %v1938_v45  ;;  %v2864_v52 = vld [vmem:[%s4835_s5 + $0x1] ss:$4 sm:$0x3] }
 0x2e7   :  { %v1957_v28 = vmul.f32 0.5, %v1942_v49 }
 0x2e8   :  { %v1341_v25 = vadd.f32 %v1331_v24, %v1330_v23  ;;  %v3534_v23 = vpop.eup %3533  ;;  %v1978_v24 = vadd.f32 1.0, %v3532_v54 }
 0x2e9   :  { %1637 = vmatpush1.bf16.msra.mxu0 %v3388_v29  ;;  %v3536_v26 = vpop.eup %3535  ;;  %v1979_v27 = vadd.f32 1.0, %v3534_v23  ;;  %v1370_v23 = vrot.slane %v2864_v52, %v3962_v48 }
 0x2ea   :  { %1342 = vadd.xlane.f32.xlu1 %v1341_v25  ;;  %1638 = vmatprep.subr.bf16.mxu0 %v3393_v30  ;;  %v1956_v25 = vmul.f32 0.5, %v1940_v46  ;;  %v3538_v29 = vpop.eup %3537  ;;  %v4358_v30 = vmul.f32 %v1978_v24, %v1954_v20 }
 0x2ed   :  { %1639 = vmatpush1.bf16.msra.mxu0 %v3391_v31  ;;  %v1980_v31 = vadd.f32 1.0, %v3536_v26 }
 0x2ee   :  { %1640 = vmatprep.subr.bf16.mxu0 %v3396_v32  ;;  %v4360_v32 = vmul.f32 %v1979_v27, %v1955_v22 }
 0x2f1   :  { %1641 = vmatpush1.bf16.msra.mxu0 %v3394_v33  ;;  %v1981_v33 = vadd.f32 1.0, %v3538_v29 }
 0x2f2   :  { %1642 = vmatprep.subr.bf16.mxu0 %v3399_v34  ;;  %v4362_v34 = vmul.f32 %v1980_v31, %v1956_v25  ;;  %v1374_v25 = vrot.slane %v2864_v52, %v3967_v50 }
 0x2f4   :  { %v1994_v38 = vpack.c.bf16 %v4362_v34, %v4358_v30 }
 0x2f5   :  { %1643 = vmatpush1.bf16.msra.mxu0 %v3397_v15  ;;  %v3540_v15 = vpop.eup %3539 }
 0x2f6   :  { %1644 = vmatprep.subr.bf16.mxu0 %v3402_v36  ;;  %v1958_v36 = vmul.f32 0.5, %v1946_v63  ;;  %v1982_v39 = vadd.f32 1.0, %v3540_v15 }
 0x2f8   :  { %v4370_v51 = vmul.f32 %v1982_v39, %v1958_v36 }
 0x2f9   :  { %1645 = vmatpush1.bf16.msra.mxu0 %v3400_v35  ;;  %v4364_v35 = vmul.f32 %v1981_v33, %v1957_v28  ;;  %v2865_v28 = vld [vmem:[%s4836_s6 + $0x1] ss:$4 sm:$0x3] }
 0x2fa   :  { %2204 = vmatprep.subr.bf16.mxu0 %v3405_v37  ;;  %v3542_v37 = vpop.eup %3541  ;;  %v1391_v15 = vrot.slane %v2865_v28, %v3962_v48  ;;  %v1395_v36 = vrot.slane %v2865_v28, %v3967_v50  ;;  %v3426_v28 = vld [vmem:[%s4831_s3 + $0x274] ss:$8 sps:$4 sm:$0xff]  }
 0x2fb   :  { %v3544_v42 = vpop.eup %3543  ;;  %v1983_v43 = vadd.f32 1.0, %v3542_v37  ;;  %v1995_v45 = vpack.c.bf16 %v4364_v35, %v4360_v32  ;;  %v3418_v32 = vld [vmem:[%s4831_s3 + $0x250] ss:$8 sps:$4 sm:$0xff]   ;;  %v3423_v35 = vld [vmem:[%s4831_s3 + $0x264] ss:$8 sps:$4 sm:$0xff]  }
 0x2fc   :  { %v3546_v46 = vpop.eup %3545  ;;  %v1984_v47 = vadd.f32 1.0, %v3544_v42 }
 0x2fd   :  { %v1985_v49 = vadd.f32 1.0, %v3546_v46  ;;  %v4372_v53 = vmul.f32 %v1983_v43, %v1959_v40 }
 0x2fe   :  { %v4374_v55 = vmul.f32 %v1984_v47, %v1960_v41 }
 0x2ff   :  { %v4376_v56 = vmul.f32 %v1985_v49, %v1961_v44 }
 0x300   :  { %v1996_v63 = vpack.c.bf16 %v4374_v55, %v4370_v51 }
 0x301   :  { %v1997_v61 = vpack.c.bf16 %v4376_v56, %v4372_v53 }
 0x36b   :  { %v1334_v2 = vpop.xlane.xlu0 %1333 }
 0x36c   :  { %v1344_v3 = vmul.f32 0.00390625, %v1334_v2  ;;  %v3403_v2 = vld [vmem:[%s4831_s3 + $0x200] ss:$8 sps:$4 sm:$0xff]  }
 0x36e   :  { %v1348_v10 = vadd.f32 1e-06, %v1344_v3 }
 0x36f   :  { %v1337_v11 = vpop.xlane.xlu1 %1336 }
 0x370   :  { %3547 = vrsqrt.f32 %v1348_v10  ;;  %v1345_v12 = vmul.f32 0.00390625, %v1337_v11 }
 0x372   :  { %v1349_v13 = vadd.f32 1e-06, %v1345_v12 }
 0x373   :  { %v1340_v14 = vpop.xlane.xlu0 %1339 }
 0x374   :  { %3549 = vrsqrt.f32 %v1349_v13  ;;  %v1346_v18 = vmul.f32 0.00390625, %v1340_v14 }
 0x376   :  { %v1350_v19 = vadd.f32 1e-06, %v1346_v18  ;;  %v3411_v18 = vld [vmem:[%s4831_s3 + $0x224] ss:$8 sps:$4 sm:$0xff]  }
 0x377   :  { %v1343_v20 = vpop.xlane.xlu1 %1342 }
 0x378   :  { %3551 = vrsqrt.f32 %v1350_v19  ;;  %v1347_v54 = vmul.f32 0.00390625, %v1343_v20 }
 0x37a   :  { %v3548_v22 = vpop.eup %3547  ;;  %v1351_v24 = vadd.f32 1e-06, %v1347_v54  ;;  %v3409_v54 = vld [vmem:[%s4831_s3 + $0x220] ss:$8 sps:$4 sm:$0xff]  }
 0x37b   :  { %v1356_v26 = vmul.f32 %v3548_v22, %v4275_v57  ;;  %v1357_v27 = vmul.f32 %v3548_v22, %v4278_v58 }
 0x37c   :  { %3553 = vrsqrt.f32 %v1351_v24  ;;  %v3412_v24 = vld [vmem:[%s4831_s3 + $0x230] ss:$8 sps:$4 sm:$0xff]  }
 0x37d   :  { %v1377_v31 = vmul.f32 %v1370_v23, %v1356_v26  ;;  %v1378_v33 = vmul.f32 %v1374_v25, %v1357_v27  ;;  %v3415_v26 = vld [vmem:[%s4831_s3 + $0x240] ss:$8 sps:$4 sm:$0xff]   ;;  %v3420_v27 = vld [vmem:[%s4831_s3 + $0x254] ss:$8 sps:$4 sm:$0xff]  }
 0x37e   :  { %v3550_v29 = vpop.eup %3549 }
 0x37f   :  { %v1358_v37 = vmul.f32 %v3550_v29, %v4285_v6  ;;  %v1359_v39 = vmul.f32 %v3550_v29, %v4288_v8  ;;  %v1399_v58 = vadd.f32 %v1395_v36, %v1378_v33  ;;  %v1398_v42 = vadd.f32 %v1391_v15, %v1377_v31  ;;  %v3408_v8 = vld [vmem:[%s4831_s3 + $0x214] ss:$8 sps:$4 sm:$0xff]   ;;  %v3424_v29 = vld [vmem:[%s4831_s3 + $0x270] ss:$8 sps:$4 sm:$0xff]   ;;  %v3429_v31 = vld [vmem:[%s4831_s3 + $0x284] ss:$8 sps:$4 sm:$0xff]  }
 0x380   :  { %v3427_v33 = vld [vmem:[%s4831_s3 + $0x280] ss:$8 sps:$4 sm:$0xff]  }
 0x381   :  { %v1379_v40 = vmul.f32 %v1370_v23, %v1358_v37  ;;  %v1380_v57 = vmul.f32 %v1374_v25, %v1359_v39  ;;  %v3435_v37 = vld [vmem:[%s4831_s3 + $0x2a4] ss:$8 sps:$4 sm:$0xff]   ;;  %v3433_v39 = vld [vmem:[%s4831_s3 + $0x2a0] ss:$8 sps:$4 sm:$0xff]  }
 0x382   :  { %v3552_v41 = vpop.eup %3551 }
 0x383   :  { %v1401_v43 = vadd.f32 %v1395_v36, %v1380_v57  ;;  %v1400_v44 = vadd.f32 %v1391_v15, %v1379_v40  ;;  %v1361_v46 = vmul.f32 %v3552_v41, %v4298_v17  ;;  %v1360_v47 = vmul.f32 %v3552_v41, %v4295_v16  ;;  %v3406_v16 = vld [vmem:[%s4831_s3 + $0x210] ss:$8 sps:$4 sm:$0xff]   ;;  %v3438_v40 = vld [vmem:[%s4831_s3 + $0x2b4] ss:$8 sps:$4 sm:$0xff]   ;;  %v3441_v41 = vld [vmem:[%s4831_s3 + $0x2c4] ss:$8 sps:$4 sm:$0xff]  }
 0x384   :  { %v3436_v57 = vld [vmem:[%s4831_s3 + $0x2b0] ss:$8 sps:$4 sm:$0xff]  }
 0x385   :  { %v1407_v49 = vpack.c.bf16 %v1401_v43, %v1399_v58  ;;  %v1406_v3 = vpack.c.bf16 %v1400_v44, %v1398_v42  ;;  %v1382_v11 = vmul.f32 %v1374_v25, %v1361_v46  ;;  %v1381_v17 = vmul.f32 %v1370_v23, %v1360_v47  ;;  %v3439_v58 = vld [vmem:[%s4831_s3 + $0x2c0] ss:$8 sps:$4 sm:$0xff]   ;;  %v3444_v42 = vld [vmem:[%s4831_s3 + $0x2d4] ss:$8 sps:$4 sm:$0xff]   ;;  %v3442_v43 = vld [vmem:[%s4831_s3 + $0x2d0] ss:$8 sps:$4 sm:$0xff]  }
 0x386   :  { %v3554_v6 = vpop.eup %3553  ;;  %v3447_v44 = vld [vmem:[%s4831_s3 + $0x2e4] ss:$8 sps:$4 sm:$0xff]   ;;  %v3445_v46 = vld [vmem:[%s4831_s3 + $0x2e0] ss:$8 sps:$4 sm:$0xff]   ;;  %v3450_v47 = vld [vmem:[%s4831_s3 + $0x2f4] ss:$8 sps:$4 sm:$0xff]  }
 0x387   :  { %1646 = vmatprep.mubr.bf16.mxu0 %v1407_v49  ;;  %v1363_v10 = vmul.f32 %v3554_v6, %v4308_v21  ;;  %v1362_v12 = vmul.f32 %v3554_v6, %v4305_v1  ;;  %v1403_v19 = vadd.f32 %v1395_v36, %v1382_v11  ;;  %v1402_v21 = vadd.f32 %v1391_v15, %v1381_v17  ;;  %v3448_v49 = vld [vmem:[%s4831_s3 + $0x2f0] ss:$8 sps:$4 sm:$0xff]  }
 0x388   :  { %1647 = vmatmul.mubr.bf16.vlgmr.msra.gmra.mrb[16].mxu0 %v1406_v3 }
 0x389   :  { %2205 = vmatpush1.bf16.msra.mxu0 %v3403_v2  ;;  %v1384_v13 = vmul.f32 %v1374_v25, %v1363_v10  ;;  %v1383_v14 = vmul.f32 %v1370_v23, %v1362_v12  ;;  %v3414_v23 = vld [vmem:[%s4831_s3 + $0x234] ss:$8 sps:$4 sm:$0xff]   ;;  %v3417_v25 = vld [vmem:[%s4831_s3 + $0x244] ss:$8 sps:$4 sm:$0xff]  }
 0x38a   :  { %2206 = vmatprep.subr.bf16.mxu0 %v3408_v8  ;;  %v1442_v2 = vld [vmem:[%s4837_s8] ss:$2 sm:$0x3] }
 0x38b   :  { %v1405_v52 = vadd.f32 %v1395_v36, %v1384_v13  ;;  %v1404_v20 = vadd.f32 %v1391_v15, %v1383_v14  ;;  %v3432_v15 = vld [vmem:[%s4831_s3 + $0x294] ss:$8 sps:$4 sm:$0xff]   ;;  %v3430_v36 = vld [vmem:[%s4831_s3 + $0x290] ss:$8 sps:$4 sm:$0xff]   ;;  %v1447_v3 = vrot.slane %v1442_v2, %v3962_v48  ;;  %v1451_v6 = vrot.slane %v1442_v2, %v3967_v50  ;;  %v3465_v2 = vld [vmem:[%s4834_s7 + $0x144] ss:$8 sps:$4 sm:$0xff]  }
 0x38d   :  { %2207 = vmatpush1.bf16.msra.mxu0 %v3406_v16  ;;  %v1409_v1 = vpack.c.bf16 %v1405_v52, %v1403_v19  ;;  %v1408_v22 = vpack.c.bf16 %v1404_v20, %v1402_v21  ;;  %v2999_v21 = vld [vmem:[%s4833_s4 + $0x2] ss:$4 sm:$0x3] }
 0x38e   :  { %2208 = vmatprep.subr.bf16.mxu0 %v3411_v18  ;;  %v2037_v20 = vrot.slane %v2999_v21, %v3962_v48 }
 0x38f   :  { %1656 = vmatprep.mubr.bf16.mxu0 %v1409_v1  ;;  %v2041_v1 = vrot.slane %v2999_v21, %v3967_v50 }
 0x390   :  { %1657 = vmatmul.mubr.bf16.gmra.mrb[20].mxu0 %v1408_v22 }
 0x391   :  { %2209 = vmatpush1.bf16.msra.mxu0 %v3409_v54  ;;  %2236 = vmatprep.mubr.bf16.mxu0 %v1995_v45  ;;  %v3421_v45 = vld [vmem:[%s4831_s3 + $0x260] ss:$8 sps:$4 sm:$0xff]  }
 0x392   :  { %2210 = vmatprep.subr.bf16.mxu0 %v3414_v23 }
 0x395   :  { %2211 = vmatpush1.bf16.msra.mxu0 %v3412_v24 }
 0x396   :  { %2212 = vmatprep.subr.bf16.mxu0 %v3417_v25 }
 0x399   :  { %2213 = vmatpush1.bf16.msra.mxu0 %v3415_v26 }
 0x39a   :  { %2214 = vmatprep.subr.bf16.mxu0 %v3420_v27 }
 0x39d   :  { %2215 = vmatpush1.bf16.msra.mxu0 %v3418_v32 }
 0x39e   :  { %2216 = vmatprep.subr.bf16.mxu0 %v3423_v35 }
 0x3a1   :  { %2217 = vmatpush1.bf16.msra.mxu0 %v3421_v45 }
 0x3a2   :  { %2218 = vmatprep.subr.bf16.mxu0 %v3426_v28 }
 0x3a5   :  { %2219 = vmatpush1.bf16.msra.mxu0 %v3424_v29 }
 0x3a6   :  { %2220 = vmatprep.subr.bf16.mxu0 %v3429_v31 }
 0x3a9   :  { %2221 = vmatpush1.bf16.msra.mxu0 %v3427_v33 }
 0x3aa   :  { %2222 = vmatprep.subr.bf16.mxu0 %v3432_v15 }
 0x3ad   :  { %2223 = vmatpush1.bf16.msra.mxu0 %v3430_v36 }
 0x3ae   :  { %2224 = vmatprep.subr.bf16.mxu0 %v3435_v37 }
 0x3b1   :  { %2225 = vmatpush1.bf16.msra.mxu0 %v3433_v39 }
 0x3b2   :  { %2226 = vmatprep.subr.bf16.mxu0 %v3438_v40 }
 0x3b5   :  { %2227 = vmatpush1.bf16.msra.mxu0 %v3436_v57 }
 0x3b6   :  { %2228 = vmatprep.subr.bf16.mxu0 %v3441_v41  ;;  %v3451_v41 = vld [vmem:[%s4834_s7 + $0x100] ss:$8 sps:$4 sm:$0xff]  }
 0x3b9   :  { %2229 = vmatpush1.bf16.msra.mxu0 %v3439_v58  ;;  %v3453_v58 = vld [vmem:[%s4834_s7 + $0x104] ss:$8 sps:$4 sm:$0xff]  }
 0x3ba   :  { %2230 = vmatprep.subr.bf16.mxu0 %v3444_v42  ;;  %v3456_v42 = vld [vmem:[%s4834_s7 + $0x114] ss:$8 sps:$4 sm:$0xff]   ;;  %2573 = vmatprep.subr.bf16.mxu1 %v3453_v58 }
 0x3bb   :  { %2574 = vmatpush1.bf16.msra.mxu1 %v3451_v41 }
 0x3bc   :  { %2575 = vmatprep.subr.bf16.mxu1 %v3456_v42 }
 0x3bd   :  { %2231 = vmatpush1.bf16.msra.mxu0 %v3442_v43  ;;  %v3454_v43 = vld [vmem:[%s4834_s7 + $0x110] ss:$8 sps:$4 sm:$0xff]  }
 0x3be   :  { %2232 = vmatprep.subr.bf16.mxu0 %v3447_v44  ;;  %v3459_v44 = vld [vmem:[%s4834_s7 + $0x124] ss:$8 sps:$4 sm:$0xff]  }
 0x3bf   :  { %2576 = vmatpush1.bf16.msra.mxu1 %v3454_v43  ;;  %v3486_v43 = vld [vmem:[%s4834_s7 + $0x1b4] ss:$8 sps:$4 sm:$0xff]  }
 0x3c0   :  { %2577 = vmatprep.subr.bf16.mxu1 %v3459_v44  ;;  %v3484_v44 = vld [vmem:[%s4834_s7 + $0x1b0] ss:$8 sps:$4 sm:$0xff]  }
 0x3c1   :  { %2233 = vmatpush1.bf16.msra.mxu0 %v3445_v46  ;;  %v3457_v46 = vld [vmem:[%s4834_s7 + $0x120] ss:$8 sps:$4 sm:$0xff]  }
 0x3c2   :  { %2234 = vmatprep.subr.bf16.mxu0 %v3450_v47  ;;  %v3462_v47 = vld [vmem:[%s4834_s7 + $0x134] ss:$8 sps:$4 sm:$0xff]  }
 0x3c3   :  { %2578 = vmatpush1.bf16.msra.mxu1 %v3457_v46  ;;  %v3489_v46 = vld [vmem:[%s4834_s7 + $0x1c4] ss:$8 sps:$4 sm:$0xff]  }
 0x3c4   :  { %2579 = vmatprep.subr.bf16.mxu1 %v3462_v47  ;;  %v3487_v47 = vld [vmem:[%s4834_s7 + $0x1c0] ss:$8 sps:$4 sm:$0xff]  }
 0x3c5   :  { %2235 = vmatpush1.bf16.msra.mxu0 %v3448_v49  ;;  %v3460_v49 = vld [vmem:[%s4834_s7 + $0x130] ss:$8 sps:$4 sm:$0xff]  }
 0x3c7   :  { %2580 = vmatpush1.bf16.msra.mxu1 %v3460_v49  ;;  %v3492_v49 = vld [vmem:[%s4834_s7 + $0x1d4] ss:$8 sps:$4 sm:$0xff]  }
 0x3c8   :  { %2237 = vmatmul.mubr.bf16.vlgmr.msra.gmra.mrb[24].mxu0 %v1994_v38  ;;  %2581 = vmatprep.subr.bf16.mxu1 %v3465_v2  ;;  %v3490_v2 = vld [vmem:[%s4834_s7 + $0x1d0] ss:$8 sps:$4 sm:$0xff]  }
 0x3c9   :  { %2246 = vmatprep.mubr.bf16.mxu0 %v1997_v61 }
 0x3d0   :  { %2247 = vmatmul.mubr.bf16.gmra.mrb[28].mxu0 %v1996_v63 }
 0x45b   :  { %v1648_v8 = vpop.f32.mrb[16].mxu0 }
 0x45c   :  { %v1649_v10 = vadd.f32 %v1648_v8, %v1447_v3  ;;  %v1650_v30 = vpop.f32.mrb[17].mxu0  ;;  %v3466_v8 = vld [vmem:[%s4834_s7 + $0x150] ss:$8 sps:$4 sm:$0xff]  }
 0x45d   :  { %v1651_v34 = vadd.f32 %v1650_v30, %v1451_v6  ;;  %v1652_v38 = vpop.f32.mrb[18].mxu0  ;;  %v3469_v30 = vld [vmem:[%s4834_s7 + $0x160] ss:$8 sps:$4 sm:$0xff]  }
 0x45e   :  { %v1653_v11 = vadd.f32 %v1652_v38, %v1447_v3  ;;  %v1654_v53 = vpop.f32.mrb[19].mxu0  ;;  %v3472_v38 = vld [vmem:[%s4834_s7 + $0x170] ss:$8 sps:$4 sm:$0xff]  }
 0x45f   :  { %v3107_v56 = vpack.c.bf16 %v1651_v34, %v1649_v10  ;;  %v1655_v61 = vadd.f32 %v1654_v53, %v1451_v6  ;;  %v3471_v10 = vld [vmem:[%s4834_s7 + $0x164] ss:$8 sps:$4 sm:$0xff]   ;;  %v3474_v34 = vld [vmem:[%s4834_s7 + $0x174] ss:$8 sps:$4 sm:$0xff]   ;;  %v3475_v53 = vld [vmem:[%s4834_s7 + $0x180] ss:$8 sps:$4 sm:$0xff]  }
 0x461   :  { %1691 = vst [vmem:[%s4838_s10] sm:$0xff] %v3107_v56  ;;  %v3108_v51 = vpack.c.bf16 %v1655_v61, %v1653_v11  ;;  %v3477_v11 = vld [vmem:[%s4834_s7 + $0x184] ss:$8 sps:$4 sm:$0xff]   ;;  %v3480_v56 = vld [vmem:[%s4834_s7 + $0x194] ss:$8 sps:$4 sm:$0xff]   ;;  %v3478_v61 = vld [vmem:[%s4834_s7 + $0x190] ss:$8 sps:$4 sm:$0xff]  }
 0x463   :  { %1692 = vst [vmem:[%s4838_s10 + $0x8] sm:$0xff] %v3108_v51  ;;  %v1658_v55 = vpop.f32.mrb[20].mxu0 }
 0x464   :  { %v1659_v63 = vadd.f32 %v1658_v55, %v1447_v3  ;;  %v1660_v12 = vpop.f32.mrb[21].mxu0 }
 0x465   :  { %v1661_v17 = vadd.f32 %v1660_v12, %v1451_v6  ;;  %v1662_v16 = vpop.f32.mrb[22].mxu0 }
 0x466   :  { %v1663_v13 = vadd.f32 %v1662_v16, %v1447_v3  ;;  %v1664_v14 = vpop.f32.mrb[23].mxu0  ;;  %v3463_v3 = vld [vmem:[%s4834_s7 + $0x140] ss:$8 sps:$4 sm:$0xff]  }
 0x467   :  { %v3109_v18 = vpack.c.bf16 %v1661_v17, %v1659_v63  ;;  %v1665_v19 = vadd.f32 %v1664_v14, %v1451_v6  ;;  %v3468_v6 = vld [vmem:[%s4834_s7 + $0x154] ss:$8 sps:$4 sm:$0xff]   ;;  %2582 = vmatpush1.bf16.msra.mxu1 %v3463_v3  ;;  %v3495_v3 = vld [vmem:[%s4834_s7 + $0x1e4] ss:$8 sps:$4 sm:$0xff]  }
 0x468   :  { %2583 = vmatprep.subr.bf16.mxu1 %v3468_v6  ;;  %v3493_v6 = vld [vmem:[%s4834_s7 + $0x1e0] ss:$8 sps:$4 sm:$0xff]  }
 0x469   :  { %1693 = vst [vmem:[%s4838_s10 + $0x10] sm:$0xff] %v3109_v18  ;;  %v3110_v52 = vpack.c.bf16 %v1665_v19, %v1663_v13 }
 0x46b   :  { %1694 = vst [vmem:[%s4838_s10 + $0x18] sm:$0xff] %v3110_v52  ;;  %2584 = vmatpush1.bf16.msra.mxu1 %v3466_v8  ;;  %v380_v52 = vld [vmem:[%s4833_s4] ss:$4 sm:$0x3]  ;;  %v3496_v8 = vld [vmem:[%s4834_s7 + $0x1f0] ss:$8 sps:$4 sm:$0xff]  }
 0x46c   :  { %2585 = vmatprep.subr.bf16.mxu1 %v3471_v10  ;;  %v3498_v10 = vld [vmem:[%s4834_s7 + $0x1f4] ss:$8 sps:$4 sm:$0xff]  }
 0x46f   :  { %2586 = vmatpush1.bf16.msra.mxu1 %v3469_v30 }
 0x470   :  { %2587 = vmatprep.subr.bf16.mxu1 %v3474_v34 }
 0x473   :  { %2588 = vmatpush1.bf16.msra.mxu1 %v3472_v38 }
 0x474   :  { %2589 = vmatprep.subr.bf16.mxu1 %v3477_v11 }
 0x477   :  { %2590 = vmatpush1.bf16.msra.mxu1 %v3475_v53 }
 0x478   :  { %2591 = vmatprep.subr.bf16.mxu1 %v3480_v56 }
 0x47b   :  { %2592 = vmatpush1.bf16.msra.mxu1 %v3478_v61 }
 0x49b   :  { %v2238_v54 = vpop.f32.mrb[24].mxu0 }
 0x49c   :  { %v4527_v22 = vadd.f32 %v2238_v54, %v2037_v20  ;;  %v2240_v23 = vpop.f32.mrb[25].mxu0 }
 0x49d   :  { %v4529_v24 = vadd.f32 %v2240_v23, %v2041_v1  ;;  %v2242_v25 = vpop.f32.mrb[26].mxu0 }
 0x49e   :  { %v4531_v26 = vadd.f32 %v2242_v25, %v2037_v20  ;;  %v2244_v27 = vpop.f32.mrb[27].mxu0 }
 0x49f   :  { %v4533_v32 = vadd.f32 %v2244_v27, %v2041_v1  ;;  %v2257_v35 = vadd.f32 %v4529_v24, %v4527_v22 }
 0x4a1   :  { %2258 = vadd.xlane.f32.xlu0 %v2257_v35  ;;  %v2260_v45 = vadd.f32 %v4533_v32, %v4531_v26 }
 0x4a3   :  { %v2248_v28 = vpop.f32.mrb[28].mxu0  ;;  %2261 = vadd.xlane.f32.xlu1 %v2260_v45 }
 0x4a4   :  { %v4539_v29 = vadd.f32 %v2248_v28, %v2037_v20  ;;  %v2250_v31 = vpop.f32.mrb[29].mxu0 }
 0x4a5   :  { %v4541_v33 = vadd.f32 %v2250_v31, %v2041_v1  ;;  %v2252_v15 = vpop.f32.mrb[30].mxu0 }
 0x4a6   :  { %v4543_v36 = vadd.f32 %v2252_v15, %v2037_v20  ;;  %v2254_v37 = vpop.f32.mrb[31].mxu0 }
 0x4a7   :  { %v4545_v39 = vadd.f32 %v2254_v37, %v2041_v1  ;;  %v2263_v40 = vadd.f32 %v4541_v33, %v4539_v29 }
 0x4a9   :  { %2264 = vadd.xlane.f32.xlu0 %v2263_v40  ;;  %v2266_v57 = vadd.f32 %v4545_v39, %v4543_v36 }
 0x4ab   :  { %2267 = vadd.xlane.f32.xlu1 %v2266_v57 }
 0x52e   :  { %v2259_v51 = vpop.xlane.xlu0 %2258 }
 0x52f   :  { %v2269_v55 = vmul.f32 0.00390625, %v2259_v51 }
 0x530   :  { %v2262_v63 = vpop.xlane.xlu1 %2261 }
 0x531   :  { %v4612_v12 = vsub.f32 %v4527_v22, %v2269_v55  ;;  %v4615_v17 = vsub.f32 %v4529_v24, %v2269_v55  ;;  %v2270_v16 = vmul.f32 0.00390625, %v2262_v63  ;;  %v385_v24 = vrot.slane %v380_v52, %v3962_v48  ;;  %v3032_v63 = vld [vmem:[%s4835_s5 + $0x2] ss:$4 sm:$0x3] }
 0x533   :  { %v4618_v13 = vsub.f32 %v4531_v26, %v2270_v16  ;;  %v4621_v14 = vsub.f32 %v4533_v32, %v2270_v16  ;;  %v2281_v18 = vmul.f32 %v4612_v12, %v4612_v12  ;;  %v2282_v19 = vmul.f32 %v4615_v17, %v4615_v17 }
 0x534   :  { %v389_v26 = vrot.slane %v380_v52, %v3967_v50  ;;  %v4663_v40 = vadd.f32 %v4152_v62, %v385_v24  ;;  %v4677_v42 = vadd.f32 %v4172_v7, %v385_v24  ;;  %v3481_v7 = vld [vmem:[%s4834_s7 + $0x1a0] ss:$8 sps:$4 sm:$0xff]  }
 0x535   :  { %v2289_v21 = vadd.f32 %v2282_v19, %v2281_v18  ;;  %v2283_v20 = vmul.f32 %v4618_v13, %v4618_v13  ;;  %v2284_v1 = vmul.f32 %v4621_v14, %v4621_v14 }
 0x536   :  { %v2265_v54 = vpop.xlane.xlu0 %2264  ;;  %v4666_v57 = vadd.f32 %v4157_v0, %v389_v26  ;;  %v4680_v62 = vadd.f32 %v4177_v9, %v389_v26 }
 0x537   :  { %v2271_v22 = vmul.f32 0.00390625, %v2265_v54  ;;  %2290 = vadd.xlane.f32.xlu0 %v2289_v21  ;;  %v2292_v23 = vadd.f32 %v2284_v1, %v2283_v20  ;;  %v3033_v20 = vld [vmem:[%s4836_s6 + $0x2] ss:$4 sm:$0x3]  ;;  %v2327_v1 = vrot.slane %v3032_v63, %v3962_v48 }
 0x538   :  { %v2268_v25 = vpop.xlane.xlu1 %2267  ;;  %v608_v0 = vadd.f32 %v4666_v57, %v4663_v40  ;;  %v614_v9 = vadd.f32 %v4680_v62, %v4677_v42 }
 0x539   :  { %v4637_v27 = vsub.f32 %v4539_v29, %v2271_v22  ;;  %v4640_v32 = vsub.f32 %v4541_v33, %v2271_v22  ;;  %v2272_v35 = vmul.f32 0.00390625, %v2268_v25  ;;  %2293 = vadd.xlane.f32.xlu1 %v2292_v23  ;;  %v4653_v29 = vadd.f32 %v4145_v59, %v385_v24 }
 0x53a   :  { %v4656_v33 = vadd.f32 %v4147_v60, %v389_v26  ;;  %v4669_v59 = vadd.f32 %v4165_v4, %v385_v24  ;;  %v4672_v60 = vadd.f32 %v4167_v5, %v389_v26  ;;  %v3483_v5 = vld [vmem:[%s4834_s7 + $0x1a4] ss:$8 sps:$4 sm:$0xff]   ;;  %v2331_v22 = vrot.slane %v3032_v63, %v3967_v50 }
 0x53b   :  { %v4643_v45 = vsub.f32 %v4543_v36, %v2272_v35  ;;  %v4646_v28 = vsub.f32 %v4545_v39, %v2272_v35  ;;  %v2285_v31 = vmul.f32 %v4637_v27, %v4637_v27  ;;  %v2286_v15 = vmul.f32 %v4640_v32, %v4640_v32  ;;  %2593 = vmatprep.subr.bf16.mxu1 %v3483_v5 }
 0x53c   :  { %v605_v58 = vadd.f32 %v4656_v33, %v4653_v29  ;;  %v611_v4 = vadd.f32 %v4672_v60, %v4669_v59  ;;  %2594 = vmatpush1.bf16.msra.mxu1 %v3481_v7 }
 0x53d   :  { %v2295_v37 = vadd.f32 %v2286_v15, %v2285_v31  ;;  %v2287_v36 = vmul.f32 %v4643_v45, %v4643_v45  ;;  %v2288_v39 = vmul.f32 %v4646_v28, %v4646_v28  ;;  %2595 = vmatprep.subr.bf16.mxu1 %v3486_v43 }
 0x53f   :  { %2296 = vadd.xlane.f32.xlu0 %v2295_v37  ;;  %v2298_v41 = vadd.f32 %v2288_v39, %v2287_v36  ;;  %v2348_v37 = vrot.slane %v3033_v20, %v3962_v48  ;;  %v2352_v36 = vrot.slane %v3033_v20, %v3967_v50 }
 0x540   :  { %2596 = vmatpush1.bf16.msra.mxu1 %v3484_v44 }
 0x541   :  { %2299 = vadd.xlane.f32.xlu1 %v2298_v41  ;;  %2597 = vmatprep.subr.bf16.mxu1 %v3489_v46 }
 0x543   :  { %606 = vadd.xlane.f32.xlu0 %v605_v58 }
 0x544   :  { %2598 = vmatpush1.bf16.msra.mxu1 %v3487_v47 }
 0x545   :  { %609 = vadd.xlane.f32.xlu1 %v608_v0  ;;  %2599 = vmatprep.subr.bf16.mxu1 %v3492_v49 }
 0x547   :  { %612 = vadd.xlane.f32.xlu0 %v611_v4 }
 0x548   :  { %2600 = vmatpush1.bf16.msra.mxu1 %v3490_v2 }
 0x549   :  { %615 = vadd.xlane.f32.xlu1 %v614_v9  ;;  %2601 = vmatprep.subr.bf16.mxu1 %v3495_v3 }
 0x54c   :  { %2602 = vmatpush1.bf16.msra.mxu1 %v3493_v6 }
 0x54d   :  { %2603 = vmatprep.subr.bf16.mxu1 %v3498_v10 }
 0x550   :  { %2604 = vmatpush1.bf16.msra.mxu1 %v3496_v8 }
 0x5c4   :  { %v2291_v30 = vpop.xlane.xlu0 %2290 }
 0x5c5   :  { %v2301_v34 = vmul.f32 0.00390625, %v2291_v30 }
 0x5c6   :  { %v2294_v38 = vpop.xlane.xlu1 %2293 }
 0x5c7   :  { %v2305_v11 = vadd.f32 1e-06, %v2301_v34  ;;  %v2302_v53 = vmul.f32 0.00390625, %v2294_v38 }
 0x5c9   :  { %3555 = vrsqrt.f32 %v2305_v11  ;;  %v2306_v56 = vadd.f32 1e-06, %v2302_v53 }
 0x5cb   :  { %3557 = vrsqrt.f32 %v2306_v56 }
 0x5cc   :  { %v2297_v61 = vpop.xlane.xlu0 %2296 }
 0x5cd   :  { %v2303_v51 = vmul.f32 0.00390625, %v2297_v61 }
 0x5ce   :  { %v2300_v55 = vpop.xlane.xlu1 %2299 }
 0x5cf   :  { %v2307_v16 = vadd.f32 1e-06, %v2303_v51  ;;  %v2304_v18 = vmul.f32 0.00390625, %v2300_v55 }
 0x5d0   :  { %v607_v19 = vpop.xlane.xlu0 %606 }
 0x5d1   :  { %3559 = vrsqrt.f32 %v2307_v16  ;;  %v2308_v52 = vadd.f32 1e-06, %v2304_v18  ;;  %v618_v21 = vmul.f32 0.00390625, %v607_v19 }
 0x5d2   :  { %v610_v54 = vpop.xlane.xlu1 %609 }
 0x5d3   :  { %v3556_v23 = vpop.eup %3555  ;;  %3561 = vrsqrt.f32 %v2308_v52  ;;  %v4733_v24 = vsub.f32 %v4653_v29, %v618_v21  ;;  %v4736_v25 = vsub.f32 %v4656_v33, %v618_v21  ;;  %v619_v26 = vmul.f32 0.00390625, %v610_v54 }
 0x5d4   :  { %v2313_v35 = vmul.f32 %v3556_v23, %v4612_v12  ;;  %v613_v31 = vpop.xlane.xlu0 %612  ;;  %v2314_v15 = vmul.f32 %v3556_v23, %v4615_v17 }
 0x5d5   :  { %v3558_v39 = vpop.eup %3557  ;;  %v4743_v41 = vsub.f32 %v4663_v40, %v619_v26  ;;  %v4746_v29 = vsub.f32 %v4666_v57, %v619_v26  ;;  %v620_v58 = vmul.f32 0.00390625, %v613_v31  ;;  %v630_v33 = vmul.f32 %v4733_v24, %v4733_v24 }
 0x5d6   :  { %v2334_v0 = vmul.f32 %v2327_v1, %v2313_v35  ;;  %v2315_v12 = vmul.f32 %v3558_v39, %v4618_v13  ;;  %v616_v4 = vpop.xlane.xlu1 %615  ;;  %v631_v17 = vmul.f32 %v4736_v25, %v4736_v25  ;;  %v2316_v5 = vmul.f32 %v3558_v39, %v4621_v14 }
 0x5d7   :  { %v4755_v7 = vsub.f32 %v4669_v59, %v620_v58  ;;  %v4758_v40 = vsub.f32 %v4672_v60, %v620_v58  ;;  %v621_v57 = vmul.f32 0.00390625, %v616_v4  ;;  %v632_v9 = vmul.f32 %v4743_v41, %v4743_v41 }
 0x5d8   :  { %v2336_v43 = vmul.f32 %v2327_v1, %v2315_v12  ;;  %v638_v44 = vadd.f32 %v631_v17, %v630_v33  ;;  %v633_v13 = vmul.f32 %v4746_v29, %v4746_v29  ;;  %v2335_v46 = vmul.f32 %v2331_v22, %v2314_v15 }
 0x5d9   :  { %v4765_v47 = vsub.f32 %v4677_v42, %v621_v57  ;;  %v4768_v14 = vsub.f32 %v4680_v62, %v621_v57  ;;  %v634_v59 = vmul.f32 %v4755_v7, %v4755_v7  ;;  %v635_v60 = vmul.f32 %v4758_v40, %v4758_v40 }
 0x5da   :  { %639 = vadd.xlane.f32.xlu0 %v638_v44  ;;  %v641_v49 = vadd.f32 %v633_v13, %v632_v9  ;;  %v2337_v2 = vmul.f32 %v2331_v22, %v2316_v5  ;;  %v2355_v3 = vadd.f32 %v2348_v37, %v2334_v0  ;;  %v2357_v10 = vadd.f32 %v2348_v37, %v2336_v43  ;;  %v690_v0 = vld [vmem:[%s4836_s6] ss:$4 sm:$0x3] }
 0x5db   :  { %v3560_v6 = vpop.eup %3559  ;;  %v644_v8 = vadd.f32 %v635_v60, %v634_v59  ;;  %v636_v42 = vmul.f32 %v4765_v47, %v4765_v47  ;;  %v637_v62 = vmul.f32 %v4768_v14, %v4768_v14  ;;  %v2356_v30 = vadd.f32 %v2352_v36, %v2335_v46 }
 0x5dc   :  { %642 = vadd.xlane.f32.xlu1 %v641_v49  ;;  %v2358_v34 = vadd.f32 %v2352_v36, %v2337_v2  ;;  %v2318_v38 = vmul.f32 %v3560_v6, %v4640_v32  ;;  %v2317_v11 = vmul.f32 %v3560_v6, %v4637_v27  ;;  %v2363_v56 = vpack.c.bf16 %v2357_v10, %v2355_v3 }
 0x5dd   :  { %v3562_v53 = vpop.eup %3561  ;;  %v647_v61 = vadd.f32 %v637_v62, %v636_v42  ;;  %v695_v5 = vrot.slane %v690_v0, %v3962_v48  ;;  %v699_v57 = vrot.slane %v690_v0, %v3967_v50 }
 0x5de   :  { %645 = vadd.xlane.f32.xlu0 %v644_v8  ;;  %v2364_v51 = vpack.c.bf16 %v2358_v34, %v2356_v30  ;;  %v2320_v55 = vmul.f32 %v3562_v53, %v4646_v28  ;;  %v2339_v63 = vmul.f32 %v2331_v22, %v2318_v38  ;;  %v2319_v16 = vmul.f32 %v3562_v53, %v4643_v45 }
 0x5df   :  { %v2338_v18 = vmul.f32 %v2327_v1, %v2317_v11 }
 0x5e0   :  { %2605 = vmatprep.mubr.bf16.mxu1 %v2364_v51  ;;  %648 = vadd.xlane.f32.xlu1 %v647_v61  ;;  %v2341_v19 = vmul.f32 %v2331_v22, %v2320_v55  ;;  %v2340_v52 = vmul.f32 %v2327_v1, %v2319_v16  ;;  %v2360_v21 = vadd.f32 %v2352_v36, %v2339_v63  ;;  %v3066_v55 = vld [vmem:[%s4837_s8 + $0x1] ss:$2 sm:$0x3] }
 0x5e1   :  { %2606 = vmatmul.mubr.bf16.vlgmr.msra.gmra.mrb[24].mxu1 %v2363_v56  ;;  %v2359_v27 = vadd.f32 %v2348_v37, %v2338_v18  ;;  %v2406_v63 = vrot.slane %v3066_v55, %v3962_v48  ;;  %v2410_v16 = vrot.slane %v3066_v55, %v3967_v50 }
 0x5e2   :  { %v2362_v32 = vadd.f32 %v2352_v36, %v2341_v19  ;;  %v2361_v20 = vadd.f32 %v2348_v37, %v2340_v52  ;;  %v670_v37 = vld [vmem:[%s4835_s5] ss:$4 sm:$0x3] }
 0x5e3   :  { %v675_v12 = vrot.slane %v670_v37, %v3962_v48  ;;  %v679_v4 = vrot.slane %v670_v37, %v3967_v50 }
 0x5e4   :  { %v2366_v54 = vpack.c.bf16 %v2362_v32, %v2360_v21  ;;  %v2365_v23 = vpack.c.bf16 %v2361_v20, %v2359_v27 }
 0x5e6   :  { %2615 = vmatprep.mubr.bf16.mxu1 %v2366_v54 }
 0x5e9   :  { %2616 = vmatmul.mubr.bf16.gmra.mrb[28].mxu1 %v2365_v23 }
 0x667   :  { %v640_v26 = vpop.xlane.xlu0 %639 }
 0x668   :  { %v650_v35 = vmul.f32 0.00390625, %v640_v26 }
 0x669   :  { %v643_v28 = vpop.xlane.xlu1 %642 }
 0x66a   :  { %v654_v31 = vadd.f32 1e-06, %v650_v35  ;;  %v651_v15 = vmul.f32 0.00390625, %v643_v28 }
 0x66b   :  { %v646_v45 = vpop.xlane.xlu0 %645 }
 0x66c   :  { %3563 = vrsqrt.f32 %v654_v31  ;;  %v655_v39 = vadd.f32 1e-06, %v651_v15  ;;  %v652_v58 = vmul.f32 0.00390625, %v646_v45 }
 0x66d   :  { %v649_v22 = vpop.xlane.xlu1 %648 }
 0x66e   :  { %3565 = vrsqrt.f32 %v655_v39  ;;  %v656_v1 = vadd.f32 1e-06, %v652_v58  ;;  %v653_v33 = vmul.f32 0.00390625, %v649_v22 }
 0x670   :  { %3567 = vrsqrt.f32 %v656_v1  ;;  %v657_v36 = vadd.f32 1e-06, %v653_v33 }
 0x672   :  { %3569 = vrsqrt.f32 %v657_v36 }
 0x676   :  { %v3564_v17 = vpop.eup %3563 }
 0x677   :  { %v662_v9 = vmul.f32 %v3564_v17, %v4733_v24  ;;  %v663_v43 = vmul.f32 %v3564_v17, %v4736_v25 }
 0x678   :  { %v3566_v44 = vpop.eup %3565 }
 0x679   :  { %v682_v13 = vmul.f32 %v675_v12, %v662_v9  ;;  %v683_v46 = vmul.f32 %v679_v4, %v663_v43  ;;  %v664_v59 = vmul.f32 %v3566_v44, %v4743_v41  ;;  %v665_v60 = vmul.f32 %v3566_v44, %v4746_v29 }
 0x67a   :  { %v3568_v49 = vpop.eup %3567 }
 0x67b   :  { %v702_v2 = vadd.f32 %v695_v5, %v682_v13  ;;  %v703_v3 = vadd.f32 %v699_v57, %v683_v46  ;;  %v684_v6 = vmul.f32 %v675_v12, %v664_v59  ;;  %v685_v8 = vmul.f32 %v679_v4, %v665_v60 }
 0x67c   :  { %v3570_v10 = vpop.eup %3569  ;;  %v666_v42 = vmul.f32 %v3568_v49, %v4755_v7  ;;  %v667_v62 = vmul.f32 %v3568_v49, %v4758_v40 }
 0x67d   :  { %v3103_v24 = vpack.c.bf16 %v703_v3, %v702_v2  ;;  %v704_v30 = vadd.f32 %v695_v5, %v684_v6  ;;  %v705_v25 = vadd.f32 %v699_v57, %v685_v8  ;;  %v668_v34 = vmul.f32 %v3570_v10, %v4765_v47 }
 0x67e   :  { %v686_v38 = vmul.f32 %v675_v12, %v666_v42  ;;  %v687_v11 = vmul.f32 %v679_v4, %v667_v62  ;;  %v669_v41 = vmul.f32 %v3570_v10, %v4768_v14 }
 0x67f   :  { %734 = vst [vmem:[%s4839_s9] sm:$0xff] %v3103_v24  ;;  %v3104_v29 = vpack.c.bf16 %v705_v25, %v704_v30  ;;  %v688_v53 = vmul.f32 %v675_v12, %v668_v34 }
 0x680   :  { %v706_v56 = vadd.f32 %v695_v5, %v686_v38  ;;  %v707_v61 = vadd.f32 %v699_v57, %v687_v11  ;;  %v689_v7 = vmul.f32 %v679_v4, %v669_v41 }
 0x681   :  { %735 = vst [vmem:[%s4839_s9 + $0x8] sm:$0xff] %v3104_v29  ;;  %v708_v40 = vadd.f32 %v695_v5, %v688_v53 }
 0x682   :  { %v3105_v51 = vpack.c.bf16 %v707_v61, %v706_v56  ;;  %v709_v47 = vadd.f32 %v699_v57, %v689_v7 }
 0x684   :  { %736 = vst [vmem:[%s4839_s9 + $0x10] sm:$0xff] %v3105_v51  ;;  %v3106_v14 = vpack.c.bf16 %v709_v47, %v708_v40 }
 0x686   :  { %737 = vst [vmem:[%s4839_s9 + $0x18] sm:$0xff] %v3106_v14 }
 0x6b4   :  { %v2607_v18 = vpop.f32.mrb[24].mxu1 }
 0x6b5   :  { %v2608_v19 = vadd.f32 %v2607_v18, %v2406_v63  ;;  %v2609_v52 = vpop.f32.mrb[25].mxu1 }
 0x6b6   :  { %v2610_v21 = vadd.f32 %v2609_v52, %v2410_v16  ;;  %v2611_v32 = vpop.f32.mrb[26].mxu1 }
 0x6b7   :  { %v2612_v20 = vadd.f32 %v2611_v32, %v2406_v63  ;;  %v2613_v27 = vpop.f32.mrb[27].mxu1 }
 0x6b8   :  { %v3111_v54 = vpack.c.bf16 %v2610_v21, %v2608_v19  ;;  %v2614_v23 = vadd.f32 %v2613_v27, %v2410_v16 }
 0x6ba   :  { %2650 = vst [vmem:[%s4840_s11] sm:$0xff] %v3111_v54  ;;  %v3112_v26 = vpack.c.bf16 %v2614_v23, %v2612_v20 }
 0x6bc   :  { %2651 = vst [vmem:[%s4840_s11 + $0x8] sm:$0xff] %v3112_v26  ;;  %v2617_v48 = vpop.f32.mrb[28].mxu1 }
 0x6bd   :  { %v2618_v50 = vadd.f32 %v2617_v48, %v2406_v63  ;;  %v2619_v35 = vpop.f32.mrb[29].mxu1 }
 0x6be   :  { %v2620_v28 = vadd.f32 %v2619_v35, %v2410_v16  ;;  %v2621_v31 = vpop.f32.mrb[30].mxu1 }
 0x6bf   :  { %v2622_v15 = vadd.f32 %v2621_v31, %v2406_v63  ;;  %v2623_v45 = vpop.f32.mrb[31].mxu1 }
 0x6c0   :  { %v3113_v39 = vpack.c.bf16 %v2620_v28, %v2618_v50  ;;  %v2624_v58 = vadd.f32 %v2623_v45, %v2410_v16 }
 0x6c2   :  { %2652 = vst [vmem:[%s4840_s11 + $0x10] sm:$0xff] %v3113_v39  ;;  %v3114_v22 = vpack.c.bf16 %v2624_v58, %v2622_v15 }
 0x6c4   :  { %2653 = vst [vmem:[%s4840_s11 + $0x18] sm:$0xff] %v3114_v22 }

</bundles_post_ra>
